<compile_context>
chip_gen: v5e
topology: v5e:2x2
jax: 0.10.0
libtpu: 0.0.40
codegen_flags: <defaults>
</compile_context>

<pallas_src>
import functools

import jax
import jax.numpy as jnp
import numpy as np
from jax.experimental import pallas as pl
from jax.experimental.pallas import tpu as pltpu


# ----------------------------------------------------------------------------
# Per-generation VMEM budget
# ----------------------------------------------------------------------------
def _vmem_limit_bytes():
    # v7x: 64 MiB physical -> leave headroom for pipelined I/O blocks.
    # v5e / v6e: 128 MiB physical -> use most of it.
    try:
        kind = jax.devices()[0].device_kind.lower()
    except Exception:
        return 48 * 1024 * 1024
    if "v7" in kind or "7x" in kind:
        return 56 * 1024 * 1024
    if "v5" in kind or "v6" in kind:
        return 96 * 1024 * 1024
    return 48 * 1024 * 1024


# ----------------------------------------------------------------------------
# Fused kernel: both branches, conv_num x (dw3x3+ReLU6, pw1x1+ReLU6) + 1x1 head
# ----------------------------------------------------------------------------
def _ttf_fused_kernel(*refs, conv_num, H, W, wh_scale):
    """One grid step == one batch element.

    refs layout:
      mask_ref                       (2, 1, HW)  [left-valid, right-valid] f32 masks
      x_ref                          (1, C0, HW) NCHW input, spatial flattened on lanes
      hm branch refs:  per layer l:  dw_w (9,C,1), dw_b (C,1), pw_wT (Co,C), pw_b (Co,1)
                       then          head_wT (P_hm, Co), head_b (P_hm, 1)
      tlrb branch refs: same structure
      hm_out_ref                     (1, P_hm, HW)   lane-dense NCHW output
      tl_out_ref                     (1, 4,    HW)   lane-dense NCHW output
    """
    HW = H * W
    n_branch = 4 * conv_num + 2
    mask_ref = refs[0]
    x_ref = refs[1]
    hm_refs = refs[2:2 + n_branch]
    tl_refs = refs[2 + n_branch:2 + 2 * n_branch]
    hm_out_ref = refs[2 + 2 * n_branch]
    tl_out_ref = refs[3 + 2 * n_branch]

    left_m = mask_ref[0]    # (1, HW): 0 where x == 0   (kills the -1 column wrap)
    right_m = mask_ref[1]   # (1, HW): 0 where x == W-1 (kills the +1 column wrap)

    def pad_rows(a):
        # (C, HW) -> (C, HW + 2W + 2): one zero row (+1 element) on each side so every
        # 3x3 tap below is a static, in-bounds lane slice of length HW.
        z = jnp.zeros((a.shape[0], W + 1), jnp.float32)
        return jnp.concatenate([z, a, z], axis=1)

    def dw3x3_relu6(padded, dw_w_ref, dw_b_ref):
        # Depthwise 3x3 + bias + ReLU6 on the VPU (f32, v5e-safe).  Row out-of-range
        # taps read the zero rows; column wraps are zeroed by the two edge masks.
        acc = None
        t = 0
        for oy in (-1, 0, 1):
            for ox in (-1, 0, 1):
                s = (oy + 1) * W + (ox + 1)
                tap = padded[:, s:s + HW] * dw_w_ref[t]      # (C, HW) * (C, 1)
                if ox == -1:
                    tap = tap * left_m
                elif ox == 1:
                    tap = tap * right_m
                acc = tap if acc is None else acc + tap      # tap 0 initialises acc
                t += 1
        return jnp.clip(acc + dw_b_ref[...], 0.0, 6.0)

    x = x_ref[0]                 # (C0, HW), f32
    padded_x = pad_rows(x)       # built once, shared by both branches

    def branch(brefs):
        a = x
        padded = padded_x
        for l in range(conv_num):
            dw_w_ref, dw_b_ref, pw_wT_ref, pw_b_ref = brefs[4 * l:4 * l + 4]
            h = dw3x3_relu6(padded, dw_w_ref, dw_b_ref)
            # Pointwise 1x1 + bias + ReLU6 on the MXU, lane-dense (Co, HW) result.
            # (bf16 operands would be faster on v6e/v7x but break 1e-5 parity; gated off.)
            a = jnp.dot(pw_wT_ref[...], h, preferred_element_type=jnp.float32)
            a = jnp.clip(a + pw_b_ref[...], 0.0, 6.0)
            if l + 1 < conv_num:
                padded = pad_rows(a)
        hwT_ref, hb_ref = brefs[4 * conv_num], brefs[4 * conv_num + 1]
        # Fused 1x1 head conv, lane-dense (P, HW) == NCHW layout.
        return jnp.dot(hwT_ref[...], a, preferred_element_type=jnp.float32) + hb_ref[...]

    hm_out_ref[0] = branch(hm_refs)                    # heatmap: no activation
    tl = branch(tl_refs)
    tl_out_ref[0] = jnp.maximum(tl, 0.0) * wh_scale    # relu(tlrb) * wh_offset_base


# ----------------------------------------------------------------------------
# Wrapper around the single fused pallas_call
# ----------------------------------------------------------------------------
def _prep_branch(bp):
    """Flatten one HeadModuleLite's params into kernel-ready arrays."""
    arrs = []
    for (dw_w, dw_b, pw_w, pw_b) in bp["feat"]:
        C = dw_w.shape[-1]
        Co = pw_w.shape[1]
        arrs += [dw_w.reshape(9, C, 1),     # (tap, C, 1): channels on sublanes
                 dw_b.reshape(C, 1),
                 pw_w.T,                    # (Co, C) for (Co,C) x (C,HW) matmul
                 pw_b.reshape(Co, 1)]
    hw, hb = bp["head"]
    arrs += [hw.T, hb.reshape(-1, 1)]       # (P, Co), (P, 1)
    return arrs


def _const_spec(arr):
    # Grid-invariant weights / biases / masks (full-array blocks, constant index map).
    # TODO(synk): pipeline_mode=pl.Buffered(1) would drop their redundant double buffer.
    nd = arr.ndim
    return pl.BlockSpec(arr.shape, lambda b, _n=nd: (0,) * _n)


def ttf_head_forward(x_nchw, params, wh_offset_base=16.0):
    """Fused TTFHead forward. x_nchw: (B, C0, H, W). Returns (heatmap, reg_box) in NCHW."""
    B, C0, H, W = x_nchw.shape
    HW = H * W
    hm_p, tl_p = params["hm"], params["tlrb"]
    conv_num = len(hm_p["feat"])
    assert conv_num >= 1 and len(tl_p["feat"]) == conv_num
    P_hm = hm_p["head"][0].shape[1]
    P_tl = tl_p["head"][0].shape[1]

    # NCHW consumed directly (channels -> sublanes, H*W -> lanes): no host transpose.
    x = x_nchw.reshape(B, C0, HW).astype(jnp.float32)

    # Column-edge validity masks for the +-1 W shifts of the depthwise 3x3.
    col = np.arange(HW) % W
    masks = jnp.asarray(
        np.stack([(col != 0), (col != W - 1)]).astype(np.float32).reshape(2, 1, HW))

    inputs = [masks, x] + _prep_branch(hm_p) + _prep_branch(tl_p)
    in_specs = [_const_spec(masks),
                pl.BlockSpec((1, C0, HW), lambda b: (b, 0, 0))]
    in_specs += [_const_spec(a) for a in inputs[2:]]

    kernel = functools.partial(_ttf_fused_kernel, conv_num=conv_num, H=H, W=W,
                               wh_scale=float(wh_offset_base))

    hm, tl = pl.pallas_call(
        kernel,
        out_shape=(jax.ShapeDtypeStruct((B, P_hm, HW), jnp.float32),
                   jax.ShapeDtypeStruct((B, P_tl, HW), jnp.float32)),
        grid=(B,),
        in_specs=in_specs,
        out_specs=(pl.BlockSpec((1, P_hm, HW), lambda b: (b, 0, 0)),
                   pl.BlockSpec((1, P_tl, HW), lambda b: (b, 0, 0))),
        compiler_params=pltpu.CompilerParams(
            dimension_semantics=("parallel",),
            vmem_limit_bytes=_vmem_limit_bytes()),
    )(*inputs)

    # (B, P, H*W) is already NCHW; the reshapes are free views.
    return hm.reshape(B, P_hm, H, W), tl.reshape(B, P_tl, H, W)


# ----------------------------------------------------------------------------
# Parameter construction (deterministic, mirrors TTFHead.init_weights)
# ----------------------------------------------------------------------------
def make_head_module_params(key, ch_in, ch_out, planes_out, conv_num, head_std, head_bias):
    feat = []
    for i in range(conv_num):
        cin = ch_in if i == 0 else ch_out
        key, k1, k2 = jax.random.split(key, 3)
        dw_w = 0.01 * jax.random.normal(k1, (3, 3, cin), jnp.float32)   # normal_init std=0.01
        dw_b = jnp.zeros((cin,), jnp.float32)
        pw_w = 0.01 * jax.random.normal(k2, (cin, ch_out), jnp.float32)
        pw_b = jnp.zeros((ch_out,), jnp.float32)
        feat.append((dw_w, dw_b, pw_w, pw_b))
    key, kh = jax.random.split(key)
    head_w = head_std * jax.random.normal(kh, (ch_out, planes_out), jnp.float32)
    head_b = jnp.full((planes_out,), head_bias, jnp.float32)
    return {"feat": feat, "head": (head_w, head_b)}, key


def make_ttf_head_params(key, in_channels, hm_head_planes, wh_head_planes,
                         num_classes, conv_num):
    prob = 0.01
    d = -float(np.log((1.0 - prob) / prob))   # hm head bias, as in init_weights()
    hm_params, key = make_head_module_params(
        key, in_channels, hm_head_planes, num_classes, conv_num, 0.001, d)
    tlrb_params, key = make_head_module_params(
        key, in_channels, wh_head_planes, 4, conv_num, 0.001, 0.0)
    return {"hm": hm_params, "tlrb": tlrb_params}


# ----------------------------------------------------------------------------
# Pure-JAX reference (for correctness check)
# ----------------------------------------------------------------------------
def _ref_forward(x_nchw, params, wh_offset_base=16.0):
    def dw_ref(x, w, b):
        C = x.shape[-1]
        y = jax.lax.conv_general_dilated(
            x, w.reshape(3, 3, 1, C), (1, 1), "SAME",
            dimension_numbers=("NHWC", "HWIO", "NHWC"), feature_group_count=C)
        return jnp.clip(y + b, 0.0, 6.0)

    def pw_ref(x, w, b, act, scale):
        y = jnp.einsum("bhwc,cd->bhwd", x, w) + b
        if act == "relu6":
            y = jnp.clip(y, 0.0, 6.0)
        elif act == "relu":
            y = jnp.maximum(y, 0.0)
        return y * scale

    def module(x, p, act, scale):
        h = x
        for (dw_w, dw_b, pw_w, pw_b) in p["feat"]:
            h = dw_ref(h, dw_w, dw_b)
            h = pw_ref(h, pw_w, pw_b, "relu6", 1.0)
        hw, hb = p["head"]
        return pw_ref(h, hw, hb, act, scale)

    x = jnp.transpose(x_nchw, (0, 2, 3, 1)).astype(jnp.float32)
    hm = module(x, params["hm"], "none", 1.0)
    rb = module(x, params["tlrb"], "relu", wh_offset_base)
    return (jnp.transpose(hm, (0, 3, 1, 2)), jnp.transpose(rb, (0, 3, 1, 2)))


# ----------------------------------------------------------------------------
if __name__ == "__main__":
    # Small config consistent with the module: TTFHead(in_channels=4,
    # hm_head_planes=32, wh_head_planes=32, num_classes=8, conv_num=2, wh_offset_base=16)
    B, Cin, H, W = 2, 4, 16, 16
    num_classes, hm_planes, wh_planes, conv_num, wh_base = 8, 32, 32, 2, 16.0

    key = jax.random.PRNGKey(0)
    key, kx = jax.random.split(key)
    x = jax.random.normal(kx, (B, Cin, H, W), jnp.float32)

    params = make_ttf_head_params(key, Cin, hm_planes, wh_planes, num_classes, conv_num)

    heatmap, reg_box = jax.jit(ttf_head_forward, static_argnums=(2,))(x, params, wh_base)
    heatmap = jax.block_until_ready(heatmap)
    reg_box = jax.block_until_ready(reg_box)

    assert heatmap.shape == (B, num_classes, H, W), heatmap.shape
    assert reg_box.shape == (B, 4, H, W), reg_box.shape

    hm_ref, rb_ref = _ref_forward(x, params, wh_base)
    np.testing.assert_allclose(np.asarray(heatmap), np.asarray(hm_ref), rtol=1e-4, atol=1e-5)
    np.testing.assert_allclose(np.asarray(reg_box), np.asarray(rb_ref), rtol=1e-4, atol=1e-5)

    print("KERNEL_OK")
</pallas_src>

<mosaic_0001>
module attributes {stable_mosaic.version = 11 : i64} {
  func.func @_ttf_fused_kernel(%arg0: i32, %arg1: memref<2x1x256xf32, #tpu.memory_space<vmem>>, %arg2: memref<1x4x256xf32, #tpu.memory_space<vmem>>, %arg3: memref<9x4x1xf32, #tpu.memory_space<vmem>>, %arg4: memref<4x1xf32, #tpu.memory_space<vmem>>, %arg5: memref<32x4xf32, #tpu.memory_space<vmem>>, %arg6: memref<32x1xf32, #tpu.memory_space<vmem>>, %arg7: memref<9x32x1xf32, #tpu.memory_space<vmem>>, %arg8: memref<32x1xf32, #tpu.memory_space<vmem>>, %arg9: memref<32x32xf32, #tpu.memory_space<vmem>>, %arg10: memref<32x1xf32, #tpu.memory_space<vmem>>, %arg11: memref<8x32xf32, #tpu.memory_space<vmem>>, %arg12: memref<8x1xf32, #tpu.memory_space<vmem>>, %arg13: memref<9x4x1xf32, #tpu.memory_space<vmem>>, %arg14: memref<4x1xf32, #tpu.memory_space<vmem>>, %arg15: memref<32x4xf32, #tpu.memory_space<vmem>>, %arg16: memref<32x1xf32, #tpu.memory_space<vmem>>, %arg17: memref<9x32x1xf32, #tpu.memory_space<vmem>>, %arg18: memref<32x1xf32, #tpu.memory_space<vmem>>, %arg19: memref<32x32xf32, #tpu.memory_space<vmem>>, %arg20: memref<32x1xf32, #tpu.memory_space<vmem>>, %arg21: memref<4x32xf32, #tpu.memory_space<vmem>>, %arg22: memref<4x1xf32, #tpu.memory_space<vmem>>, %arg23: memref<1x8x256xf32, #tpu.memory_space<vmem>>, %arg24: memref<1x4x256xf32, #tpu.memory_space<vmem>>) attributes {dimension_semantics = [#tpu.dimension_semantics<parallel>], iteration_bounds = array<i64: 2>, scalar_prefetch = 0 : i64, scratch_operands = 0 : i64, tpu.core_type = #tpu.core_type<tc>, window_params = [{pipeline_mode = #tpu.pipeline_mode<synchronous>, transform_indices = @transform_0, window_bounds = array<i64: 2, 1, 256>}, {transform_indices = @transform_1, window_bounds = array<i64: 1, 4, 256>}, {pipeline_mode = #tpu.pipeline_mode<synchronous>, transform_indices = @transform_2, window_bounds = array<i64: 9, 4, 1>}, {pipeline_mode = #tpu.pipeline_mode<synchronous>, transform_indices = @transform_3, window_bounds = array<i64: 4, 1>}, {pipeline_mode = #tpu.pipeline_mode<synchronous>, transform_indices = @transform_4, window_bounds = array<i64: 32, 4>}, {pipeline_mode = #tpu.pipeline_mode<synchronous>, transform_indices = @transform_5, window_bounds = array<i64: 32, 1>}, {pipeline_mode = #tpu.pipeline_mode<synchronous>, transform_indices = @transform_6, window_bounds = array<i64: 9, 32, 1>}, {pipeline_mode = #tpu.pipeline_mode<synchronous>, transform_indices = @transform_7, window_bounds = array<i64: 32, 1>}, {pipeline_mode = #tpu.pipeline_mode<synchronous>, transform_indices = @transform_8, window_bounds = array<i64: 32, 32>}, {pipeline_mode = #tpu.pipeline_mode<synchronous>, transform_indices = @transform_9, window_bounds = array<i64: 32, 1>}, {pipeline_mode = #tpu.pipeline_mode<synchronous>, transform_indices = @transform_10, window_bounds = array<i64: 8, 32>}, {pipeline_mode = #tpu.pipeline_mode<synchronous>, transform_indices = @transform_11, window_bounds = array<i64: 8, 1>}, {pipeline_mode = #tpu.pipeline_mode<synchronous>, transform_indices = @transform_12, window_bounds = array<i64: 9, 4, 1>}, {pipeline_mode = #tpu.pipeline_mode<synchronous>, transform_indices = @transform_13, window_bounds = array<i64: 4, 1>}, {pipeline_mode = #tpu.pipeline_mode<synchronous>, transform_indices = @transform_14, window_bounds = array<i64: 32, 4>}, {pipeline_mode = #tpu.pipeline_mode<synchronous>, transform_indices = @transform_15, window_bounds = array<i64: 32, 1>}, {pipeline_mode = #tpu.pipeline_mode<synchronous>, transform_indices = @transform_16, window_bounds = array<i64: 9, 32, 1>}, {pipeline_mode = #tpu.pipeline_mode<synchronous>, transform_indices = @transform_17, window_bounds = array<i64: 32, 1>}, {pipeline_mode = #tpu.pipeline_mode<synchronous>, transform_indices = @transform_18, window_bounds = array<i64: 32, 32>}, {pipeline_mode = #tpu.pipeline_mode<synchronous>, transform_indices = @transform_19, window_bounds = array<i64: 32, 1>}, {pipeline_mode = #tpu.pipeline_mode<synchronous>, transform_indices = @transform_20, window_bounds = array<i64: 4, 32>}, {pipeline_mode = #tpu.pipeline_mode<synchronous>, transform_indices = @transform_21, window_bounds = array<i64: 4, 1>}, {transform_indices = @transform_22, window_bounds = array<i64: 1, 8, 256>}, {transform_indices = @transform_23, window_bounds = array<i64: 1, 4, 256>}]} {
    %c0 = arith.constant 0 : index
    %c0_0 = arith.constant 0 : index
    %c0_1 = arith.constant 0 : index
    %0 = vector.load %arg1[%c0, %c0_0, %c0_1] : memref<2x1x256xf32, #tpu.memory_space<vmem>>, vector<1x1x256xf32>
    %1 = vector.shape_cast %0 : vector<1x1x256xf32> to vector<1x256xf32>
    %c1 = arith.constant 1 : index
    %c0_2 = arith.constant 0 : index
    %c0_3 = arith.constant 0 : index
    %2 = vector.load %arg1[%c1, %c0_2, %c0_3] : memref<2x1x256xf32, #tpu.memory_space<vmem>>, vector<1x1x256xf32>
    %3 = vector.shape_cast %2 : vector<1x1x256xf32> to vector<1x256xf32>
    %c0_4 = arith.constant 0 : index
    %c0_5 = arith.constant 0 : index
    %c0_6 = arith.constant 0 : index
    %4 = vector.load %arg2[%c0_4, %c0_5, %c0_6] : memref<1x4x256xf32, #tpu.memory_space<vmem>>, vector<1x4x256xf32>
    %5 = vector.shape_cast %4 : vector<1x4x256xf32> to vector<4x256xf32>
    %cst = arith.constant 0.000000e+00 : f32
    %6 = vector.broadcast %cst : f32 to vector<4x17xf32>
    %7 = tpu.concatenate %6, %5, %6 in 1 : vector<4x17xf32>, vector<4x256xf32>, vector<4x17xf32> -> vector<4x290xf32>
    %8 = vector.extract_strided_slice %7 {offsets = [0, 0], sizes = [4, 256], strides = [1, 1]} : vector<4x290xf32> to vector<4x256xf32>
    %c0_7 = arith.constant 0 : index
    %c0_8 = arith.constant 0 : index
    %c0_9 = arith.constant 0 : index
    %9 = vector.load %arg3[%c0_7, %c0_8, %c0_9] : memref<9x4x1xf32, #tpu.memory_space<vmem>>, vector<1x4x1xf32>
    %10 = vector.shape_cast %9 : vector<1x4x1xf32> to vector<4x1xf32>
    %11 = vector.broadcast %10 : vector<4x1xf32> to vector<4x256xf32>
    %12 = arith.mulf %8, %11 : vector<4x256xf32>
    %13 = vector.broadcast %1 : vector<1x256xf32> to vector<4x256xf32>
    %14 = arith.mulf %12, %13 : vector<4x256xf32>
    %15 = vector.extract_strided_slice %7 {offsets = [0, 1], sizes = [4, 256], strides = [1, 1]} : vector<4x290xf32> to vector<4x256xf32>
    %c1_10 = arith.constant 1 : index
    %c0_11 = arith.constant 0 : index
    %c0_12 = arith.constant 0 : index
    %16 = vector.load %arg3[%c1_10, %c0_11, %c0_12] : memref<9x4x1xf32, #tpu.memory_space<vmem>>, vector<1x4x1xf32>
    %17 = vector.shape_cast %16 : vector<1x4x1xf32> to vector<4x1xf32>
    %18 = vector.broadcast %17 : vector<4x1xf32> to vector<4x256xf32>
    %19 = arith.mulf %15, %18 : vector<4x256xf32>
    %20 = arith.addf %14, %19 : vector<4x256xf32>
    %21 = vector.extract_strided_slice %7 {offsets = [0, 2], sizes = [4, 256], strides = [1, 1]} : vector<4x290xf32> to vector<4x256xf32>
    %c2 = arith.constant 2 : index
    %c0_13 = arith.constant 0 : index
    %c0_14 = arith.constant 0 : index
    %22 = vector.load %arg3[%c2, %c0_13, %c0_14] : memref<9x4x1xf32, #tpu.memory_space<vmem>>, vector<1x4x1xf32>
    %23 = vector.shape_cast %22 : vector<1x4x1xf32> to vector<4x1xf32>
    %24 = vector.broadcast %23 : vector<4x1xf32> to vector<4x256xf32>
    %25 = arith.mulf %21, %24 : vector<4x256xf32>
    %26 = vector.broadcast %3 : vector<1x256xf32> to vector<4x256xf32>
    %27 = arith.mulf %25, %26 : vector<4x256xf32>
    %28 = arith.addf %20, %27 : vector<4x256xf32>
    %29 = vector.extract_strided_slice %7 {offsets = [0, 16], sizes = [4, 256], strides = [1, 1]} : vector<4x290xf32> to vector<4x256xf32>
    %c3 = arith.constant 3 : index
    %c0_15 = arith.constant 0 : index
    %c0_16 = arith.constant 0 : index
    %30 = vector.load %arg3[%c3, %c0_15, %c0_16] : memref<9x4x1xf32, #tpu.memory_space<vmem>>, vector<1x4x1xf32>
    %31 = vector.shape_cast %30 : vector<1x4x1xf32> to vector<4x1xf32>
    %32 = vector.broadcast %31 : vector<4x1xf32> to vector<4x256xf32>
    %33 = arith.mulf %29, %32 : vector<4x256xf32>
    %34 = vector.broadcast %1 : vector<1x256xf32> to vector<4x256xf32>
    %35 = arith.mulf %33, %34 : vector<4x256xf32>
    %36 = arith.addf %28, %35 : vector<4x256xf32>
    %37 = vector.extract_strided_slice %7 {offsets = [0, 17], sizes = [4, 256], strides = [1, 1]} : vector<4x290xf32> to vector<4x256xf32>
    %c4 = arith.constant 4 : index
    %c0_17 = arith.constant 0 : index
    %c0_18 = arith.constant 0 : index
    %38 = vector.load %arg3[%c4, %c0_17, %c0_18] : memref<9x4x1xf32, #tpu.memory_space<vmem>>, vector<1x4x1xf32>
    %39 = vector.shape_cast %38 : vector<1x4x1xf32> to vector<4x1xf32>
    %40 = vector.broadcast %39 : vector<4x1xf32> to vector<4x256xf32>
    %41 = arith.mulf %37, %40 : vector<4x256xf32>
    %42 = arith.addf %36, %41 : vector<4x256xf32>
    %43 = vector.extract_strided_slice %7 {offsets = [0, 18], sizes = [4, 256], strides = [1, 1]} : vector<4x290xf32> to vector<4x256xf32>
    %c5 = arith.constant 5 : index
    %c0_19 = arith.constant 0 : index
    %c0_20 = arith.constant 0 : index
    %44 = vector.load %arg3[%c5, %c0_19, %c0_20] : memref<9x4x1xf32, #tpu.memory_space<vmem>>, vector<1x4x1xf32>
    %45 = vector.shape_cast %44 : vector<1x4x1xf32> to vector<4x1xf32>
    %46 = vector.broadcast %45 : vector<4x1xf32> to vector<4x256xf32>
    %47 = arith.mulf %43, %46 : vector<4x256xf32>
    %48 = vector.broadcast %3 : vector<1x256xf32> to vector<4x256xf32>
    %49 = arith.mulf %47, %48 : vector<4x256xf32>
    %50 = arith.addf %42, %49 : vector<4x256xf32>
    %51 = vector.extract_strided_slice %7 {offsets = [0, 32], sizes = [4, 256], strides = [1, 1]} : vector<4x290xf32> to vector<4x256xf32>
    %c6 = arith.constant 6 : index
    %c0_21 = arith.constant 0 : index
    %c0_22 = arith.constant 0 : index
    %52 = vector.load %arg3[%c6, %c0_21, %c0_22] : memref<9x4x1xf32, #tpu.memory_space<vmem>>, vector<1x4x1xf32>
    %53 = vector.shape_cast %52 : vector<1x4x1xf32> to vector<4x1xf32>
    %54 = vector.broadcast %53 : vector<4x1xf32> to vector<4x256xf32>
    %55 = arith.mulf %51, %54 : vector<4x256xf32>
    %56 = vector.broadcast %1 : vector<1x256xf32> to vector<4x256xf32>
    %57 = arith.mulf %55, %56 : vector<4x256xf32>
    %58 = arith.addf %50, %57 : vector<4x256xf32>
    %59 = vector.extract_strided_slice %7 {offsets = [0, 33], sizes = [4, 256], strides = [1, 1]} : vector<4x290xf32> to vector<4x256xf32>
    %c7 = arith.constant 7 : index
    %c0_23 = arith.constant 0 : index
    %c0_24 = arith.constant 0 : index
    %60 = vector.load %arg3[%c7, %c0_23, %c0_24] : memref<9x4x1xf32, #tpu.memory_space<vmem>>, vector<1x4x1xf32>
    %61 = vector.shape_cast %60 : vector<1x4x1xf32> to vector<4x1xf32>
    %62 = vector.broadcast %61 : vector<4x1xf32> to vector<4x256xf32>
    %63 = arith.mulf %59, %62 : vector<4x256xf32>
    %64 = arith.addf %58, %63 : vector<4x256xf32>
    %65 = vector.extract_strided_slice %7 {offsets = [0, 34], sizes = [4, 256], strides = [1, 1]} : vector<4x290xf32> to vector<4x256xf32>
    %c8 = arith.constant 8 : index
    %c0_25 = arith.constant 0 : index
    %c0_26 = arith.constant 0 : index
    %66 = vector.load %arg3[%c8, %c0_25, %c0_26] : memref<9x4x1xf32, #tpu.memory_space<vmem>>, vector<1x4x1xf32>
    %67 = vector.shape_cast %66 : vector<1x4x1xf32> to vector<4x1xf32>
    %68 = vector.broadcast %67 : vector<4x1xf32> to vector<4x256xf32>
    %69 = arith.mulf %65, %68 : vector<4x256xf32>
    %70 = vector.broadcast %3 : vector<1x256xf32> to vector<4x256xf32>
    %71 = arith.mulf %69, %70 : vector<4x256xf32>
    %72 = arith.addf %64, %71 : vector<4x256xf32>
    %c0_27 = arith.constant 0 : index
    %c0_28 = arith.constant 0 : index
    %73 = vector.load %arg4[%c0_27, %c0_28] : memref<4x1xf32, #tpu.memory_space<vmem>>, vector<4x1xf32>
    %74 = vector.broadcast %73 : vector<4x1xf32> to vector<4x256xf32>
    %75 = arith.addf %72, %74 : vector<4x256xf32>
    %cst_29 = arith.constant 0.000000e+00 : f32
    %cst_30 = arith.constant 6.000000e+00 : f32
    %76 = vector.broadcast %cst_29 : f32 to vector<4x256xf32>
    %77 = arith.maximumf %76, %75 : vector<4x256xf32>
    %78 = vector.broadcast %cst_30 : f32 to vector<4x256xf32>
    %79 = arith.minimumf %78, %77 : vector<4x256xf32>
    %c0_31 = arith.constant 0 : index
    %c0_32 = arith.constant 0 : index
    %80 = vector.load %arg5[%c0_31, %c0_32] : memref<32x4xf32, #tpu.memory_space<vmem>>, vector<32x4xf32>
    %cst_33 = arith.constant dense<0.000000e+00> : vector<32x256xf32>
    %81 = tpu.matmul %80, %79, %cst_33 {dimension_numbers = #tpu.dot_dimension_numbers<[1], [0], [0], [1], [0, 0, 1, 1], [], []>} : vector<32x4xf32>, vector<4x256xf32>, vector<32x256xf32> -> vector<32x256xf32>
    %c0_34 = arith.constant 0 : index
    %c0_35 = arith.constant 0 : index
    %82 = vector.load %arg6[%c0_34, %c0_35] : memref<32x1xf32, #tpu.memory_space<vmem>>, vector<32x1xf32>
    %83 = vector.broadcast %82 : vector<32x1xf32> to vector<32x256xf32>
    %84 = arith.addf %81, %83 : vector<32x256xf32>
    %cst_36 = arith.constant 0.000000e+00 : f32
    %cst_37 = arith.constant 6.000000e+00 : f32
    %85 = vector.broadcast %cst_36 : f32 to vector<32x256xf32>
    %86 = arith.maximumf %85, %84 : vector<32x256xf32>
    %87 = vector.broadcast %cst_37 : f32 to vector<32x256xf32>
    %88 = arith.minimumf %87, %86 : vector<32x256xf32>
    %cst_38 = arith.constant 0.000000e+00 : f32
    %89 = vector.broadcast %cst_38 : f32 to vector<32x17xf32>
    %90 = tpu.concatenate %89, %88, %89 in 1 : vector<32x17xf32>, vector<32x256xf32>, vector<32x17xf32> -> vector<32x290xf32>
    %91 = vector.extract_strided_slice %90 {offsets = [0, 0], sizes = [32, 256], strides = [1, 1]} : vector<32x290xf32> to vector<32x256xf32>
    %c0_39 = arith.constant 0 : index
    %c0_40 = arith.constant 0 : index
    %c0_41 = arith.constant 0 : index
    %92 = vector.load %arg7[%c0_39, %c0_40, %c0_41] : memref<9x32x1xf32, #tpu.memory_space<vmem>>, vector<1x32x1xf32>
    %93 = vector.shape_cast %92 : vector<1x32x1xf32> to vector<32x1xf32>
    %94 = vector.broadcast %93 : vector<32x1xf32> to vector<32x256xf32>
    %95 = arith.mulf %91, %94 : vector<32x256xf32>
    %96 = vector.broadcast %1 : vector<1x256xf32> to vector<32x256xf32>
    %97 = arith.mulf %95, %96 : vector<32x256xf32>
    %98 = vector.extract_strided_slice %90 {offsets = [0, 1], sizes = [32, 256], strides = [1, 1]} : vector<32x290xf32> to vector<32x256xf32>
    %c1_42 = arith.constant 1 : index
    %c0_43 = arith.constant 0 : index
    %c0_44 = arith.constant 0 : index
    %99 = vector.load %arg7[%c1_42, %c0_43, %c0_44] : memref<9x32x1xf32, #tpu.memory_space<vmem>>, vector<1x32x1xf32>
    %100 = vector.shape_cast %99 : vector<1x32x1xf32> to vector<32x1xf32>
    %101 = vector.broadcast %100 : vector<32x1xf32> to vector<32x256xf32>
    %102 = arith.mulf %98, %101 : vector<32x256xf32>
    %103 = arith.addf %97, %102 : vector<32x256xf32>
    %104 = vector.extract_strided_slice %90 {offsets = [0, 2], sizes = [32, 256], strides = [1, 1]} : vector<32x290xf32> to vector<32x256xf32>
    %c2_45 = arith.constant 2 : index
    %c0_46 = arith.constant 0 : index
    %c0_47 = arith.constant 0 : index
    %105 = vector.load %arg7[%c2_45, %c0_46, %c0_47] : memref<9x32x1xf32, #tpu.memory_space<vmem>>, vector<1x32x1xf32>
    %106 = vector.shape_cast %105 : vector<1x32x1xf32> to vector<32x1xf32>
    %107 = vector.broadcast %106 : vector<32x1xf32> to vector<32x256xf32>
    %108 = arith.mulf %104, %107 : vector<32x256xf32>
    %109 = vector.broadcast %3 : vector<1x256xf32> to vector<32x256xf32>
    %110 = arith.mulf %108, %109 : vector<32x256xf32>
    %111 = arith.addf %103, %110 : vector<32x256xf32>
    %112 = vector.extract_strided_slice %90 {offsets = [0, 16], sizes = [32, 256], strides = [1, 1]} : vector<32x290xf32> to vector<32x256xf32>
    %c3_48 = arith.constant 3 : index
    %c0_49 = arith.constant 0 : index
    %c0_50 = arith.constant 0 : index
    %113 = vector.load %arg7[%c3_48, %c0_49, %c0_50] : memref<9x32x1xf32, #tpu.memory_space<vmem>>, vector<1x32x1xf32>
    %114 = vector.shape_cast %113 : vector<1x32x1xf32> to vector<32x1xf32>
    %115 = vector.broadcast %114 : vector<32x1xf32> to vector<32x256xf32>
    %116 = arith.mulf %112, %115 : vector<32x256xf32>
    %117 = vector.broadcast %1 : vector<1x256xf32> to vector<32x256xf32>
    %118 = arith.mulf %116, %117 : vector<32x256xf32>
    %119 = arith.addf %111, %118 : vector<32x256xf32>
    %120 = vector.extract_strided_slice %90 {offsets = [0, 17], sizes = [32, 256], strides = [1, 1]} : vector<32x290xf32> to vector<32x256xf32>
    %c4_51 = arith.constant 4 : index
    %c0_52 = arith.constant 0 : index
    %c0_53 = arith.constant 0 : index
    %121 = vector.load %arg7[%c4_51, %c0_52, %c0_53] : memref<9x32x1xf32, #tpu.memory_space<vmem>>, vector<1x32x1xf32>
    %122 = vector.shape_cast %121 : vector<1x32x1xf32> to vector<32x1xf32>
    %123 = vector.broadcast %122 : vector<32x1xf32> to vector<32x256xf32>
    %124 = arith.mulf %120, %123 : vector<32x256xf32>
    %125 = arith.addf %119, %124 : vector<32x256xf32>
    %126 = vector.extract_strided_slice %90 {offsets = [0, 18], sizes = [32, 256], strides = [1, 1]} : vector<32x290xf32> to vector<32x256xf32>
    %c5_54 = arith.constant 5 : index
    %c0_55 = arith.constant 0 : index
    %c0_56 = arith.constant 0 : index
    %127 = vector.load %arg7[%c5_54, %c0_55, %c0_56] : memref<9x32x1xf32, #tpu.memory_space<vmem>>, vector<1x32x1xf32>
    %128 = vector.shape_cast %127 : vector<1x32x1xf32> to vector<32x1xf32>
    %129 = vector.broadcast %128 : vector<32x1xf32> to vector<32x256xf32>
    %130 = arith.mulf %126, %129 : vector<32x256xf32>
    %131 = vector.broadcast %3 : vector<1x256xf32> to vector<32x256xf32>
    %132 = arith.mulf %130, %131 : vector<32x256xf32>
    %133 = arith.addf %125, %132 : vector<32x256xf32>
    %134 = vector.extract_strided_slice %90 {offsets = [0, 32], sizes = [32, 256], strides = [1, 1]} : vector<32x290xf32> to vector<32x256xf32>
    %c6_57 = arith.constant 6 : index
    %c0_58 = arith.constant 0 : index
    %c0_59 = arith.constant 0 : index
    %135 = vector.load %arg7[%c6_57, %c0_58, %c0_59] : memref<9x32x1xf32, #tpu.memory_space<vmem>>, vector<1x32x1xf32>
    %136 = vector.shape_cast %135 : vector<1x32x1xf32> to vector<32x1xf32>
    %137 = vector.broadcast %136 : vector<32x1xf32> to vector<32x256xf32>
    %138 = arith.mulf %134, %137 : vector<32x256xf32>
    %139 = vector.broadcast %1 : vector<1x256xf32> to vector<32x256xf32>
    %140 = arith.mulf %138, %139 : vector<32x256xf32>
    %141 = arith.addf %133, %140 : vector<32x256xf32>
    %142 = vector.extract_strided_slice %90 {offsets = [0, 33], sizes = [32, 256], strides = [1, 1]} : vector<32x290xf32> to vector<32x256xf32>
    %c7_60 = arith.constant 7 : index
    %c0_61 = arith.constant 0 : index
    %c0_62 = arith.constant 0 : index
    %143 = vector.load %arg7[%c7_60, %c0_61, %c0_62] : memref<9x32x1xf32, #tpu.memory_space<vmem>>, vector<1x32x1xf32>
    %144 = vector.shape_cast %143 : vector<1x32x1xf32> to vector<32x1xf32>
    %145 = vector.broadcast %144 : vector<32x1xf32> to vector<32x256xf32>
    %146 = arith.mulf %142, %145 : vector<32x256xf32>
    %147 = arith.addf %141, %146 : vector<32x256xf32>
    %148 = vector.extract_strided_slice %90 {offsets = [0, 34], sizes = [32, 256], strides = [1, 1]} : vector<32x290xf32> to vector<32x256xf32>
    %c8_63 = arith.constant 8 : index
    %c0_64 = arith.constant 0 : index
    %c0_65 = arith.constant 0 : index
    %149 = vector.load %arg7[%c8_63, %c0_64, %c0_65] : memref<9x32x1xf32, #tpu.memory_space<vmem>>, vector<1x32x1xf32>
    %150 = vector.shape_cast %149 : vector<1x32x1xf32> to vector<32x1xf32>
    %151 = vector.broadcast %150 : vector<32x1xf32> to vector<32x256xf32>
    %152 = arith.mulf %148, %151 : vector<32x256xf32>
    %153 = vector.broadcast %3 : vector<1x256xf32> to vector<32x256xf32>
    %154 = arith.mulf %152, %153 : vector<32x256xf32>
    %155 = arith.addf %147, %154 : vector<32x256xf32>
    %c0_66 = arith.constant 0 : index
    %c0_67 = arith.constant 0 : index
    %156 = vector.load %arg8[%c0_66, %c0_67] : memref<32x1xf32, #tpu.memory_space<vmem>>, vector<32x1xf32>
    %157 = vector.broadcast %156 : vector<32x1xf32> to vector<32x256xf32>
    %158 = arith.addf %155, %157 : vector<32x256xf32>
    %cst_68 = arith.constant 0.000000e+00 : f32
    %cst_69 = arith.constant 6.000000e+00 : f32
    %159 = vector.broadcast %cst_68 : f32 to vector<32x256xf32>
    %160 = arith.maximumf %159, %158 : vector<32x256xf32>
    %161 = vector.broadcast %cst_69 : f32 to vector<32x256xf32>
    %162 = arith.minimumf %161, %160 : vector<32x256xf32>
    %c0_70 = arith.constant 0 : index
    %c0_71 = arith.constant 0 : index
    %163 = vector.load %arg9[%c0_70, %c0_71] : memref<32x32xf32, #tpu.memory_space<vmem>>, vector<32x32xf32>
    %cst_72 = arith.constant dense<0.000000e+00> : vector<32x256xf32>
    %164 = tpu.matmul %163, %162, %cst_72 {dimension_numbers = #tpu.dot_dimension_numbers<[1], [0], [0], [1], [0, 0, 1, 1], [], []>} : vector<32x32xf32>, vector<32x256xf32>, vector<32x256xf32> -> vector<32x256xf32>
    %c0_73 = arith.constant 0 : index
    %c0_74 = arith.constant 0 : index
    %165 = vector.load %arg10[%c0_73, %c0_74] : memref<32x1xf32, #tpu.memory_space<vmem>>, vector<32x1xf32>
    %166 = vector.broadcast %165 : vector<32x1xf32> to vector<32x256xf32>
    %167 = arith.addf %164, %166 : vector<32x256xf32>
    %cst_75 = arith.constant 0.000000e+00 : f32
    %cst_76 = arith.constant 6.000000e+00 : f32
    %168 = vector.broadcast %cst_75 : f32 to vector<32x256xf32>
    %169 = arith.maximumf %168, %167 : vector<32x256xf32>
    %170 = vector.broadcast %cst_76 : f32 to vector<32x256xf32>
    %171 = arith.minimumf %170, %169 : vector<32x256xf32>
    %c0_77 = arith.constant 0 : index
    %c0_78 = arith.constant 0 : index
    %172 = vector.load %arg11[%c0_77, %c0_78] : memref<8x32xf32, #tpu.memory_space<vmem>>, vector<8x32xf32>
    %cst_79 = arith.constant dense<0.000000e+00> : vector<8x256xf32>
    %173 = tpu.matmul %172, %171, %cst_79 {dimension_numbers = #tpu.dot_dimension_numbers<[1], [0], [0], [1], [0, 0, 1, 1], [], []>} : vector<8x32xf32>, vector<32x256xf32>, vector<8x256xf32> -> vector<8x256xf32>
    %c0_80 = arith.constant 0 : index
    %c0_81 = arith.constant 0 : index
    %174 = vector.load %arg12[%c0_80, %c0_81] : memref<8x1xf32, #tpu.memory_space<vmem>>, vector<8x1xf32>
    %175 = vector.broadcast %174 : vector<8x1xf32> to vector<8x256xf32>
    %176 = arith.addf %173, %175 : vector<8x256xf32>
    %c0_82 = arith.constant 0 : index
    %c0_83 = arith.constant 0 : index
    %c0_84 = arith.constant 0 : index
    %177 = vector.load %arg23[%c0_82, %c0_83, %c0_84] : memref<1x8x256xf32, #tpu.memory_space<vmem>>, vector<1x8x256xf32>
    %178 = vector.shape_cast %177 : vector<1x8x256xf32> to vector<8x256xf32>
    %179 = vector.shape_cast %176 : vector<8x256xf32> to vector<1x8x256xf32>
    tpu.vector_store %arg23[%c0_82, %c0_83, %c0_84], %179 {strides = array<i32>} : memref<1x8x256xf32, #tpu.memory_space<vmem>>, vector<1x8x256xf32>,
    %180 = vector.extract_strided_slice %7 {offsets = [0, 0], sizes = [4, 256], strides = [1, 1]} : vector<4x290xf32> to vector<4x256xf32>
    %c0_85 = arith.constant 0 : index
    %c0_86 = arith.constant 0 : index
    %c0_87 = arith.constant 0 : index
    %181 = vector.load %arg13[%c0_85, %c0_86, %c0_87] : memref<9x4x1xf32, #tpu.memory_space<vmem>>, vector<1x4x1xf32>
    %182 = vector.shape_cast %181 : vector<1x4x1xf32> to vector<4x1xf32>
    %183 = vector.broadcast %182 : vector<4x1xf32> to vector<4x256xf32>
    %184 = arith.mulf %180, %183 : vector<4x256xf32>
    %185 = vector.broadcast %1 : vector<1x256xf32> to vector<4x256xf32>
    %186 = arith.mulf %184, %185 : vector<4x256xf32>
    %187 = vector.extract_strided_slice %7 {offsets = [0, 1], sizes = [4, 256], strides = [1, 1]} : vector<4x290xf32> to vector<4x256xf32>
    %c1_88 = arith.constant 1 : index
    %c0_89 = arith.constant 0 : index
    %c0_90 = arith.constant 0 : index
    %188 = vector.load %arg13[%c1_88, %c0_89, %c0_90] : memref<9x4x1xf32, #tpu.memory_space<vmem>>, vector<1x4x1xf32>
    %189 = vector.shape_cast %188 : vector<1x4x1xf32> to vector<4x1xf32>
    %190 = vector.broadcast %189 : vector<4x1xf32> to vector<4x256xf32>
    %191 = arith.mulf %187, %190 : vector<4x256xf32>
    %192 = arith.addf %186, %191 : vector<4x256xf32>
    %193 = vector.extract_strided_slice %7 {offsets = [0, 2], sizes = [4, 256], strides = [1, 1]} : vector<4x290xf32> to vector<4x256xf32>
    %c2_91 = arith.constant 2 : index
    %c0_92 = arith.constant 0 : index
    %c0_93 = arith.constant 0 : index
    %194 = vector.load %arg13[%c2_91, %c0_92, %c0_93] : memref<9x4x1xf32, #tpu.memory_space<vmem>>, vector<1x4x1xf32>
    %195 = vector.shape_cast %194 : vector<1x4x1xf32> to vector<4x1xf32>
    %196 = vector.broadcast %195 : vector<4x1xf32> to vector<4x256xf32>
    %197 = arith.mulf %193, %196 : vector<4x256xf32>
    %198 = vector.broadcast %3 : vector<1x256xf32> to vector<4x256xf32>
    %199 = arith.mulf %197, %198 : vector<4x256xf32>
    %200 = arith.addf %192, %199 : vector<4x256xf32>
    %201 = vector.extract_strided_slice %7 {offsets = [0, 16], sizes = [4, 256], strides = [1, 1]} : vector<4x290xf32> to vector<4x256xf32>
    %c3_94 = arith.constant 3 : index
    %c0_95 = arith.constant 0 : index
    %c0_96 = arith.constant 0 : index
    %202 = vector.load %arg13[%c3_94, %c0_95, %c0_96] : memref<9x4x1xf32, #tpu.memory_space<vmem>>, vector<1x4x1xf32>
    %203 = vector.shape_cast %202 : vector<1x4x1xf32> to vector<4x1xf32>
    %204 = vector.broadcast %203 : vector<4x1xf32> to vector<4x256xf32>
    %205 = arith.mulf %201, %204 : vector<4x256xf32>
    %206 = vector.broadcast %1 : vector<1x256xf32> to vector<4x256xf32>
    %207 = arith.mulf %205, %206 : vector<4x256xf32>
    %208 = arith.addf %200, %207 : vector<4x256xf32>
    %209 = vector.extract_strided_slice %7 {offsets = [0, 17], sizes = [4, 256], strides = [1, 1]} : vector<4x290xf32> to vector<4x256xf32>
    %c4_97 = arith.constant 4 : index
    %c0_98 = arith.constant 0 : index
    %c0_99 = arith.constant 0 : index
    %210 = vector.load %arg13[%c4_97, %c0_98, %c0_99] : memref<9x4x1xf32, #tpu.memory_space<vmem>>, vector<1x4x1xf32>
    %211 = vector.shape_cast %210 : vector<1x4x1xf32> to vector<4x1xf32>
    %212 = vector.broadcast %211 : vector<4x1xf32> to vector<4x256xf32>
    %213 = arith.mulf %209, %212 : vector<4x256xf32>
    %214 = arith.addf %208, %213 : vector<4x256xf32>
    %215 = vector.extract_strided_slice %7 {offsets = [0, 18], sizes = [4, 256], strides = [1, 1]} : vector<4x290xf32> to vector<4x256xf32>
    %c5_100 = arith.constant 5 : index
    %c0_101 = arith.constant 0 : index
    %c0_102 = arith.constant 0 : index
    %216 = vector.load %arg13[%c5_100, %c0_101, %c0_102] : memref<9x4x1xf32, #tpu.memory_space<vmem>>, vector<1x4x1xf32>
    %217 = vector.shape_cast %216 : vector<1x4x1xf32> to vector<4x1xf32>
    %218 = vector.broadcast %217 : vector<4x1xf32> to vector<4x256xf32>
    %219 = arith.mulf %215, %218 : vector<4x256xf32>
    %220 = vector.broadcast %3 : vector<1x256xf32> to vector<4x256xf32>
    %221 = arith.mulf %219, %220 : vector<4x256xf32>
    %222 = arith.addf %214, %221 : vector<4x256xf32>
    %223 = vector.extract_strided_slice %7 {offsets = [0, 32], sizes = [4, 256], strides = [1, 1]} : vector<4x290xf32> to vector<4x256xf32>
    %c6_103 = arith.constant 6 : index
    %c0_104 = arith.constant 0 : index
    %c0_105 = arith.constant 0 : index
    %224 = vector.load %arg13[%c6_103, %c0_104, %c0_105] : memref<9x4x1xf32, #tpu.memory_space<vmem>>, vector<1x4x1xf32>
    %225 = vector.shape_cast %224 : vector<1x4x1xf32> to vector<4x1xf32>
    %226 = vector.broadcast %225 : vector<4x1xf32> to vector<4x256xf32>
    %227 = arith.mulf %223, %226 : vector<4x256xf32>
    %228 = vector.broadcast %1 : vector<1x256xf32> to vector<4x256xf32>
    %229 = arith.mulf %227, %228 : vector<4x256xf32>
    %230 = arith.addf %222, %229 : vector<4x256xf32>
    %231 = vector.extract_strided_slice %7 {offsets = [0, 33], sizes = [4, 256], strides = [1, 1]} : vector<4x290xf32> to vector<4x256xf32>
    %c7_106 = arith.constant 7 : index
    %c0_107 = arith.constant 0 : index
    %c0_108 = arith.constant 0 : index
    %232 = vector.load %arg13[%c7_106, %c0_107, %c0_108] : memref<9x4x1xf32, #tpu.memory_space<vmem>>, vector<1x4x1xf32>
    %233 = vector.shape_cast %232 : vector<1x4x1xf32> to vector<4x1xf32>
    %234 = vector.broadcast %233 : vector<4x1xf32> to vector<4x256xf32>
    %235 = arith.mulf %231, %234 : vector<4x256xf32>
    %236 = arith.addf %230, %235 : vector<4x256xf32>
    %237 = vector.extract_strided_slice %7 {offsets = [0, 34], sizes = [4, 256], strides = [1, 1]} : vector<4x290xf32> to vector<4x256xf32>
    %c8_109 = arith.constant 8 : index
    %c0_110 = arith.constant 0 : index
    %c0_111 = arith.constant 0 : index
    %238 = vector.load %arg13[%c8_109, %c0_110, %c0_111] : memref<9x4x1xf32, #tpu.memory_space<vmem>>, vector<1x4x1xf32>
    %239 = vector.shape_cast %238 : vector<1x4x1xf32> to vector<4x1xf32>
    %240 = vector.broadcast %239 : vector<4x1xf32> to vector<4x256xf32>
    %241 = arith.mulf %237, %240 : vector<4x256xf32>
    %242 = vector.broadcast %3 : vector<1x256xf32> to vector<4x256xf32>
    %243 = arith.mulf %241, %242 : vector<4x256xf32>
    %244 = arith.addf %236, %243 : vector<4x256xf32>
    %c0_112 = arith.constant 0 : index
    %c0_113 = arith.constant 0 : index
    %245 = vector.load %arg14[%c0_112, %c0_113] : memref<4x1xf32, #tpu.memory_space<vmem>>, vector<4x1xf32>
    %246 = vector.broadcast %245 : vector<4x1xf32> to vector<4x256xf32>
    %247 = arith.addf %244, %246 : vector<4x256xf32>
    %cst_114 = arith.constant 0.000000e+00 : f32
    %cst_115 = arith.constant 6.000000e+00 : f32
    %248 = vector.broadcast %cst_114 : f32 to vector<4x256xf32>
    %249 = arith.maximumf %248, %247 : vector<4x256xf32>
    %250 = vector.broadcast %cst_115 : f32 to vector<4x256xf32>
    %251 = arith.minimumf %250, %249 : vector<4x256xf32>
    %c0_116 = arith.constant 0 : index
    %c0_117 = arith.constant 0 : index
    %252 = vector.load %arg15[%c0_116, %c0_117] : memref<32x4xf32, #tpu.memory_space<vmem>>, vector<32x4xf32>
    %cst_118 = arith.constant dense<0.000000e+00> : vector<32x256xf32>
    %253 = tpu.matmul %252, %251, %cst_118 {dimension_numbers = #tpu.dot_dimension_numbers<[1], [0], [0], [1], [0, 0, 1, 1], [], []>} : vector<32x4xf32>, vector<4x256xf32>, vector<32x256xf32> -> vector<32x256xf32>
    %c0_119 = arith.constant 0 : index
    %c0_120 = arith.constant 0 : index
    %254 = vector.load %arg16[%c0_119, %c0_120] : memref<32x1xf32, #tpu.memory_space<vmem>>, vector<32x1xf32>
    %255 = vector.broadcast %254 : vector<32x1xf32> to vector<32x256xf32>
    %256 = arith.addf %253, %255 : vector<32x256xf32>
    %cst_121 = arith.constant 0.000000e+00 : f32
    %cst_122 = arith.constant 6.000000e+00 : f32
    %257 = vector.broadcast %cst_121 : f32 to vector<32x256xf32>
    %258 = arith.maximumf %257, %256 : vector<32x256xf32>
    %259 = vector.broadcast %cst_122 : f32 to vector<32x256xf32>
    %260 = arith.minimumf %259, %258 : vector<32x256xf32>
    %cst_123 = arith.constant 0.000000e+00 : f32
    %261 = vector.broadcast %cst_123 : f32 to vector<32x17xf32>
    %262 = tpu.concatenate %261, %260, %261 in 1 : vector<32x17xf32>, vector<32x256xf32>, vector<32x17xf32> -> vector<32x290xf32>
    %263 = vector.extract_strided_slice %262 {offsets = [0, 0], sizes = [32, 256], strides = [1, 1]} : vector<32x290xf32> to vector<32x256xf32>
    %c0_124 = arith.constant 0 : index
    %c0_125 = arith.constant 0 : index
    %c0_126 = arith.constant 0 : index
    %264 = vector.load %arg17[%c0_124, %c0_125, %c0_126] : memref<9x32x1xf32, #tpu.memory_space<vmem>>, vector<1x32x1xf32>
    %265 = vector.shape_cast %264 : vector<1x32x1xf32> to vector<32x1xf32>
    %266 = vector.broadcast %265 : vector<32x1xf32> to vector<32x256xf32>
    %267 = arith.mulf %263, %266 : vector<32x256xf32>
    %268 = vector.broadcast %1 : vector<1x256xf32> to vector<32x256xf32>
    %269 = arith.mulf %267, %268 : vector<32x256xf32>
    %270 = vector.extract_strided_slice %262 {offsets = [0, 1], sizes = [32, 256], strides = [1, 1]} : vector<32x290xf32> to vector<32x256xf32>
    %c1_127 = arith.constant 1 : index
    %c0_128 = arith.constant 0 : index
    %c0_129 = arith.constant 0 : index
    %271 = vector.load %arg17[%c1_127, %c0_128, %c0_129] : memref<9x32x1xf32, #tpu.memory_space<vmem>>, vector<1x32x1xf32>
    %272 = vector.shape_cast %271 : vector<1x32x1xf32> to vector<32x1xf32>
    %273 = vector.broadcast %272 : vector<32x1xf32> to vector<32x256xf32>
    %274 = arith.mulf %270, %273 : vector<32x256xf32>
    %275 = arith.addf %269, %274 : vector<32x256xf32>
    %276 = vector.extract_strided_slice %262 {offsets = [0, 2], sizes = [32, 256], strides = [1, 1]} : vector<32x290xf32> to vector<32x256xf32>
    %c2_130 = arith.constant 2 : index
    %c0_131 = arith.constant 0 : index
    %c0_132 = arith.constant 0 : index
    %277 = vector.load %arg17[%c2_130, %c0_131, %c0_132] : memref<9x32x1xf32, #tpu.memory_space<vmem>>, vector<1x32x1xf32>
    %278 = vector.shape_cast %277 : vector<1x32x1xf32> to vector<32x1xf32>
    %279 = vector.broadcast %278 : vector<32x1xf32> to vector<32x256xf32>
    %280 = arith.mulf %276, %279 : vector<32x256xf32>
    %281 = vector.broadcast %3 : vector<1x256xf32> to vector<32x256xf32>
    %282 = arith.mulf %280, %281 : vector<32x256xf32>
    %283 = arith.addf %275, %282 : vector<32x256xf32>
    %284 = vector.extract_strided_slice %262 {offsets = [0, 16], sizes = [32, 256], strides = [1, 1]} : vector<32x290xf32> to vector<32x256xf32>
    %c3_133 = arith.constant 3 : index
    %c0_134 = arith.constant 0 : index
    %c0_135 = arith.constant 0 : index
    %285 = vector.load %arg17[%c3_133, %c0_134, %c0_135] : memref<9x32x1xf32, #tpu.memory_space<vmem>>, vector<1x32x1xf32>
    %286 = vector.shape_cast %285 : vector<1x32x1xf32> to vector<32x1xf32>
    %287 = vector.broadcast %286 : vector<32x1xf32> to vector<32x256xf32>
    %288 = arith.mulf %284, %287 : vector<32x256xf32>
    %289 = vector.broadcast %1 : vector<1x256xf32> to vector<32x256xf32>
    %290 = arith.mulf %288, %289 : vector<32x256xf32>
    %291 = arith.addf %283, %290 : vector<32x256xf32>
    %292 = vector.extract_strided_slice %262 {offsets = [0, 17], sizes = [32, 256], strides = [1, 1]} : vector<32x290xf32> to vector<32x256xf32>
    %c4_136 = arith.constant 4 : index
    %c0_137 = arith.constant 0 : index
    %c0_138 = arith.constant 0 : index
    %293 = vector.load %arg17[%c4_136, %c0_137, %c0_138] : memref<9x32x1xf32, #tpu.memory_space<vmem>>, vector<1x32x1xf32>
    %294 = vector.shape_cast %293 : vector<1x32x1xf32> to vector<32x1xf32>
    %295 = vector.broadcast %294 : vector<32x1xf32> to vector<32x256xf32>
    %296 = arith.mulf %292, %295 : vector<32x256xf32>
    %297 = arith.addf %291, %296 : vector<32x256xf32>
    %298 = vector.extract_strided_slice %262 {offsets = [0, 18], sizes = [32, 256], strides = [1, 1]} : vector<32x290xf32> to vector<32x256xf32>
    %c5_139 = arith.constant 5 : index
    %c0_140 = arith.constant 0 : index
    %c0_141 = arith.constant 0 : index
    %299 = vector.load %arg17[%c5_139, %c0_140, %c0_141] : memref<9x32x1xf32, #tpu.memory_space<vmem>>, vector<1x32x1xf32>
    %300 = vector.shape_cast %299 : vector<1x32x1xf32> to vector<32x1xf32>
    %301 = vector.broadcast %300 : vector<32x1xf32> to vector<32x256xf32>
    %302 = arith.mulf %298, %301 : vector<32x256xf32>
    %303 = vector.broadcast %3 : vector<1x256xf32> to vector<32x256xf32>
    %304 = arith.mulf %302, %303 : vector<32x256xf32>
    %305 = arith.addf %297, %304 : vector<32x256xf32>
    %306 = vector.extract_strided_slice %262 {offsets = [0, 32], sizes = [32, 256], strides = [1, 1]} : vector<32x290xf32> to vector<32x256xf32>
    %c6_142 = arith.constant 6 : index
    %c0_143 = arith.constant 0 : index
    %c0_144 = arith.constant 0 : index
    %307 = vector.load %arg17[%c6_142, %c0_143, %c0_144] : memref<9x32x1xf32, #tpu.memory_space<vmem>>, vector<1x32x1xf32>
    %308 = vector.shape_cast %307 : vector<1x32x1xf32> to vector<32x1xf32>
    %309 = vector.broadcast %308 : vector<32x1xf32> to vector<32x256xf32>
    %310 = arith.mulf %306, %309 : vector<32x256xf32>
    %311 = vector.broadcast %1 : vector<1x256xf32> to vector<32x256xf32>
    %312 = arith.mulf %310, %311 : vector<32x256xf32>
    %313 = arith.addf %305, %312 : vector<32x256xf32>
    %314 = vector.extract_strided_slice %262 {offsets = [0, 33], sizes = [32, 256], strides = [1, 1]} : vector<32x290xf32> to vector<32x256xf32>
    %c7_145 = arith.constant 7 : index
    %c0_146 = arith.constant 0 : index
    %c0_147 = arith.constant 0 : index
    %315 = vector.load %arg17[%c7_145, %c0_146, %c0_147] : memref<9x32x1xf32, #tpu.memory_space<vmem>>, vector<1x32x1xf32>
    %316 = vector.shape_cast %315 : vector<1x32x1xf32> to vector<32x1xf32>
    %317 = vector.broadcast %316 : vector<32x1xf32> to vector<32x256xf32>
    %318 = arith.mulf %314, %317 : vector<32x256xf32>
    %319 = arith.addf %313, %318 : vector<32x256xf32>
    %320 = vector.extract_strided_slice %262 {offsets = [0, 34], sizes = [32, 256], strides = [1, 1]} : vector<32x290xf32> to vector<32x256xf32>
    %c8_148 = arith.constant 8 : index
    %c0_149 = arith.constant 0 : index
    %c0_150 = arith.constant 0 : index
    %321 = vector.load %arg17[%c8_148, %c0_149, %c0_150] : memref<9x32x1xf32, #tpu.memory_space<vmem>>, vector<1x32x1xf32>
    %322 = vector.shape_cast %321 : vector<1x32x1xf32> to vector<32x1xf32>
    %323 = vector.broadcast %322 : vector<32x1xf32> to vector<32x256xf32>
    %324 = arith.mulf %320, %323 : vector<32x256xf32>
    %325 = vector.broadcast %3 : vector<1x256xf32> to vector<32x256xf32>
    %326 = arith.mulf %324, %325 : vector<32x256xf32>
    %327 = arith.addf %319, %326 : vector<32x256xf32>
    %c0_151 = arith.constant 0 : index
    %c0_152 = arith.constant 0 : index
    %328 = vector.load %arg18[%c0_151, %c0_152] : memref<32x1xf32, #tpu.memory_space<vmem>>, vector<32x1xf32>
    %329 = vector.broadcast %328 : vector<32x1xf32> to vector<32x256xf32>
    %330 = arith.addf %327, %329 : vector<32x256xf32>
    %cst_153 = arith.constant 0.000000e+00 : f32
    %cst_154 = arith.constant 6.000000e+00 : f32
    %331 = vector.broadcast %cst_153 : f32 to vector<32x256xf32>
    %332 = arith.maximumf %331, %330 : vector<32x256xf32>
    %333 = vector.broadcast %cst_154 : f32 to vector<32x256xf32>
    %334 = arith.minimumf %333, %332 : vector<32x256xf32>
    %c0_155 = arith.constant 0 : index
    %c0_156 = arith.constant 0 : index
    %335 = vector.load %arg19[%c0_155, %c0_156] : memref<32x32xf32, #tpu.memory_space<vmem>>, vector<32x32xf32>
    %cst_157 = arith.constant dense<0.000000e+00> : vector<32x256xf32>
    %336 = tpu.matmul %335, %334, %cst_157 {dimension_numbers = #tpu.dot_dimension_numbers<[1], [0], [0], [1], [0, 0, 1, 1], [], []>} : vector<32x32xf32>, vector<32x256xf32>, vector<32x256xf32> -> vector<32x256xf32>
    %c0_158 = arith.constant 0 : index
    %c0_159 = arith.constant 0 : index
    %337 = vector.load %arg20[%c0_158, %c0_159] : memref<32x1xf32, #tpu.memory_space<vmem>>, vector<32x1xf32>
    %338 = vector.broadcast %337 : vector<32x1xf32> to vector<32x256xf32>
    %339 = arith.addf %336, %338 : vector<32x256xf32>
    %cst_160 = arith.constant 0.000000e+00 : f32
    %cst_161 = arith.constant 6.000000e+00 : f32
    %340 = vector.broadcast %cst_160 : f32 to vector<32x256xf32>
    %341 = arith.maximumf %340, %339 : vector<32x256xf32>
    %342 = vector.broadcast %cst_161 : f32 to vector<32x256xf32>
    %343 = arith.minimumf %342, %341 : vector<32x256xf32>
    %c0_162 = arith.constant 0 : index
    %c0_163 = arith.constant 0 : index
    %344 = vector.load %arg21[%c0_162, %c0_163] : memref<4x32xf32, #tpu.memory_space<vmem>>, vector<4x32xf32>
    %cst_164 = arith.constant dense<0.000000e+00> : vector<4x256xf32>
    %345 = tpu.matmul %344, %343, %cst_164 {dimension_numbers = #tpu.dot_dimension_numbers<[1], [0], [0], [1], [0, 0, 1, 1], [], []>} : vector<4x32xf32>, vector<32x256xf32>, vector<4x256xf32> -> vector<4x256xf32>
    %c0_165 = arith.constant 0 : index
    %c0_166 = arith.constant 0 : index
    %346 = vector.load %arg22[%c0_165, %c0_166] : memref<4x1xf32, #tpu.memory_space<vmem>>, vector<4x1xf32>
    %347 = vector.broadcast %346 : vector<4x1xf32> to vector<4x256xf32>
    %348 = arith.addf %345, %347 : vector<4x256xf32>
    %cst_167 = arith.constant 0.000000e+00 : f32
    %349 = vector.broadcast %cst_167 : f32 to vector<4x256xf32>
    %350 = arith.maximumf %348, %349 : vector<4x256xf32>
    %cst_168 = arith.constant 1.600000e+01 : f32
    %351 = vector.broadcast %cst_168 : f32 to vector<4x256xf32>
    %352 = arith.mulf %350, %351 : vector<4x256xf32>
    %c0_169 = arith.constant 0 : index
    %c0_170 = arith.constant 0 : index
    %c0_171 = arith.constant 0 : index
    %353 = vector.load %arg24[%c0_169, %c0_170, %c0_171] : memref<1x4x256xf32, #tpu.memory_space<vmem>>, vector<1x4x256xf32>
    %354 = vector.shape_cast %353 : vector<1x4x256xf32> to vector<4x256xf32>
    %355 = vector.shape_cast %352 : vector<4x256xf32> to vector<1x4x256xf32>
    tpu.vector_store %arg24[%c0_169, %c0_170, %c0_171], %355 {strides = array<i32>} : memref<1x4x256xf32, #tpu.memory_space<vmem>>, vector<1x4x256xf32>,
    return
  }
  func.func @transform_0(%arg0: i32) -> (i32, i32, i32) {
    %c0_i32 = arith.constant 0 : i32
    %c0_i32_0 = arith.constant 0 : i32
    %c0_i32_1 = arith.constant 0 : i32
    %c0_i32_2 = arith.constant 0 : i32
    return %c0_i32, %c0_i32_0, %c0_i32_1 : i32, i32, i32
  }
  func.func @transform_1(%arg0: i32) -> (i32, i32, i32) {
    %c0_i32 = arith.constant 0 : i32
    %c0_i32_0 = arith.constant 0 : i32
    %c0_i32_1 = arith.constant 0 : i32
    return %arg0, %c0_i32, %c0_i32_0 : i32, i32, i32
  }
  func.func @transform_2(%arg0: i32) -> (i32, i32, i32) {
    %c0_i32 = arith.constant 0 : i32
    %c0_i32_0 = arith.constant 0 : i32
    %c0_i32_1 = arith.constant 0 : i32
    %c0_i32_2 = arith.constant 0 : i32
    return %c0_i32, %c0_i32_0, %c0_i32_1 : i32, i32, i32
  }
  func.func @transform_3(%arg0: i32) -> (i32, i32) {
    %c0_i32 = arith.constant 0 : i32
    %c0_i32_0 = arith.constant 0 : i32
    %c0_i32_1 = arith.constant 0 : i32
    return %c0_i32, %c0_i32_0 : i32, i32
  }
  func.func @transform_4(%arg0: i32) -> (i32, i32) {
    %c0_i32 = arith.constant 0 : i32
    %c0_i32_0 = arith.constant 0 : i32
    %c0_i32_1 = arith.constant 0 : i32
    return %c0_i32, %c0_i32_0 : i32, i32
  }
  func.func @transform_5(%arg0: i32) -> (i32, i32) {
    %c0_i32 = arith.constant 0 : i32
    %c0_i32_0 = arith.constant 0 : i32
    %c0_i32_1 = arith.constant 0 : i32
    return %c0_i32, %c0_i32_0 : i32, i32
  }
  func.func @transform_6(%arg0: i32) -> (i32, i32, i32) {
    %c0_i32 = arith.constant 0 : i32
    %c0_i32_0 = arith.constant 0 : i32
    %c0_i32_1 = arith.constant 0 : i32
    %c0_i32_2 = arith.constant 0 : i32
    return %c0_i32, %c0_i32_0, %c0_i32_1 : i32, i32, i32
  }
  func.func @transform_7(%arg0: i32) -> (i32, i32) {
    %c0_i32 = arith.constant 0 : i32
    %c0_i32_0 = arith.constant 0 : i32
    %c0_i32_1 = arith.constant 0 : i32
    return %c0_i32, %c0_i32_0 : i32, i32
  }
  func.func @transform_8(%arg0: i32) -> (i32, i32) {
    %c0_i32 = arith.constant 0 : i32
    %c0_i32_0 = arith.constant 0 : i32
    %c0_i32_1 = arith.constant 0 : i32
    return %c0_i32, %c0_i32_0 : i32, i32
  }
  func.func @transform_9(%arg0: i32) -> (i32, i32) {
    %c0_i32 = arith.constant 0 : i32
    %c0_i32_0 = arith.constant 0 : i32
    %c0_i32_1 = arith.constant 0 : i32
    return %c0_i32, %c0_i32_0 : i32, i32
  }
  func.func @transform_10(%arg0: i32) -> (i32, i32) {
    %c0_i32 = arith.constant 0 : i32
    %c0_i32_0 = arith.constant 0 : i32
    %c0_i32_1 = arith.constant 0 : i32
    return %c0_i32, %c0_i32_0 : i32, i32
  }
  func.func @transform_11(%arg0: i32) -> (i32, i32) {
    %c0_i32 = arith.constant 0 : i32
    %c0_i32_0 = arith.constant 0 : i32
    %c0_i32_1 = arith.constant 0 : i32
    return %c0_i32, %c0_i32_0 : i32, i32
  }
  func.func @transform_12(%arg0: i32) -> (i32, i32, i32) {
    %c0_i32 = arith.constant 0 : i32
    %c0_i32_0 = arith.constant 0 : i32
    %c0_i32_1 = arith.constant 0 : i32
    %c0_i32_2 = arith.constant 0 : i32
    return %c0_i32, %c0_i32_0, %c0_i32_1 : i32, i32, i32
  }
  func.func @transform_13(%arg0: i32) -> (i32, i32) {
    %c0_i32 = arith.constant 0 : i32
    %c0_i32_0 = arith.constant 0 : i32
    %c0_i32_1 = arith.constant 0 : i32
    return %c0_i32, %c0_i32_0 : i32, i32
  }
  func.func @transform_14(%arg0: i32) -> (i32, i32) {
    %c0_i32 = arith.constant 0 : i32
    %c0_i32_0 = arith.constant 0 : i32
    %c0_i32_1 = arith.constant 0 : i32
    return %c0_i32, %c0_i32_0 : i32, i32
  }
  func.func @transform_15(%arg0: i32) -> (i32, i32) {
    %c0_i32 = arith.constant 0 : i32
    %c0_i32_0 = arith.constant 0 : i32
    %c0_i32_1 = arith.constant 0 : i32
    return %c0_i32, %c0_i32_0 : i32, i32
  }
  func.func @transform_16(%arg0: i32) -> (i32, i32, i32) {
    %c0_i32 = arith.constant 0 : i32
    %c0_i32_0 = arith.constant 0 : i32
    %c0_i32_1 = arith.constant 0 : i32
    %c0_i32_2 = arith.constant 0 : i32
    return %c0_i32, %c0_i32_0, %c0_i32_1 : i32, i32, i32
  }
  func.func @transform_17(%arg0: i32) -> (i32, i32) {
    %c0_i32 = arith.constant 0 : i32
    %c0_i32_0 = arith.constant 0 : i32
    %c0_i32_1 = arith.constant 0 : i32
    return %c0_i32, %c0_i32_0 : i32, i32
  }
  func.func @transform_18(%arg0: i32) -> (i32, i32) {
    %c0_i32 = arith.constant 0 : i32
    %c0_i32_0 = arith.constant 0 : i32
    %c0_i32_1 = arith.constant 0 : i32
    return %c0_i32, %c0_i32_0 : i32, i32
  }
  func.func @transform_19(%arg0: i32) -> (i32, i32) {
    %c0_i32 = arith.constant 0 : i32
    %c0_i32_0 = arith.constant 0 : i32
    %c0_i32_1 = arith.constant 0 : i32
    return %c0_i32, %c0_i32_0 : i32, i32
  }
  func.func @transform_20(%arg0: i32) -> (i32, i32) {
    %c0_i32 = arith.constant 0 : i32
    %c0_i32_0 = arith.constant 0 : i32
    %c0_i32_1 = arith.constant 0 : i32
    return %c0_i32, %c0_i32_0 : i32, i32
  }
  func.func @transform_21(%arg0: i32) -> (i32, i32) {
    %c0_i32 = arith.constant 0 : i32
    %c0_i32_0 = arith.constant 0 : i32
    %c0_i32_1 = arith.constant 0 : i32
    return %c0_i32, %c0_i32_0 : i32, i32
  }
  func.func @transform_22(%arg0: i32) -> (i32, i32, i32) {
    %c0_i32 = arith.constant 0 : i32
    %c0_i32_0 = arith.constant 0 : i32
    %c0_i32_1 = arith.constant 0 : i32
    return %arg0, %c0_i32, %c0_i32_0 : i32, i32, i32
  }
  func.func @transform_23(%arg0: i32) -> (i32, i32, i32) {
    %c0_i32 = arith.constant 0 : i32
    %c0_i32_0 = arith.constant 0 : i32
    %c0_i32_1 = arith.constant 0 : i32
    return %arg0, %c0_i32, %c0_i32_0 : i32, i32, i32
  }
}

</mosaic_0001>

<bundles_post_ra>
// kernel: ttf_head_forward.1
= control target key start
LH: loop header
LB: loop body
LE: loop exit
PB: predicated region body
PF: predicated region fallthrough
CT: control target
= control target key end

     0   :  { %s6526_s0 = inlined_call_operand.vmem [shape: f32[2,1,256], index: 0, kind: input, shape index: {}]   ;;  %s6527_s1 = inlined_call_operand.vmem [shape: f32[2,4,256], index: 1, kind: input, shape index: {}]   ;;  %s6528_s2 = inlined_call_operand.vmem [shape: f32[9,4,1], index: 2, kind: input, shape index: {}]   ;;  %s6529_s3 = inlined_call_operand.vmem [shape: f32[4,1], index: 3, kind: input, shape index: {}]   ;;  %s6530_s4 = inlined_call_operand.vmem [shape: f32[32,4], index: 4, kind: input, shape index: {}]   ;;  %s6531_s5 = inlined_call_operand.vmem [shape: f32[32,1], index: 5, kind: input, shape index: {}]   ;;  %s6532_s6 = inlined_call_operand.vmem [shape: f32[9,32,1], index: 6, kind: input, shape index: {}]   ;;  %s6533_s7 = inlined_call_operand.vmem [shape: f32[32,1], index: 7, kind: input, shape index: {}]   ;;  %s6534_s8 = inlined_call_operand.vmem [shape: f32[32,32], index: 8, kind: input, shape index: {}]   ;;  %s6535_s9 = inlined_call_operand.vmem [shape: f32[32,1], index: 9, kind: input, shape index: {}]   ;;  %s6536_s10 = inlined_call_operand.vmem [shape: f32[8,32], index: 10, kind: input, shape index: {}]   ;;  %s6537_s11 = inlined_call_operand.vmem [shape: f32[8,1], index: 11, kind: input, shape index: {}]   ;;  %s6538_s12 = inlined_call_operand.vmem [shape: f32[9,4,1], index: 12, kind: input, shape index: {}]   ;;  %s6539_s13 = inlined_call_operand.vmem [shape: f32[4,1], index: 13, kind: input, shape index: {}]   ;;  %s6540_s14 = inlined_call_operand.vmem [shape: f32[32,4], index: 14, kind: input, shape index: {}]   ;;  %s6541_s15 = inlined_call_operand.vmem [shape: f32[32,1], index: 15, kind: input, shape index: {}]   ;;  %s6542_s16 = inlined_call_operand.vmem [shape: f32[9,32,1], index: 16, kind: input, shape index: {}]   ;;  %s6543_s17 = inlined_call_operand.vmem [shape: f32[32,1], index: 17, kind: input, shape index: {}]   ;;  %s6544_s18 = inlined_call_operand.vmem [shape: f32[32,32], index: 18, kind: input, shape index: {}]   ;;  %s6545_s19 = inlined_call_operand.vmem [shape: f32[32,1], index: 19, kind: input, shape index: {}]   ;;  %s6546_s20 = inlined_call_operand.vmem [shape: f32[4,32], index: 20, kind: input, shape index: {}]   ;;  %s6547_s21 = inlined_call_operand.vmem [shape: f32[4,1], index: 21, kind: input, shape index: {}]   ;;  %s6548_s22 = inlined_call_operand.vmem [shape: f32[2,8,256], index: 22, kind: output, shape index: {0}]   ;;  %s6549_s23 = inlined_call_operand.vmem [shape: f32[2,4,256], index: 23, kind: output, shape index: {1}]  }
   0x1   :  { %6650 = sst [smem:[#allocation81_spill]] %s6526_s0 }
   0x2   :  { %6651 = sst [smem:[#allocation82_spill]] %s6527_s1 }
   0x3   :  { %6652 = sst [smem:[#allocation83_spill]] %s6528_s2 }
   0x4   :  { %6653 = sst [smem:[#allocation84_spill]] %s6529_s3 }
   0x5   :  { %6654 = sst [smem:[#allocation85_spill]] %s6530_s4  ;;  %s4198_s4 = smov 0  }
   0x6   :  { %6655 = sst [smem:[#allocation86_spill]] %s6531_s5 }
   0x7   :  { %6656 = sst [smem:[#allocation87_spill]] %s6532_s6 }
   0x8   :  { %6657 = sst [smem:[#allocation88_spill]] %s6533_s7 }
   0x9   :  { %6658 = sst [smem:[#allocation89_spill]] %s6534_s8 }
   0xa   :  { %6659 = sst [smem:[#allocation90_spill]] %s6535_s9 }
   0xb   :  { %6660 = sst [smem:[#allocation91_spill]] %s6536_s10 }
   0xc   :  { %6661 = sst [smem:[#allocation92_spill]] %s6537_s11 }
   0xd   :  { %6662 = sst [smem:[#allocation93_spill]] %s6538_s12 }
   0xe LB: > { %6663 = sst [smem:[#allocation2_spill]] %s4061_s4  ;;  %s3892_s30 = sadd.s32 4294967295, %s4061_s4   ;;  %s4061_s4 = sphi %s4198_s4, %s34_s4  }
   0xf   : > { %p3896_p0 = scmp.ge.s32.totalorder %s4061_s4, 1  ;;  %p640_p1 = scmp.lt.s32.totalorder %s4061_s4, 3 }
  0x11   : > { %p641_p2 = pnand %p3896_p0, %p640_p1 }
  0x13   : > { %644 = sbr.rel (%p641_p2) target bundleno = 2323 (0x913), region = 108 }
  0x18   : > { %s6664_s5 = sld [smem:[#allocation83_spill]]  ;;  %v4063_v2 = vmov 0   ;;  %p709_p3 = scmp.lt.s32.totalorder %s3892_s30, 1  ;;  %vm736_vm0 = vcmask 138240   ;;  %vm801_vm1 = vcmask 15360   ;;  %vm839_vm2 = vcmask 130048  }
  0x19   : > { %s6665_s2 = sld [smem:[#allocation81_spill]]  ;;  %4052 = vset.pattern.permute.xlu1 %v4063_v2  ;;  %4053 = vset.pattern.permute.xlu2 %v4063_v2  ;;  %s4064_s6 = smov 2   ;;  %vm903_vm3 = vcmask 146432   ;;  %vm941_vm4 = vcmask 261120   ;;  %vm1005_vm5 = vcmask 277504   ;;  %vm777_vm6 = vcmask 1039360  }
  0x1a   : > { %4054 = vset.pattern.permute.xlu0 %v4063_v2  ;;  %s6859_s30 = smov (!%p709_p3, %s3892_s30), 1  ;;  %s6666_s25 = sld [smem:[#allocation82_spill]]  ;;  %vm818_vm7 = vcmask 1031168   ;;  %vm856_vm8 = vcmask 916480   ;;  %vm882_vm9 = vcmask 908288   ;;  %vm920_vm10 = vcmask 900096  }
  0x1b   : > { %s6557_s28 = sshll.u32 %s6859_s30, 3  ;;  %s4065_s26 = smov 16   ;;  %vm958_vm11 = vcmask 785408   ;;  %vm984_vm12 = vcmask 777216   ;;  %vm1022_vm13 = vcmask 769024   ;;  %vm1082_vm14 = vcmask 1043456  }
  0x1c   : > { %s4067_s0 = smov 18   ;;  %s4068_s24 = smov 34   ;;  %vm1069_vm15 = vcmask 31744  }
  0x1d   : > { %s4069_s27 = smov 32   ;;  %s6564_s29 = smov 112  }
  0x1e   : > { %v743_v0 = vld [vmem:[%s6664_s5] sm:$0xf]  ;;  %v3904_v5 = vld [vmem:[%s6664_s5 + $0x4] sm:$0xf]  ;;  %v3905_v8 = vld [vmem:[%s6664_s5 + $0x8] sm:$0xf] }
  0x1f   : > { %v3903_v1 = vld [vmem:[%s6665_s2 + $0x2] sm:$0x3]  ;;  %746 = vperm.xlu1 %4052, %v743_v0   ;;  %v724_v4 = vld [vmem:[%s6665_s2] sm:$0x3]  ;;  %v3908_v10 = vld [vmem:[%s6664_s5 + $0x14] sm:$0xf] }
  0x20   : > { %v795_v3 = vperm.slane %v3903_v1, 0  ;;  %v4221_v6 = vperm.slane %v724_v4, 0  ;;  %s713_s1 = scalar_lea.vmem %s6666_s25, %s6557_s28  ;;  %s6558_s2 = smov 17   ;;  %v3906_v12 = vld [vmem:[%s6664_s5 + $0xc] sm:$0xf]  ;;  %v796_v14 = vperm.slane %v3903_v1, 1 }
  0x21   : > { %v727_v7 = vld [vmem:[%s713_s1] sm:$0xff]  ;;  %v3909_v13 = vld [vmem:[%s6664_s5 + $0x18] sm:$0xf]  ;;  %v3907_v15 = vld [vmem:[%s6664_s5 + $0x10] sm:$0xf]  ;;  %v4249_v17 = vperm.slane %v724_v4, 1 }
  0x22   : > { %797 = vrot.lane.b32.xlu2 %v795_v3, %s4064_s6  ;;  %729 = vst [vmem:[#allocation1] ss:$2 sm:$0xff] %v727_v7  ;;  %v3910_v16 = vld [vmem:[%s6664_s5 + $0x1c] sm:$0xf]  ;;  %s6668_s28 = sld [smem:[#allocation86_spill]]  ;;  %s6562_s3 = smov 110  }
  0x23   : > { %6667 = vst [vmem:[#allocation3_spill] sm:$0xff] %v4249_v17  ;;  %v3911_v20 = vld [vmem:[%s6664_s5 + $0x20] sm:$0xf]  ;;  %s6669_s1 = sld [smem:[#allocation84_spill]]  ;;  %s6560_s25 = smov 96  }
  0x24   : > { %s6688_s7 = sld [smem:[#allocation87_spill]] }
  0x25   : > { %s6690_s9 = sld [smem:[#allocation90_spill]] }
  0x26   : > { %s6691_s11 = sld [smem:[#allocation92_spill]] }
  0x27   : > { %762 = vperm.xlu1 %4052, %v3904_v5   ;;  %s6694_s12 = sld [smem:[#allocation93_spill]] }
  0x28   : > { %v1045_v18 = vld [vmem:[%s6668_s28] sm:$0xff]  ;;  %v1048_v19 = vld [vmem:[%s6668_s28 + $0x18] sm:$0xff]  ;;  %v1046_v22 = vld [vmem:[%s6668_s28 + $0x8] sm:$0xff]  ;;  %s6818_s8 = sld [smem:[#allocation89_spill]] }
  0x29   : > { %v730_v9 = vld.sshfl [vmem:[#allocation1] sm:$0xff pattern:$0x75316420]  ;;  %v731_v11 = vld.sshfl [vmem:[#allocation1 + $0x8] sm:$0xff pattern:$0x75316420] }
  0x2a   : > { %835 = vrot.lane.b32.xlu2 %v4221_v6, %s4065_s26  ;;  %732 = vrot.lane.b32.xlu0 %v730_v9, %s6558_s2  ;;  %v1029_v21 = vld [vmem:[%s6669_s1] sm:$0xf]  ;;  %v1047_v23 = vld [vmem:[%s6668_s28 + $0x10] sm:$0xff]  ;;  %s6572_s1 = smov 94   ;;  %s6826_s10 = sld [smem:[#allocation91_spill]] }
  0x2f   : > { %788 = vperm.xlu1 %4052, %v3905_v8  }
  0x32   : > { %893 = vperm.xlu2 %4053, %v3908_v10   ;;  %734 = vrot.lane.b32.xlu0 %v731_v11, %s6558_s2  ;;  %s6574_s2 = smov 127  }
  0x37   : > { %829 = vperm.xlu1 %4052, %v3906_v12  }
  0x3a   : > { %931 = vperm.xlu2 %4053, %v3909_v13   ;;  %799 = vrot.lane.b32.xlu0 %v796_v14, %s4064_s6  ;;  %s6700_s6 = smov 17  }
  0x3f   : > { %867 = vperm.xlu1 %4052, %v3907_v15  }
  0x42   : > { %969 = vperm.xlu2 %4053, %v3910_v16   ;;  %837 = vrot.lane.b32.xlu0 %v4249_v17, %s4065_s26  ;;  %s6570_s26 = smov 126  }
  0x47   : > { %901 = vrot.lane.b32.xlu1 %v796_v14, %s4067_s0 }
  0x4a   : > { %1003 = vrot.lane.b32.xlu2 %v796_v14, %s4068_s24  ;;  %899 = vrot.lane.b32.xlu0 %v795_v3, %s4067_s0  ;;  %s6713_s0 = smov 96  }
  0x4f   : > { %939 = vrot.lane.b32.xlu1 %v4249_v17, %s4069_s27 }
  0x52   : > { %1051 = vperm.xlu2 %4053, %v1045_v18   ;;  %937 = vrot.lane.b32.xlu0 %v4221_v6, %s4069_s27  ;;  %s6566_s27 = smov 95  }
  0x57   : > { %1001 = vrot.lane.b32.xlu1 %v795_v3, %s4068_s24  ;;  %s6568_s24 = smov 111  }
  0x5a   : > { %1066 = vperm.xlu2 %4053, %v1048_v19   ;;  %995 = vperm.xlu0 %4054, %v3911_v20  }
  0x5f   : > { %1032 = vperm.xlu1 %4052, %v1029_v21  }
  0x62   : > { %1056 = vperm.xlu0 %4054, %v1046_v22  }
  0x67   : > { %1061 = vperm.xlu1 %4052, %v1047_v23  }
  0x7c   : > { %v4272_v24 = vpop.permute.xlu2 %797 }
  0x7d   : > { %6670 = vst [vmem:[#allocation4_spill] sm:$0xff] %v4272_v24 }
  0x84   : > { %v4276_v27 = vpop.permute.xlu2 %835 }
  0x85   : > { %6671 = vst [vmem:[#allocation5_spill] sm:$0xff] %v4276_v27 }
  0x8c   : > { %v894_v32 = vpop.permute.xlu2 %893 }
  0x91   : > { %v4274_v25 = vpop.permute.xlu1 %746 }
  0x94   : > { %v4293_v39 = vpop.permute.xlu2 %931 }
  0x99   : > { %v763_v26 = vpop.permute.xlu1 %762 }
  0x9c   : > { %v733_v28 = vpop.permute.xlu0 %732  ;;  %v970_v45 = vpop.permute.xlu2 %969 }
  0x9d   : > { %v4279_v29 = vsel %vm736_vm0, 0.0, %v733_v28 }
  0x9e   : > { %6672 = vst [vmem:[#allocation6_spill] sm:$0xff] %v4279_v29  ;;  %v765_v31 = vmul.f32 %v763_v26, %v4279_v29  ;;  %v972_v47 = vmul.f32 %v970_v45, %v4279_v29  ;;  %v896_v7 = vmul.f32 %v894_v32, %v4279_v29  ;;  %v934_v15 = vmul.f32 %v4293_v39, %v4279_v29 }
  0xa0   : > { %771 = vrot.lane.b32.xlu2 %v765_v31, %s6574_s2 }
  0xa1   : > { %v789_v30 = vpop.permute.xlu1 %788 }
  0xa2   : > { %v791_v50 = vmul.f32 %v789_v30, %v4279_v29 }
  0xa4   : > { %v735_v33 = vpop.permute.xlu0 %734  ;;  %v806_v54 = vmul.f32 %v4272_v24, %v791_v50  ;;  %v4377_v23 = vpop.permute.xlu2 %1003  ;;  %v3929_v50 = vld [vmem:[%s6688_s7 + $0x58] sm:$0xff] }
  0xa5   : > { %v4284_v34 = vsel %vm736_vm0, %v733_v28, %v735_v33  ;;  %v4287_v35 = vsel %vm736_vm0, %v735_v33, 0.0  ;;  %6685 = vst [vmem:[#allocation19_spill] sm:$0xff] %v4377_v23 }
  0xa6   : > { %6673 = vst [vmem:[#allocation7_spill] sm:$0xff] %v4284_v34  ;;  %v767_v37 = vmul.f32 %v763_v26, %v4287_v35  ;;  %v766_v38 = vmul.f32 %v763_v26, %v4284_v34  ;;  %v973_v46 = vmul.f32 %v970_v45, %v4284_v34  ;;  %v974_v48 = vmul.f32 %v970_v45, %v4287_v35  ;;  %v3926_v45 = vld [vmem:[%s6688_s7 + $0x40] sm:$0xff] }
  0xa7   : > { %6674 = vst [vmem:[#allocation8_spill] sm:$0xff] %v4287_v35  ;;  %v793_v51 = vmul.f32 %v789_v30, %v4287_v35  ;;  %v792_v53 = vmul.f32 %v789_v30, %v4284_v34  ;;  %v898_v3 = vmul.f32 %v894_v32, %v4287_v35  ;;  %v897_v4 = vmul.f32 %v894_v32, %v4284_v34 }
  0xa8   : > { %775 = vrot.lane.b32.xlu0 %v767_v37, %s6574_s2  ;;  %773 = vrot.lane.b32.xlu2 %v766_v38, %s6574_s2  ;;  %v936_v13 = vmul.f32 %v4293_v39, %v4287_v35  ;;  %v935_v14 = vmul.f32 %v4293_v39, %v4284_v34  ;;  %v1213_v37 = vld [vmem:[%s6688_s7 + $0x10] sm:$0xff]  ;;  %v1211_v38 = vld [vmem:[%s6688_s7] sm:$0xff]  ;;  %s6710_s2 = smov 112  }
  0xa9   : > { %v830_v36 = vpop.permute.xlu1 %829  ;;  %v3922_v39 = vld [vmem:[%s6688_s7 + $0x20] sm:$0xff] }
  0xaa   : > { %v832_v57 = vmul.f32 %v830_v36, %v4279_v29  ;;  %v834_v59 = vmul.f32 %v830_v36, %v4287_v35  ;;  %v833_v61 = vmul.f32 %v830_v36, %v4284_v34  ;;  %v1212_v36 = vld [vmem:[%s6688_s7 + $0x8] sm:$0xff] }
  0xac   : > { %v4298_v44 = vpop.permute.xlu0 %799  ;;  %v844_v62 = vmul.f32 %v4276_v27, %v832_v57 }
  0xad   : > { %6675 = vst [vmem:[#allocation9_spill] sm:$0xff] %v4298_v44  ;;  %v4315_v52 = vsel %vm801_vm1, %v4272_v24, %v4298_v44  ;;  %v808_v55 = vmul.f32 %v4298_v44, %v793_v51  ;;  %v3927_v51 = vld [vmem:[%s6688_s7 + $0x48] sm:$0xff] }
  0xae   : > { %6677 = vst [vmem:[#allocation11_spill] sm:$0xff] %v4315_v52  ;;  %v807_v56 = vmul.f32 %v4315_v52, %v792_v53 }
  0xb1   : > { %v868_v40 = vpop.permute.xlu1 %867 }
  0xb2   : > { %v872_v41 = vmul.f32 %v868_v40, %v4287_v35  ;;  %v871_v42 = vmul.f32 %v868_v40, %v4284_v34  ;;  %v870_v43 = vmul.f32 %v868_v40, %v4279_v29  ;;  %v3923_v40 = vld [vmem:[%s6688_s7 + $0x28] sm:$0xff] }
  0xb4   : > { %880 = vrot.lane.b32.xlu1 %v872_v41, %s6568_s24  ;;  %878 = vrot.lane.b32.xlu0 %v871_v42, %s6568_s24  ;;  %v4308_v49 = vpop.permute.xlu0 %837  ;;  %v1214_v41 = vld [vmem:[%s6688_s7 + $0x18] sm:$0xff]  ;;  %v4410_v42 = vpop.permute.xlu2 %1051 }
  0xb5   : > { %876 = vrot.lane.b32.xlu2 %v870_v43, %s6568_s24  ;;  %6676 = vst [vmem:[#allocation10_spill] sm:$0xff] %v4308_v49  ;;  %v4330_v60 = vsel %vm839_vm2, %v4276_v27, %v4308_v49  ;;  %v846_v63 = vmul.f32 %v4308_v49, %v834_v59  ;;  %v3925_v43 = vld [vmem:[%s6688_s7 + $0x38] sm:$0xff]  ;;  %v3934_v59 = vld [vmem:[%s6688_s7 + $0x80] sm:$0xff]  ;;  %s6693_s24 = sld [smem:[#allocation85_spill]] }
  0xb6   : > { %6679 = vst [vmem:[#allocation13_spill] sm:$0xff] %v4330_v60  ;;  %v845_v1 = vmul.f32 %v4330_v60, %v833_v61  ;;  %v3935_v61 = vld [vmem:[%s6688_s7 + $0x88] sm:$0xff] }
  0xb9   : > { %v4335_v0 = vpop.permute.xlu1 %901 }
  0xba   : > { %6680 = vst [vmem:[#allocation14_spill] sm:$0xff] %v4335_v0  ;;  %v910_v8 = vmul.f32 %v4335_v0, %v898_v3 }
  0xbc   : > { %980 = vrot.lane.b32.xlu1 %v973_v46, %s6566_s27  ;;  %978 = vrot.lane.b32.xlu0 %v972_v47, %s6566_s27  ;;  %v4325_v58 = vpop.permute.xlu0 %899  ;;  %v3924_v46 = vld [vmem:[%s6688_s7 + $0x30] sm:$0xff]  ;;  %v4421_v47 = vpop.permute.xlu2 %1066 }
  0xbd   : > { %982 = vrot.lane.b32.xlu2 %v974_v48, %s6566_s27  ;;  %6678 = vst [vmem:[#allocation12_spill] sm:$0xff] %v4325_v58  ;;  %v4343_v2 = vsel %vm903_vm3, %v4325_v58, %v4335_v0  ;;  %v908_v10 = vmul.f32 %v4325_v58, %v896_v7  ;;  %v3928_v48 = vld [vmem:[%s6688_s7 + $0x50] sm:$0xff]  ;;  %v3938_v7 = vld [vmem:[%s6688_s7 + $0xa0] sm:$0xff]  ;;  %s6707_s27 = smov 126  }
  0xbe   : > { %6681 = vst [vmem:[#allocation15_spill] sm:$0xff] %v4343_v2  ;;  %v909_v9 = vmul.f32 %v4343_v2, %v897_v4  ;;  %v3937_v4 = vld [vmem:[%s6688_s7 + $0x98] sm:$0xff] }
  0xc1   : > { %v4355_v11 = vpop.permute.xlu1 %939 }
  0xc2   : > { %6683 = vst [vmem:[#allocation17_spill] sm:$0xff] %v4355_v11  ;;  %v948_v16 = vmul.f32 %v4355_v11, %v936_v13  ;;  %v3940_v13 = vld [vmem:[%s6688_s7 + $0xb0] sm:$0xff] }
  0xc4   : > { %812 = vrot.lane.b32.xlu1 %v806_v54, %s6570_s26  ;;  %816 = vrot.lane.b32.xlu0 %v808_v55, %s6570_s26  ;;  %v4347_v5 = vpop.permute.xlu0 %937  ;;  %v3931_v54 = vld [vmem:[%s6688_s7 + $0x68] sm:$0xff]  ;;  %v3932_v55 = vld [vmem:[%s6688_s7 + $0x70] sm:$0xff] }
  0xc5   : > { %814 = vrot.lane.b32.xlu2 %v807_v56, %s6570_s26  ;;  %6682 = vst [vmem:[#allocation16_spill] sm:$0xff] %v4347_v5  ;;  %v4361_v12 = vsel %vm941_vm4, %v4347_v5, %v4355_v11  ;;  %v946_v20 = vmul.f32 %v4347_v5, %v934_v15  ;;  %v3930_v56 = vld [vmem:[%s6688_s7 + $0x60] sm:$0xff]  ;;  %v3939_v15 = vld [vmem:[%s6688_s7 + $0xa8] sm:$0xff]  ;;  %s6709_s26 = smov 95  }
  0xc6   : > { %6684 = vst [vmem:[#allocation18_spill] sm:$0xff] %v4361_v12  ;;  %v947_v18 = vmul.f32 %v4361_v12, %v935_v14  ;;  %v3941_v14 = vld [vmem:[%s6688_s7 + $0xb8] sm:$0xff] }
  0xc9   : > { %v4379_v26 = vpop.permute.xlu1 %1001 }
  0xca   : > { %6686 = vst [vmem:[#allocation20_spill] sm:$0xff] %v4379_v26  ;;  %v4384_v30 = vsel %vm1005_vm5, %v4379_v26, %v4377_v23 }
  0xcb   : > { %6687 = vst [vmem:[#allocation21_spill] sm:$0xff] %v4384_v30 }
  0xcc   : > { %850 = vrot.lane.b32.xlu1 %v844_v62, %s6564_s29  ;;  %854 = vrot.lane.b32.xlu0 %v846_v63, %s6564_s29  ;;  %v996_v19 = vpop.permute.xlu0 %995  ;;  %v3933_v62 = vld [vmem:[%s6688_s7 + $0x78] sm:$0xff] }
  0xcd   : > { %852 = vrot.lane.b32.xlu2 %v845_v1, %s6564_s29  ;;  %v998_v21 = vmul.f32 %v996_v19, %v4279_v29  ;;  %v1000_v22 = vmul.f32 %v996_v19, %v4287_v35  ;;  %v999_v28 = vmul.f32 %v996_v19, %v4284_v34  ;;  %s6708_s29 = smov 111  }
  0xcf   : > { %v1012_v31 = vmul.f32 %v4377_v23, %v1000_v22  ;;  %v1010_v32 = vmul.f32 %v4379_v26, %v998_v21  ;;  %v1011_v33 = vmul.f32 %v4384_v30, %v999_v28  ;;  %v3944_v21 = vld [vmem:[%s6688_s7 + $0xd0] sm:$0xff]  ;;  %v3942_v22 = vld [vmem:[%s6688_s7 + $0xc0] sm:$0xff] }
  0xd1   : > { %v4454_v63 = vpop.permute.xlu1 %1032 }
  0xd4   : > { %918 = vrot.lane.b32.xlu1 %v910_v8, %s6562_s3  ;;  %916 = vrot.lane.b32.xlu0 %v909_v9, %s6562_s3  ;;  %v4456_v1 = vpop.permute.xlu0 %1056  ;;  %v3936_v8 = vld [vmem:[%s6688_s7 + $0x90] sm:$0xff] }
  0xd5   : > { %914 = vrot.lane.b32.xlu2 %v908_v10, %s6562_s3  ;;  %s6689_s3 = sld [smem:[#allocation88_spill]] }
  0xd9   : > { %v4469_v9 = vpop.permute.xlu1 %1061 }
  0xdc   : > { %956 = vrot.lane.b32.xlu1 %v948_v16, %s6560_s25  ;;  %954 = vrot.lane.b32.xlu0 %v947_v18, %s6560_s25 }
  0xdd   : > { %952 = vrot.lane.b32.xlu2 %v946_v20, %s6560_s25  ;;  %v3943_v20 = vld [vmem:[%s6688_s7 + $0xc8] sm:$0xff]  ;;  %s6699_s25 = smov 127  }
  0xe4   : > { %1020 = vrot.lane.b32.xlu0 %v1012_v31, %s6572_s1  ;;  %1016 = vrot.lane.b32.xlu1 %v1010_v32, %s6572_s1 }
  0xe5   : > { %1018 = vrot.lane.b32.xlu2 %v1011_v33, %s6572_s1  ;;  %v3946_v33 = vld [vmem:[%s6688_s7 + $0xe0] sm:$0xff]  ;;  %s6711_s1 = smov 110  }
  0xec   : > { %1222 = vperm.xlu0 %4054, %v1212_v36   ;;  %1227 = vperm.xlu1 %4052, %v1213_v37   ;;  %v3947_v36 = vld [vmem:[%s6688_s7 + $0xe8] sm:$0xff]  ;;  %v3945_v37 = vld [vmem:[%s6688_s7 + $0xd8] sm:$0xff] }
  0xed   : > { %1217 = vperm.xlu2 %4053, %v1211_v38  }
  0xf4   : > { %1258 = vperm.xlu0 %4054, %v3922_v39   ;;  %1263 = vperm.xlu1 %4052, %v3923_v40  }
  0xf5   : > { %1232 = vperm.xlu2 %4053, %v1214_v41   ;;  %v3949_v41 = vld [vmem:[%s6688_s7 + $0xf8] sm:$0xff] }
  0xfa   : > { %v4432_v53 = vpop.permute.xlu2 %771 }
  0xfc   : > { %1273 = vperm.xlu0 %4054, %v3925_v43   ;;  %1355 = vperm.xlu1 %4052, %v3926_v45   ;;  %v3950_v43 = vld [vmem:[%s6688_s7 + $0x100] sm:$0xff]  ;;  %v3948_v45 = vld [vmem:[%s6688_s7 + $0xf0] sm:$0xff] }
  0xfd   : > { %1268 = vperm.xlu2 %4053, %v3924_v46  }
 0x102   : > { %v4443_v57 = vpop.permute.xlu2 %773 }
 0x104   : > { %1365 = vperm.xlu0 %4054, %v3928_v48   ;;  %1370 = vperm.xlu1 %4052, %v3929_v50   ;;  %v749_v50 = vmul.f32 %v4274_v25, %v4279_v29 }
 0x105   : > { %1360 = vperm.xlu2 %4053, %v3927_v51   ;;  %v750_v51 = vmul.f32 %v4274_v25, %v4284_v34 }
 0x10c   : > { %1469 = vperm.xlu0 %4054, %v3931_v54   ;;  %1474 = vperm.xlu1 %4052, %v3932_v55   ;;  %v3952_v55 = vld [vmem:[%s6688_s7 + $0x110] sm:$0xff] }
 0x10d   : > { %1464 = vperm.xlu2 %4053, %v3930_v56   ;;  %v3953_v56 = vld [vmem:[%s6688_s7 + $0x118] sm:$0xff] }
 0x10f   : > { %v4458_v3 = vpop.permute.xlu2 %876 }
 0x114   : > { %1573 = vperm.xlu0 %4054, %v3934_v59   ;;  %1578 = vperm.xlu1 %4052, %v3935_v61   ;;  %v3951_v59 = vld [vmem:[%s6688_s7 + $0x108] sm:$0xff]  ;;  %v778_v61 = vsel %vm777_vm6, %v4432_v53, %v4443_v57 }
 0x115   : > { %1479 = vperm.xlu2 %4053, %v3933_v62   ;;  %v756_v62 = vmul.f32 %v4221_v6, %v749_v50 }
 0x117   : > { %v4480_v16 = vpop.permute.xlu2 %982 }
 0x11a   : > { %v776_v10 = vpop.permute.xlu0 %775 }
 0x11b   : > { %v779_v25 = vsel %vm777_vm6, %v4443_v57, %v776_v10 }
 0x11c   : > { %1588 = vperm.xlu0 %4054, %v3937_v4   ;;  %1670 = vperm.xlu1 %4052, %v3938_v7   ;;  %v757_v4 = vmul.f32 %v4249_v17, %v750_v51 }
 0x11d   : > { %1583 = vperm.xlu2 %4053, %v3936_v8  }
 0x11f   : > { %v815_v28 = vpop.permute.xlu2 %814 }
 0x124   : > { %1680 = vperm.xlu0 %4054, %v3940_v13   ;;  %1685 = vperm.xlu1 %4052, %v3941_v14   ;;  %v782_v13 = vadd.f32 %v778_v61, %v756_v62  ;;  %v783_v14 = vadd.f32 %v779_v25, %v757_v4  ;;  %v2090_v61 = vld [vmem:[%s6689_s3 + $0x18] sm:$0xff] }
 0x125   : > { %1675 = vperm.xlu2 %4053, %v3939_v15  }
 0x126   : > { %v4482_v18 = vpop.permute.xlu1 %880  ;;  %v4484_v19 = vpop.permute.xlu0 %878 }
 0x127   : > { %v853_v40 = vpop.permute.xlu2 %852 }
 0x12c   : > { %1784 = vperm.xlu0 %4054, %v3943_v20   ;;  %1789 = vperm.xlu1 %4052, %v3944_v21  }
 0x12d   : > { %1779 = vperm.xlu2 %4053, %v3942_v22   ;;  %v2088_v22 = vld [vmem:[%s6689_s3 + $0x8] sm:$0xff] }
 0x12e   : > { %v4495_v31 = vpop.permute.xlu1 %980  ;;  %v4497_v32 = vpop.permute.xlu0 %978 }
 0x12f   : > { %v915_v54 = vpop.permute.xlu2 %914  ;;  %v986_v25 = vsel %vm984_vm12, %v4495_v31, %v4480_v16  ;;  %v985_v62 = vsel %vm984_vm12, %v4497_v32, %v4495_v31  ;;  %v2142_v16 = vld [vmem:[%s6690_s9 + $0x18] sm:$0xff]  ;;  %v2250_v31 = vld [vmem:[%s6691_s11] sm:$0xff]  ;;  %v2141_v32 = vld [vmem:[%s6690_s9 + $0x10] sm:$0xff] }
 0x134   : > { %1888 = vperm.xlu0 %4054, %v3946_v33   ;;  %1893 = vperm.xlu1 %4052, %v3947_v36   ;;  %v2089_v33 = vld [vmem:[%s6689_s3 + $0x10] sm:$0xff] }
 0x135   : > { %1794 = vperm.xlu2 %4053, %v3945_v37   ;;  %v2087_v37 = vld [vmem:[%s6689_s3] sm:$0xff]  ;;  %s6715_s3 = smov 94  }
 0x136   : > { %v813_v38 = vpop.permute.xlu1 %812  ;;  %v817_v39 = vpop.permute.xlu0 %816 }
 0x137   : > { %v819_v7 = vsel %vm818_vm7, %v813_v38, %v815_v28  ;;  %v820_v8 = vsel %vm818_vm7, %v815_v28, %v817_v39  ;;  %v953_v38 = vpop.permute.xlu2 %952  ;;  %v883_v39 = vsel %vm882_vm9, %v4458_v3, %v4484_v19  ;;  %v2139_v3 = vld [vmem:[%s6690_s9] sm:$0xff] }
 0x138   : > { %v823_v10 = vadd.f32 %v819_v7, %v782_v13  ;;  %v824_v21 = vadd.f32 %v820_v8, %v783_v14 }
 0x13c   : > { %1903 = vperm.xlu0 %4054, %v3949_v41   ;;  %1985 = vperm.xlu1 %4052, %v3950_v43  }
 0x13d   : > { %1898 = vperm.xlu2 %4053, %v3948_v45  }
 0x13e   : > { %v851_v46 = vpop.permute.xlu1 %850  ;;  %v855_v48 = vpop.permute.xlu0 %854 }
 0x13f   : > { %v857_v53 = vsel %vm856_vm8, %v851_v46, %v853_v40  ;;  %v858_v57 = vsel %vm856_vm8, %v853_v40, %v855_v48  ;;  %v884_v40 = vsel %vm882_vm9, %v4484_v19, %v4482_v18  ;;  %v2140_v18 = vld [vmem:[%s6690_s9 + $0x8] sm:$0xff]  ;;  %v1019_v4 = vpop.permute.xlu2 %1018 }
 0x140   : > { %v861_v28 = vadd.f32 %v857_v53, %v823_v10  ;;  %v862_v36 = vadd.f32 %v858_v57, %v824_v21 }
 0x142   : > { %v887_v45 = vadd.f32 %v883_v39, %v861_v28  ;;  %v888_v46 = vadd.f32 %v884_v40, %v862_v36  ;;  %v2301_v39 = vld [vmem:[%s6694_s12] sm:$0xf] }
 0x144   : > { %1995 = vperm.xlu0 %4054, %v3952_v55   ;;  %2000 = vperm.xlu1 %4052, %v3953_v56  }
 0x145   : > { %1990 = vperm.xlu2 %4053, %v3951_v59  }
 0x146   : > { %v919_v15 = vpop.permute.xlu1 %918  ;;  %v917_v20 = vpop.permute.xlu0 %916 }
 0x147   : > { %v921_v41 = vsel %vm920_vm10, %v915_v54, %v917_v20  ;;  %v922_v43 = vsel %vm920_vm10, %v917_v20, %v919_v15 }
 0x148   : > { %v925_v56 = vadd.f32 %v921_v41, %v887_v45  ;;  %v926_v59 = vadd.f32 %v922_v43, %v888_v46  ;;  %v1042_v41 = vld [vmem:[%s6693_s24 + $0x8] sm:$0xff]  ;;  %v1043_v45 = vld [vmem:[%s6693_s24 + $0x10] sm:$0xff] }
 0x14c   : > { %2098 = vperm.xlu0 %4054, %v2088_v22   ;;  %2103 = vperm.xlu1 %4052, %v2089_v33  }
 0x14d   : > { %2093 = vperm.xlu2 %4053, %v2087_v37  }
 0x14e   : > { %v957_v48 = vpop.permute.xlu1 %956  ;;  %v955_v50 = vpop.permute.xlu0 %954 }
 0x14f   : > { %v959_v51 = vsel %vm958_vm11, %v953_v38, %v955_v50  ;;  %v960_v55 = vsel %vm958_vm11, %v955_v50, %v957_v48  ;;  %v1041_v38 = vld [vmem:[%s6693_s24] sm:$0xff]  ;;  %v1044_v48 = vld [vmem:[%s6693_s24 + $0x18] sm:$0xff] }
 0x150   : > { %v963_v19 = vadd.f32 %v959_v51, %v925_v56  ;;  %v964_v54 = vadd.f32 %v960_v55, %v926_v59 }
 0x152   : > { %v989_v8 = vadd.f32 %v985_v62, %v963_v19  ;;  %v990_v13 = vadd.f32 %v986_v25, %v964_v54 }
 0x154   : > { %2145 = vperm.xlu0 %4054, %v2139_v3   ;;  %2150 = vperm.xlu1 %4052, %v2140_v18  }
 0x155   : > { %2108 = vperm.xlu2 %4053, %v2090_v61  }
 0x156   : > { %v1017_v7 = vpop.permute.xlu1 %1016  ;;  %v1021_v14 = vpop.permute.xlu0 %1020 }
 0x157   : > { %v1023_v15 = vsel %vm1022_vm13, %v1017_v7, %v1019_v4  ;;  %v1024_v20 = vsel %vm1022_vm13, %v1019_v4, %v1021_v14 }
 0x158   : > { %v1027_v53 = vadd.f32 %v1023_v15, %v989_v8  ;;  %v1028_v57 = vadd.f32 %v1024_v20, %v990_v13 }
 0x15a   : > { %v1035_v10 = vadd.f32 %v4454_v63, %v1027_v53  ;;  %v1036_v21 = vadd.f32 %v4454_v63, %v1028_v57  ;;  %v3964_v63 = vld [vmem:[%s6694_s12 + $0x4] sm:$0xf] }
 0x15c   : > { %2160 = vperm.xlu0 %4054, %v2142_v16   ;;  %2253 = vperm.xlu1 %4052, %v2250_v31   ;;  %v1037_v22 = vmax.f32 %v1035_v10, 0.0  ;;  %v1038_v33 = vmax.f32 %v1036_v21, 0.0  ;;  %v3965_v31 = vld [vmem:[%s6694_s12 + $0x8] sm:$0xf] }
 0x15d   : > { %2155 = vperm.xlu2 %4053, %v2141_v32  }
 0x15e   : > { %v4588_v28 = vpop.permute.xlu0 %1222  ;;  %v1039_v36 = vmin.f32 %v1037_v22, 6.0  ;;  %v1040_v37 = vmin.f32 %v1038_v33, 6.0  ;;  %v4640_v54 = vpop.permute.xlu1 %1227 }
 0x15f   : > { %6692 = vst [vmem:[#allocation22_spill] sm:$0xff] %v4588_v28 }
 0x160   : > { %3912 = vmatpush.msk.msra.mxu0 %vm1082_vm14, %v1039_v36  ;;  %3917 = vmatpush.msk.msra.mxu1 %vm1082_vm14, %v1040_v37  ;;  %6695 = vst [vmem:[#allocation23_spill] sm:$0xff] %v4640_v54 }
 0x161   : > { %3913 = vmatmul.msk.f32.vlgmr.msra.gmra.mxu0 %vm1069_vm15, %v1041_v38  ;;  %3918 = vmatmul.msk.f32.vlgmr.msra.gmra.mxu1 %vm1069_vm15, %v1041_v38 }
 0x164   : > { %2315 = vperm.xlu0 %4054, %v3964_v63  }
 0x165   : > { %2304 = vperm.xlu2 %4053, %v2301_v39  }
 0x166   : > { %v4603_v40 = vpop.permute.xlu0 %1258  ;;  %v4644_v25 = vpop.permute.xlu1 %1263 }
 0x169   : > { %3914 = vmatmul.msk.f32.gmra.mxu0 %vm1069_vm15, %v1042_v41  ;;  %3919 = vmatmul.msk.f32.gmra.mxu1 %vm1069_vm15, %v1042_v41 }
 0x16e   : > { %v4610_v43 = vpop.permute.xlu0 %1273  ;;  %v4648_v4 = vpop.permute.xlu1 %1355 }
 0x171   : > { %3915 = vmatmul.msk.f32.gmra.mxu0 %vm1069_vm15, %v1043_v45  ;;  %3920 = vmatmul.msk.f32.gmra.mxu1 %vm1069_vm15, %v1043_v45 }
 0x176   : > { %v4617_v46 = vpop.permute.xlu0 %1365  ;;  %v4652_v8 = vpop.permute.xlu1 %1370 }
 0x179   : > { %3916 = vmatmul.msk.f32.gmra.mxu0 %vm1069_vm15, %v1044_v48  ;;  %3921 = vmatmul.msk.f32.gmra.mxu1 %vm1069_vm15, %v1044_v48 }
 0x17e   : > { %v4624_v50 = vpop.permute.xlu0 %1469  ;;  %v4664_v32 = vpop.permute.xlu1 %1474 }
 0x186   : > { %v4626_v51 = vpop.permute.xlu0 %1573  ;;  %v4669_v41 = vpop.permute.xlu1 %1578 }
 0x18e   : > { %v4628_v55 = vpop.permute.xlu0 %1588 }
 0x196   : > { %v4630_v56 = vpop.permute.xlu0 %1680 }
 0x19e   : > { %v4632_v59 = vpop.permute.xlu0 %1784 }
 0x1a6   : > { %v4634_v3 = vpop.permute.xlu0 %1888 }
 0x1ae   : > { %v4636_v18 = vpop.permute.xlu0 %1903 }
 0x1b6   : > { %v4638_v19 = vpop.permute.xlu0 %1995 }
 0x1be   : > { %v4642_v61 = vpop.permute.xlu0 %2098 }
 0x1bf   : > { %6696 = vst [vmem:[#allocation24_spill] sm:$0xff] %v4642_v61 }
 0x1c6   : > { %v4646_v62 = vpop.permute.xlu0 %2145 }
 0x1c7   : > { %6697 = vst [vmem:[#allocation25_spill] sm:$0xff] %v4646_v62 }
 0x1ce   : > { %v4650_v7 = vpop.permute.xlu0 %2160 }
 0x1cf   : > { %6698 = vst [vmem:[#allocation26_spill] sm:$0xff] %v4650_v7 }
 0x1d6   : > { %v2316_v13 = vpop.permute.xlu0 %2315 }
 0x1d7   : > { %v2320_v14 = vmul.f32 %v2316_v13, %v4287_v35  ;;  %v2319_v15 = vmul.f32 %v2316_v13, %v4284_v34  ;;  %v2318_v20 = vmul.f32 %v2316_v13, %v4279_v29 }
 0x1d9   : > { %2328 = vrot.lane.b32.xlu0 %v2320_v14, %s6699_s25  ;;  %2326 = vrot.lane.b32.xlu2 %v2319_v15, %s6699_s25 }
 0x1da   : > { %2324 = vrot.lane.b32.xlu1 %v2318_v20, %s6699_s25  ;;  %v4674_v20 = vpop.permute.xlu1 %1670 }
 0x1de   : > { %v1106_v53 = vpop.f32.mrf.mxu0  ;;  %v1135_v57 = vpop.f32.mrf.mxu1 }
 0x1df   : > { %v1107_v16 = vadd.f32 %v1106_v53, %v4410_v42  ;;  %v1136_v10 = vadd.f32 %v1135_v57, %v4410_v42 }
 0x1e1   : > { %v1147_v21 = vmax.f32 %v1107_v16, 0.0  ;;  %v1148_v33 = vmax.f32 %v1136_v10, 0.0 }
 0x1e2   : > { %2340 = vperm.xlu1 %4052, %v3965_v31  }
 0x1e3   : > { %v1155_v22 = vmin.f32 %v1147_v21, 6.0  ;;  %v1156_v63 = vmin.f32 %v1148_v33, 6.0 }
 0x1e5   : > { %1171 = vrot.lane.b32.xlu0 %v1155_v22, %s6700_s6 }
 0x1e6   : > { %v1109_v36 = vpop.f32.mrf.mxu0  ;;  %v1138_v37 = vpop.f32.mrf.mxu1 }
 0x1e7   : > { %v1139_v38 = vadd.f32 %v1138_v37, %v4456_v1  ;;  %v4681_v37 = vpop.permute.xlu1 %1685  ;;  %v1110_v61 = vadd.f32 %v1109_v36, %v4456_v1 }
 0x1e9   : > { %v1150_v39 = vmax.f32 %v1139_v38, 0.0 }
 0x1ea   : > { %1173 = vrot.lane.b32.xlu1 %v1156_v63, %s6700_s6  ;;  %v4685_v63 = vpop.permute.xlu2 %1217 }
 0x1eb   : > { %v1158_v45 = vmin.f32 %v1150_v39, 6.0 }
 0x1ed   : > { %1177 = vrot.lane.b32.xlu0 %v1158_v45, %s6700_s6 }
 0x1ee   : > { %v1112_v42 = vpop.f32.mrf.mxu0  ;;  %v1141_v48 = vpop.f32.mrf.mxu1 }
 0x1ef   : > { %v1113_v13 = vadd.f32 %v1112_v42, %v4469_v9  ;;  %v4683_v38 = vpop.permute.xlu1 %1789  ;;  %v1142_v36 = vadd.f32 %v1141_v48, %v4469_v9 }
 0x1f1   : > { %v1151_v14 = vmax.f32 %v1113_v13, 0.0 }
 0x1f2   : > { %v4689_v45 = vpop.permute.xlu2 %1232 }
 0x1f3   : > { %v1159_v15 = vmin.f32 %v1151_v14, 6.0  ;;  %6701 = vst [vmem:[#allocation27_spill] sm:$0xff] %v4689_v45 }
 0x1f5   : > { %1179 = vrot.lane.b32.xlu1 %v1159_v15, %s6700_s6 }
 0x1f6   : > { %v1115_v53 = vpop.f32.mrf.mxu0  ;;  %v1144_v57 = vpop.f32.mrf.mxu1 }
 0x1f7   : > { %v1116_v16 = vadd.f32 %v1115_v53, %v4421_v47  ;;  %v1145_v31 = vadd.f32 %v1144_v57, %v4421_v47  ;;  %v4687_v39 = vpop.permute.xlu1 %1893 }
 0x1f9   : > { %v1153_v10 = vmax.f32 %v1116_v16, 0.0  ;;  %v1154_v21 = vmax.f32 %v1145_v31, 0.0 }
 0x1fa   : > { %v4693_v47 = vpop.permute.xlu2 %1268 }
 0x1fb   : > { %v1161_v22 = vmin.f32 %v1153_v10, 6.0  ;;  %v1162_v33 = vmin.f32 %v1154_v21, 6.0 }
 0x1fd   : > { %1183 = vrot.lane.b32.xlu0 %v1161_v22, %s6700_s6  ;;  %1185 = vrot.lane.b32.xlu1 %v1162_v33, %s6700_s6 }
 0x1ff   : > { %v4691_v42 = vpop.permute.xlu1 %1985 }
 0x202   : > { %v4697_v14 = vpop.permute.xlu2 %1360 }
 0x207   : > { %v4695_v13 = vpop.permute.xlu1 %2000 }
 0x20a   : > { %v4701_v53 = vpop.permute.xlu2 %1464 }
 0x20f   : > { %v4699_v15 = vpop.permute.xlu1 %2103 }
 0x210   : > { %6702 = vst [vmem:[#allocation28_spill] sm:$0xff] %v4699_v15 }
 0x212   : > { %v4705_v16 = vpop.permute.xlu2 %1479 }
 0x217   : > { %v4703_v57 = vpop.permute.xlu1 %2150 }
 0x218   : > { %6703 = vst [vmem:[#allocation29_spill] sm:$0xff] %v4703_v57 }
 0x21a   : > { %v4709_v10 = vpop.permute.xlu2 %1583 }
 0x21f   : > { %v4707_v31 = vpop.permute.xlu1 %2253 }
 0x220   : > { %6704 = vst [vmem:[#allocation30_spill] sm:$0xff] %v4707_v31 }
 0x222   : > { %v4715_v33 = vpop.permute.xlu2 %1675 }
 0x22a   : > { %v4730_v54 = vpop.permute.xlu2 %1779 }
 0x232   : > { %v4745_v17 = vpop.permute.xlu2 %1794 }
 0x24b   : > { %v4713_v22 = vpop.permute.xlu0 %2328 }
 0x24c   : > { %v4711_v21 = vpop.permute.xlu1 %2324  ;;  %6706 = vst [vmem:[#allocation32_spill] sm:$0xff] %v4713_v22  ;;  %v1149_v22 = vmax.f32 %v1110_v61, 0.0 }
 0x24d   : > { %6705 = vst [vmem:[#allocation31_spill] sm:$0xff] %v4711_v21 }
 0x254   : > { %v4717_v62 = vpop.permute.xlu1 %2340 }
 0x255   : > { %v2343_v7 = vmul.f32 %v4717_v62, %v4279_v29 }
 0x257   : > { %v1172_v57 = vpop.permute.xlu0 %1171  ;;  %v2346_v15 = vmul.f32 %v2343_v7, %v4272_v24  ;;  %v1157_v7 = vmin.f32 %v1149_v22, 6.0 }
 0x258   : > { %v4724_v31 = vsel %vm736_vm0, 0.0, %v1172_v57 }
 0x259   : > { %2352 = vrot.lane.b32.xlu2 %v2346_v15, %s6707_s27  ;;  %v1276_v21 = vmul.f32 %v4603_v40, %v4724_v31  ;;  %v1591_v61 = vmul.f32 %v4626_v51, %v4724_v31  ;;  %v1152_v15 = vmax.f32 %v1142_v36, 0.0  ;;  %v1906_v9 = vmul.f32 %v4634_v3, %v4724_v31 }
 0x25b   : > { %1300 = vrot.lane.b32.xlu1 %v1276_v21, %s6699_s25  ;;  %v1160_v28 = vmin.f32 %v1152_v15, 6.0 }
 0x25c   : > { %v1174_v45 = vpop.permute.xlu1 %1173 }
 0x25d   : > { %v4733_v29 = vsel %vm736_vm0, %v1174_v45, 0.0  ;;  %v4753_v48 = vsel %vm736_vm0, %v1172_v57, %v1174_v45 }
 0x25e   : > { %v1278_v1 = vmul.f32 %v4603_v40, %v4733_v29  ;;  %v1593_v21 = vmul.f32 %v4626_v51, %v4733_v29  ;;  %v1375_v22 = vmul.f32 %v4648_v4, %v4733_v29  ;;  %v1374_v45 = vmul.f32 %v4648_v4, %v4753_v48 }
 0x25f   : > { %v1483_v57 = vmul.f32 %v4701_v53, %v4753_v48 }
 0x260   : > { %1304 = vrot.lane.b32.xlu0 %v1278_v1, %s6699_s25  ;;  %v1908_v1 = vmul.f32 %v4634_v3, %v4733_v29  ;;  %v1387_v36 = vmul.f32 %v1375_v22, %v4298_v44  ;;  %v1690_v22 = vmul.f32 %v4674_v20, %v4733_v29 }
 0x261   : > { %1175 = vrot.lane.b32.xlu2 %v1157_v7, %s6700_s6  ;;  %v1277_v7 = vmul.f32 %v4603_v40, %v4753_v48  ;;  %v1592_v40 = vmul.f32 %v4626_v51, %v4753_v48  ;;  %v1495_v15 = vmul.f32 %v1483_v57, %v4330_v60  ;;  %v1907_v51 = vmul.f32 %v4634_v3, %v4753_v48 }
 0x263   : > { %1615 = vrot.lane.b32.xlu1 %v1591_v61, %s6708_s29  ;;  %v1386_v61 = vmul.f32 %v1374_v45, %v4315_v52  ;;  %v1373_v45 = vmul.f32 %v4648_v4, %v4724_v31  ;;  %v1484_v4 = vmul.f32 %v4701_v53, %v4733_v29 }
 0x268   : > { %1619 = vrot.lane.b32.xlu0 %v1593_v21, %s6708_s29  ;;  %v1482_v21 = vmul.f32 %v4701_v53, %v4724_v31  ;;  %v1688_v53 = vmul.f32 %v4674_v20, %v4724_v31 }
 0x269   : > { %1181 = vrot.lane.b32.xlu2 %v1160_v28, %s6700_s6  ;;  %v4762_v28 = vpop.permute.xlu2 %1898 }
 0x26b   : > { %1930 = vrot.lane.b32.xlu1 %v1906_v9, %s6709_s26 }
 0x270   : > { %1934 = vrot.lane.b32.xlu0 %v1908_v1, %s6709_s26  ;;  %v1494_v1 = vmul.f32 %v1482_v21, %v4276_v27  ;;  %v1797_v21 = vmul.f32 %v4730_v54, %v4724_v31 }
 0x271   : > { %1302 = vrot.lane.b32.xlu2 %v1277_v7, %s6699_s25  ;;  %v4779_v9 = vpop.permute.xlu2 %1990  ;;  %v1702_v7 = vmul.f32 %v1690_v22, %v4335_v0  ;;  %v2005_v22 = vmul.f32 %v4691_v42, %v4733_v29 }
 0x273   : > { %1413 = vrot.lane.b32.xlu1 %v1387_v36, %s6707_s27  ;;  %v1689_v36 = vmul.f32 %v4674_v20, %v4753_v48 }
 0x275   : > { %v1701_v3 = vmul.f32 %v1689_v36, %v4343_v2  ;;  %v2017_v36 = vmul.f32 %v2005_v22, %v4377_v23 }
 0x278   : > { %1411 = vrot.lane.b32.xlu0 %v1386_v61, %s6707_s27  ;;  %v1798_v61 = vmul.f32 %v4730_v54, %v4753_v48 }
 0x279   : > { %1617 = vrot.lane.b32.xlu2 %v1592_v40, %s6708_s29  ;;  %v4795_v57 = vpop.permute.xlu2 %2093  ;;  %v1385_v40 = vmul.f32 %v1373_v45, %v4272_v24  ;;  %v2004_v45 = vmul.f32 %v4691_v42, %v4753_v48 }
 0x27a   : > { %6712 = vst [vmem:[#allocation33_spill] sm:$0xff] %v4795_v57 }
 0x27b   : > { %1520 = vrot.lane.b32.xlu1 %v1495_v15, %s6710_s2  ;;  %v1810_v15 = vmul.f32 %v1798_v61, %v4361_v12  ;;  %v2016_v61 = vmul.f32 %v2004_v45, %v4384_v30 }
 0x280   : > { %1518 = vrot.lane.b32.xlu0 %v1494_v1, %s6710_s2  ;;  %v1809_v1 = vmul.f32 %v1797_v21, %v4347_v5 }
 0x281   : > { %1932 = vrot.lane.b32.xlu2 %v1907_v51, %s6709_s26  ;;  %v4812_v51 = vpop.permute.xlu2 %2108 }
 0x282   : > { %6714 = vst [vmem:[#allocation34_spill] sm:$0xff] %v4812_v51 }
 0x283   : > { %1728 = vrot.lane.b32.xlu1 %v1702_v7, %s6711_s1  ;;  %v1496_v7 = vmul.f32 %v1484_v4, %v4308_v49  ;;  %v1799_v4 = vmul.f32 %v4730_v54, %v4733_v29 }
 0x285   : > { %v1811_v22 = vmul.f32 %v1799_v4, %v4355_v11 }
 0x288   : > { %1726 = vrot.lane.b32.xlu0 %v1701_v3, %s6711_s1  ;;  %v1700_v3 = vmul.f32 %v1688_v53, %v4325_v58 }
 0x289   : > { %1409 = vrot.lane.b32.xlu2 %v1385_v40, %s6707_s27  ;;  %v1178_v40 = vpop.permute.xlu0 %1177 }
 0x28a   : > { %v4830_v21 = vsel %vm736_vm0, %v1178_v40, 0.0 }
 0x28b   : > { %1835 = vrot.lane.b32.xlu1 %v1810_v15, %s6713_s0  ;;  %v4826_v15 = vpop.permute.xlu2 %2155  ;;  %v1281_v20 = vmul.f32 %v4644_v25, %v4830_v21  ;;  %v1911_v54 = vmul.f32 %v4687_v39, %v4830_v21  ;;  %v1802_v57 = vmul.f32 %v4632_v59, %v4830_v21 }
 0x28c   : > { %6716 = vst [vmem:[#allocation35_spill] sm:$0xff] %v4826_v15 }
 0x290   : > { %1833 = vrot.lane.b32.xlu0 %v1809_v1, %s6713_s0 }
 0x291   : > { %1522 = vrot.lane.b32.xlu2 %v1496_v7, %s6710_s2  ;;  %v2003_v7 = vmul.f32 %v4691_v42, %v4724_v31 }
 0x293   : > { %2043 = vrot.lane.b32.xlu1 %v2017_v36, %s6715_s3  ;;  %v4839_v1 = vpop.permute.xlu2 %2304  ;;  %v1596_v36 = vmul.f32 %v4669_v41, %v4830_v21  ;;  %v2015_v45 = vmul.f32 %v2003_v7, %v4379_v26 }
 0x294   : > { %6717 = vst [vmem:[#allocation36_spill] sm:$0xff] %v4839_v1 }
 0x298   : > { %2041 = vrot.lane.b32.xlu0 %v2016_v61, %s6715_s3 }
 0x299   : > { %1724 = vrot.lane.b32.xlu2 %v1700_v3, %s6711_s1 }
 0x29b   : > { %v4848_v29 = vpop.permute.xlu2 %2326 }
 0x29c   : > { %6718 = vst [vmem:[#allocation37_spill] sm:$0xff] %v4848_v29 }
 0x2a0   : > { %1310 = vrot.lane.b32.xlu0 %v1281_v20, %s6699_s25 }
 0x2a1   : > { %1837 = vrot.lane.b32.xlu2 %v1811_v22, %s6713_s0 }
 0x2a8   : > { %1625 = vrot.lane.b32.xlu0 %v1596_v36, %s6708_s29 }
 0x2a9   : > { %2039 = vrot.lane.b32.xlu2 %v2015_v45, %s6715_s3 }
 0x2b0   : > { %1940 = vrot.lane.b32.xlu0 %v1911_v54, %s6709_s26 }
 0x2b3   : > { %v4853_v53 = vpop.permute.xlu2 %2352 }
 0x2b4   : > { %6719 = vst [vmem:[#allocation38_spill] sm:$0xff] %v4853_v53 }
 0x2bb   : > { %v1176_v61 = vpop.permute.xlu2 %1175 }
 0x2bc   : > { %v4856_v42 = vsel %vm736_vm0, %v1176_v61, %v1178_v40  ;;  %v4859_v3 = vsel %vm736_vm0, 0.0, %v1176_v61  ;;  %v4883_v61 = vpop.permute.xlu0 %1183 }
 0x2bd   : > { %v1279_v4 = vmul.f32 %v4644_v25, %v4859_v3  ;;  %v1280_v20 = vmul.f32 %v4644_v25, %v4856_v42  ;;  %v1377_v22 = vmul.f32 %v4697_v14, %v4856_v42  ;;  %v1485_v36 = vmul.f32 %v4624_v50, %v4859_v3 }
 0x2be   : > { %v1594_v45 = vmul.f32 %v4669_v41, %v4859_v3  ;;  %v1595_v25 = vmul.f32 %v4669_v41, %v4856_v42  ;;  %v1910_v41 = vmul.f32 %v4687_v39, %v4856_v42  ;;  %v2006_v51 = vmul.f32 %v4779_v9, %v4859_v3 }
 0x2bf   : > { %1306 = vrot.lane.b32.xlu1 %v1279_v4, %s6699_s25  ;;  %1308 = vrot.lane.b32.xlu2 %v1280_v20, %s6699_s25  ;;  %v1389_v7 = vmul.f32 %v1377_v22, %v4315_v52  ;;  %v1497_v54 = vmul.f32 %v1485_v36, %v4276_v27  ;;  %v1692_v20 = vmul.f32 %v4715_v33, %v4856_v42  ;;  %v1180_v36 = vpop.permute.xlu1 %1179 }
 0x2c0   : > { %v1909_v22 = vmul.f32 %v4687_v39, %v4859_v3  ;;  %v1800_v39 = vmul.f32 %v4632_v59, %v4859_v3 }
 0x2c1   : > { %1417 = vrot.lane.b32.xlu0 %v1389_v7, %s6707_s27  ;;  %v1704_v7 = vmul.f32 %v1692_v20, %v4343_v2 }
 0x2c3   : > { %v4871_v40 = vpop.permute.xlu2 %1181 }
 0x2c7   : > { %1621 = vrot.lane.b32.xlu1 %v1594_v45, %s6708_s29  ;;  %1623 = vrot.lane.b32.xlu2 %v1595_v25, %s6708_s29  ;;  %v1378_v45 = vmul.f32 %v4697_v14, %v4830_v21  ;;  %v1376_v25 = vmul.f32 %v4697_v14, %v4859_v3  ;;  %v1486_v14 = vmul.f32 %v4624_v50, %v4856_v42  ;;  %v4919_v1 = vpop.permute.xlu1 %1185 }
 0x2c9   : > { %1524 = vrot.lane.b32.xlu0 %v1497_v54, %s6710_s2  ;;  %v1388_v20 = vmul.f32 %v1376_v25, %v4272_v24  ;;  %v1498_v25 = vmul.f32 %v1486_v14, %v4330_v60 }
 0x2cb   : > { %v4885_v4 = vpop.permute.xlu2 %1302 }
 0x2cf   : > { %1936 = vrot.lane.b32.xlu1 %v1909_v22, %s6709_s26  ;;  %1938 = vrot.lane.b32.xlu2 %v1910_v41, %s6709_s26  ;;  %v1390_v22 = vmul.f32 %v1378_v45, %v4298_v44  ;;  %v1812_v41 = vmul.f32 %v1800_v39, %v4347_v5  ;;  %v2007_v45 = vmul.f32 %v4779_v9, %v4856_v42  ;;  %v4937_v14 = vpop.permute.xlu1 %1300 }
 0x2d1   : > { %1732 = vrot.lane.b32.xlu0 %v1704_v7, %s6711_s1  ;;  %v1487_v7 = vmul.f32 %v4624_v50, %v4830_v21  ;;  %v1693_v50 = vmul.f32 %v4715_v33, %v4830_v21 }
 0x2d2   : > { %v4901_v54 = vpop.permute.xlu0 %1304 }
 0x2d3   : > { %v4905_v53 = vpop.permute.xlu2 %1617 }
 0x2d7   : > { %1419 = vrot.lane.b32.xlu1 %v1390_v22, %s6707_s27  ;;  %1415 = vrot.lane.b32.xlu2 %v1388_v20, %s6707_s27  ;;  %v1499_v22 = vmul.f32 %v1487_v7, %v4308_v49  ;;  %v2019_v20 = vmul.f32 %v2007_v45, %v4384_v30  ;;  %v4941_v7 = vsel %vm736_vm0, %v4871_v40, 0.0 }
 0x2d9   : > { %1839 = vrot.lane.b32.xlu0 %v1812_v41, %s6713_s0  ;;  %v1691_v41 = vmul.f32 %v4715_v33, %v4859_v3 }
 0x2da   : > { %v4917_v29 = vpop.permute.xlu0 %1619 }
 0x2db   : > { %6720 = vst [vmem:[#allocation39_spill] sm:$0xff] %v4917_v29  ;;  %v4925_v39 = vpop.permute.xlu2 %1932  ;;  %v1703_v45 = vmul.f32 %v1691_v41, %v4325_v58  ;;  %v4958_v41 = vpop.permute.xlu1 %1615 }
 0x2dc   : > { %6721 = vst [vmem:[#allocation40_spill] sm:$0xff] %v4925_v39 }
 0x2df   : > { %1526 = vrot.lane.b32.xlu1 %v1498_v25, %s6710_s2  ;;  %1528 = vrot.lane.b32.xlu2 %v1499_v22, %s6710_s2  ;;  %v1705_v25 = vmul.f32 %v1693_v50, %v4335_v0  ;;  %v1284_v22 = vmul.f32 %v4693_v47, %v4941_v7 }
 0x2e1   : > { %2047 = vrot.lane.b32.xlu0 %v2019_v20, %s6715_s3  ;;  %v1801_v20 = vmul.f32 %v4632_v59, %v4856_v42  ;;  %v2008_v59 = vmul.f32 %v4779_v9, %v4830_v21  ;;  %v1914_v21 = vmul.f32 %v4762_v28, %v4941_v7  ;;  %v4985_v9 = vsel %vm736_vm0, %v1180_v36, %v4871_v40 }
 0x2e2   : > { %v4935_v15 = vpop.permute.xlu0 %1934 }
 0x2e3   : > { %6722 = vst [vmem:[#allocation41_spill] sm:$0xff] %v4935_v15  ;;  %v4949_v33 = vpop.permute.xlu2 %1409 }
 0x2e7   : > { %1734 = vrot.lane.b32.xlu1 %v1705_v25, %s6711_s1  ;;  %1730 = vrot.lane.b32.xlu2 %v1703_v45, %s6711_s1  ;;  %v1813_v25 = vmul.f32 %v1801_v20, %v4361_v12  ;;  %v1814_v45 = vmul.f32 %v1802_v57, %v4355_v11  ;;  %v2020_v57 = vmul.f32 %v2008_v59, %v4377_v23 }
 0x2e9   : > { %1316 = vrot.lane.b32.xlu0 %v1284_v22, %s6699_s25  ;;  %v1599_v22 = vmul.f32 %v4709_v10, %v4941_v7 }
 0x2ea   : > { %v4956_v50 = vpop.permute.xlu0 %1411 }
 0x2eb   : > { %v4973_v20 = vpop.permute.xlu2 %1522 }
 0x2ef   : > { %1841 = vrot.lane.b32.xlu1 %v1813_v25, %s6713_s0  ;;  %1843 = vrot.lane.b32.xlu2 %v1814_v45, %s6713_s0  ;;  %v2018_v25 = vmul.f32 %v2006_v51, %v4379_v26  ;;  %v4977_v45 = vpop.permute.xlu1 %1930  ;;  %v1380_v51 = vmul.f32 %v4617_v46, %v4985_v9 }
 0x2f0   : > { %6723 = vst [vmem:[#allocation42_spill] sm:$0xff] %v4977_v45  ;;  %v1283_v45 = vmul.f32 %v4693_v47, %v4985_v9 }
 0x2f1   : > { %1631 = vrot.lane.b32.xlu0 %v1599_v22, %s6708_s29  ;;  %v4989_v22 = vsel %vm736_vm0, 0.0, %v1180_v36  ;;  %v1392_v40 = vmul.f32 %v1380_v51, %v4315_v52 }
 0x2f2   : > { %v4971_v15 = vpop.permute.xlu0 %1518  ;;  %v1488_v39 = vmul.f32 %v4664_v32, %v4989_v22  ;;  %v1597_v29 = vmul.f32 %v4709_v10, %v4989_v22 }
 0x2f7   : > { %2049 = vrot.lane.b32.xlu1 %v2020_v57, %s6715_s3  ;;  %2045 = vrot.lane.b32.xlu2 %v2018_v25, %s6715_s3  ;;  %v4995_v57 = vpop.permute.xlu2 %1724  ;;  %v1282_v25 = vmul.f32 %v4693_v47, %v4989_v22  ;;  %v5004_v36 = vpop.permute.xlu1 %1413  ;;  %v1598_v47 = vmul.f32 %v4709_v10, %v4985_v9  ;;  %v1912_v10 = vmul.f32 %v4762_v28, %v4989_v22 }
 0x2f9   : > { %1946 = vrot.lane.b32.xlu0 %v1914_v21, %s6709_s26 }
 0x2fa   : > { %v4991_v59 = vpop.permute.xlu0 %1726 }
 0x2ff   : > { %1312 = vrot.lane.b32.xlu1 %v1282_v25, %s6699_s25  ;;  %1314 = vrot.lane.b32.xlu2 %v1283_v45, %s6699_s25  ;;  %v5015_v25 = vpop.permute.xlu2 %1837  ;;  %v1500_v45 = vmul.f32 %v1488_v39, %v4276_v27  ;;  %v5021_v51 = vpop.permute.xlu1 %1520 }
 0x300   : > { %6725 = vst [vmem:[#allocation44_spill] sm:$0xff] %v5015_v25  ;;  %v1913_v25 = vmul.f32 %v4762_v28, %v4985_v9 }
 0x301   : > { %1423 = vrot.lane.b32.xlu0 %v1392_v40, %s6707_s27  ;;  %v1695_v40 = vmul.f32 %v4630_v56, %v4985_v9 }
 0x302   : > { %v5007_v21 = vpop.permute.xlu0 %1833 }
 0x303   : > { %6724 = vst [vmem:[#allocation43_spill] sm:$0xff] %v5007_v21 }
 0x307   : > { %1627 = vrot.lane.b32.xlu1 %v1597_v29, %s6708_s29  ;;  %1629 = vrot.lane.b32.xlu2 %v1598_v47, %s6708_s29  ;;  %v1707_v29 = vmul.f32 %v1695_v40, %v4343_v2  ;;  %v5034_v39 = vpop.permute.xlu2 %2039  ;;  %v1381_v47 = vmul.f32 %v4617_v46, %v4941_v7  ;;  %v5043_v28 = vpop.permute.xlu1 %1728 }
 0x308   : > { %6727 = vst [vmem:[#allocation46_spill] sm:$0xff] %v5034_v39 }
 0x309   : > { %1530 = vrot.lane.b32.xlu0 %v1500_v45, %s6710_s2  ;;  %v1379_v45 = vmul.f32 %v4617_v46, %v4989_v22  ;;  %6728 = vst [vmem:[#allocation47_spill] sm:$0xff] %v5043_v28  ;;  %v1489_v46 = vmul.f32 %v4664_v32, %v4985_v9 }
 0x30a   : > { %v5025_v21 = vpop.permute.xlu0 %2041 }
 0x30b   : > { %6726 = vst [vmem:[#allocation45_spill] sm:$0xff] %v5025_v21  ;;  %v1803_v21 = vmul.f32 %v4683_v38, %v4989_v22  ;;  %v1501_v28 = vmul.f32 %v1489_v46, %v4330_v60  ;;  %v1694_v46 = vmul.f32 %v4630_v56, %v4989_v22 }
 0x30f   : > { %1942 = vrot.lane.b32.xlu1 %v1912_v10, %s6709_s26  ;;  %1944 = vrot.lane.b32.xlu2 %v1913_v25, %s6709_s26  ;;  %v1393_v10 = vmul.f32 %v1381_v47, %v4298_v44  ;;  %v1391_v25 = vmul.f32 %v1379_v45, %v4272_v24  ;;  %v1490_v47 = vmul.f32 %v4664_v32, %v4941_v7 }
 0x310   : > { %v2010_v45 = vmul.f32 %v4638_v19, %v4985_v9  ;;  %v1696_v32 = vmul.f32 %v4630_v56, %v4941_v7  ;;  %v1804_v56 = vmul.f32 %v4683_v38, %v4985_v9 }
 0x311   : > { %1738 = vrot.lane.b32.xlu0 %v1707_v29, %s6711_s1  ;;  %v1815_v29 = vmul.f32 %v1803_v21, %v4347_v5 }
 0x312   : > { %v5047_v40 = vpop.permute.xlu0 %1310  ;;  %v2022_v21 = vmul.f32 %v2010_v45, %v4384_v30  ;;  %v1706_v45 = vmul.f32 %v1694_v46, %v4325_v58 }
 0x313   : > { %6729 = vst [vmem:[#allocation48_spill] sm:$0xff] %v5047_v40 }
 0x317   : > { %1425 = vrot.lane.b32.xlu1 %v1393_v10, %s6707_s27  ;;  %1421 = vrot.lane.b32.xlu2 %v1391_v25, %s6707_s27  ;;  %v1502_v10 = vmul.f32 %v1490_v47, %v4308_v49  ;;  %v5063_v25 = vpop.permute.xlu1 %1835  ;;  %v5079_v47 = vsel %vm736_vm0, %v4919_v1, 0.0 }
 0x319   : > { %v5052_v39 = vpop.permute.xlu2 %1308  ;;  %1845 = vrot.lane.b32.xlu0 %v1815_v29, %s6713_s0 }
 0x31a   : > { %v5068_v29 = vpop.permute.xlu0 %1625 }
 0x31b   : > { %6730 = vst [vmem:[#allocation49_spill] sm:$0xff] %v5068_v29 }
 0x31f   : > { %1532 = vrot.lane.b32.xlu1 %v1501_v28, %s6710_s2  ;;  %1534 = vrot.lane.b32.xlu2 %v1502_v10, %s6710_s2  ;;  %v1708_v28 = vmul.f32 %v1696_v32, %v4335_v0  ;;  %v1287_v10 = vmul.f32 %v4610_v43, %v5079_v47  ;;  %v1805_v32 = vmul.f32 %v4683_v38, %v4941_v7 }
 0x320   : > { %v2011_v38 = vmul.f32 %v4638_v19, %v4941_v7  ;;  %v5124_v7 = vsel %vm736_vm0, %v4883_v61, %v4919_v1 }
 0x321   : > { %v5070_v40 = vpop.permute.xlu2 %1623  ;;  %2053 = vrot.lane.b32.xlu0 %v2022_v21, %s6715_s3  ;;  %v5087_v21 = vpop.permute.xlu1 %2043  ;;  %v1286_v1 = vmul.f32 %v4610_v43, %v5124_v7 }
 0x322   : > { %6731 = vst [vmem:[#allocation50_spill] sm:$0xff] %v5070_v40  ;;  %v5096_v46 = vpop.permute.xlu0 %1940 }
 0x323   : > { %6732 = vst [vmem:[#allocation51_spill] sm:$0xff] %v5087_v21  ;;  %v1602_v21 = vmul.f32 %v4628_v55, %v5079_v47 }
 0x324   : > { %6734 = vst [vmem:[#allocation53_spill] sm:$0xff] %v5096_v46 }
 0x327   : > { %1740 = vrot.lane.b32.xlu1 %v1708_v28, %s6711_s1  ;;  %1736 = vrot.lane.b32.xlu2 %v1706_v45, %s6711_s1  ;;  %v1816_v28 = vmul.f32 %v1804_v56, %v4361_v12  ;;  %v1817_v45 = vmul.f32 %v1805_v32, %v4355_v11  ;;  %v2009_v56 = vmul.f32 %v4638_v19, %v4989_v22 }
 0x329   : > { %v5089_v29 = vpop.permute.xlu2 %1938  ;;  %1322 = vrot.lane.b32.xlu0 %v1287_v10, %s6699_s25 }
 0x32a   : > { %6733 = vst [vmem:[#allocation52_spill] sm:$0xff] %v5089_v29 }
 0x32f   : > { %1847 = vrot.lane.b32.xlu1 %v1816_v28, %s6713_s0  ;;  %1849 = vrot.lane.b32.xlu2 %v1817_v45, %s6713_s0  ;;  %v2023_v28 = vmul.f32 %v2011_v38, %v4377_v23  ;;  %v2021_v45 = vmul.f32 %v2009_v56, %v4379_v26  ;;  %v5133_v38 = vsel %vm736_vm0, 0.0, %v4883_v61 }
 0x331   : > { %v5104_v10 = vpop.permute.xlu2 %1415  ;;  %1637 = vrot.lane.b32.xlu0 %v1602_v21, %s6708_s29  ;;  %v5107_v29 = vpop.permute.xlu1 %1306  ;;  %v1917_v21 = vmul.f32 %v4636_v18, %v5079_v47 }
 0x333   : > { %v5113_v32 = vpop.permute.xlu0 %1417 }
 0x337   : > { %2055 = vrot.lane.b32.xlu1 %v2023_v28, %s6715_s3  ;;  %2051 = vrot.lane.b32.xlu2 %v2021_v45, %s6715_s3  ;;  %v1383_v28 = vmul.f32 %v4652_v8, %v5124_v7  ;;  %v1285_v45 = vmul.f32 %v4610_v43, %v5133_v38  ;;  %v1600_v43 = vmul.f32 %v4628_v55, %v5133_v38 }
 0x339   : > { %v5126_v46 = vpop.permute.xlu2 %1528  ;;  %1952 = vrot.lane.b32.xlu0 %v1917_v21, %s6709_s26  ;;  %v5129_v19 = vpop.permute.xlu1 %1621  ;;  %v1395_v21 = vmul.f32 %v1383_v28, %v4315_v52 }
 0x33a   : > { %6735 = vst [vmem:[#allocation54_spill] sm:$0xff] %v5126_v46  ;;  %v1491_v46 = vmul.f32 %v4705_v16, %v5133_v38 }
 0x33b   : > { %6736 = vst [vmem:[#allocation55_spill] sm:$0xff] %v5129_v19  ;;  %v5135_v56 = vpop.permute.xlu0 %1524 }
 0x33c   : > { %v1503_v28 = vmul.f32 %v1491_v46, %v4276_v27  ;;  %v1382_v27 = vmul.f32 %v4652_v8, %v5133_v38 }
 0x33f   : > { %1318 = vrot.lane.b32.xlu1 %v1285_v45, %s6699_s25  ;;  %1320 = vrot.lane.b32.xlu2 %v1286_v1, %s6699_s25  ;;  %v1601_v45 = vmul.f32 %v4628_v55, %v5124_v7  ;;  %v1915_v55 = vmul.f32 %v4636_v18, %v5133_v38 }
 0x341   : > { %v5146_v19 = vpop.permute.xlu2 %1730  ;;  %1429 = vrot.lane.b32.xlu0 %v1395_v21, %s6707_s27  ;;  %v5149_v61 = vpop.permute.xlu1 %1936 }
 0x342   : > { %6737 = vst [vmem:[#allocation56_spill] sm:$0xff] %v5146_v19  ;;  %v1698_v19 = vmul.f32 %v4681_v37, %v5124_v7 }
 0x343   : > { %6738 = vst [vmem:[#allocation57_spill] sm:$0xff] %v5149_v61  ;;  %v5151_v40 = vpop.permute.xlu0 %1732 }
 0x344   : > { %v1710_v46 = vmul.f32 %v1698_v19, %v4343_v2  ;;  %v1394_v19 = vmul.f32 %v1382_v27, %v4272_v24  ;;  %v1492_v2 = vmul.f32 %v4705_v16, %v5124_v7  ;;  %v2013_v27 = vmul.f32 %v4695_v13, %v5124_v7 }
 0x345   : > { %v1699_v24 = vmul.f32 %v4681_v37, %v5079_v47 }
 0x347   : > { %1633 = vrot.lane.b32.xlu1 %v1600_v43, %s6708_s29  ;;  %1635 = vrot.lane.b32.xlu2 %v1601_v45, %s6708_s29  ;;  %v1916_v43 = vmul.f32 %v4636_v18, %v5124_v7  ;;  %v1806_v18 = vmul.f32 %v4745_v17, %v5133_v38 }
 0x349   : > { %v5162_v1 = vpop.permute.xlu2 %1843  ;;  %1536 = vrot.lane.b32.xlu0 %v1503_v28, %s6710_s2  ;;  %v5165_v21 = vpop.permute.xlu1 %1419 }
 0x34a   : > { %6739 = vst [vmem:[#allocation58_spill] sm:$0xff] %v5162_v1  ;;  %v1384_v1 = vmul.f32 %v4652_v8, %v5079_v47 }
 0x34b   : > { %v5167_v61 = vpop.permute.xlu0 %1839 }
 0x34c   : > { %6740 = vst [vmem:[#allocation59_spill] sm:$0xff] %v5167_v61 }
 0x34f   : > { %1948 = vrot.lane.b32.xlu1 %v1915_v55, %s6709_s26  ;;  %1950 = vrot.lane.b32.xlu2 %v1916_v43, %s6709_s26  ;;  %v1396_v55 = vmul.f32 %v1384_v1, %v4298_v44  ;;  %v1818_v43 = vmul.f32 %v1806_v18, %v4347_v5  ;;  %v1493_v1 = vmul.f32 %v4705_v16, %v5079_v47 }
 0x350   : > { %v1807_v5 = vmul.f32 %v4745_v17, %v5124_v7 }
 0x351   : > { %v5178_v45 = vpop.permute.xlu2 %2045  ;;  %1744 = vrot.lane.b32.xlu0 %v1710_v46, %s6711_s1  ;;  %v5181_v28 = vpop.permute.xlu1 %1526  ;;  %v1505_v18 = vmul.f32 %v1493_v1, %v4308_v49  ;;  %v2344_v1 = vmul.f32 %v4717_v62, %v4284_v34 }
 0x352   : > { %6741 = vst [vmem:[#allocation60_spill] sm:$0xff] %v5178_v45 }
 0x353   : > { %v5187_v61 = vpop.permute.xlu0 %2047 }
 0x354   : > { %6742 = vst [vmem:[#allocation61_spill] sm:$0xff] %v5187_v61 }
 0x357   : > { %1431 = vrot.lane.b32.xlu1 %v1396_v55, %s6707_s27  ;;  %1427 = vrot.lane.b32.xlu2 %v1394_v19, %s6707_s27  ;;  %v1504_v55 = vmul.f32 %v1492_v2, %v4330_v60  ;;  %v2025_v19 = vmul.f32 %v2013_v27, %v4384_v30  ;;  %v1697_v2 = vmul.f32 %v4681_v37, %v5133_v38 }
 0x359   : > { %v5196_v46 = vpop.permute.xlu2 %1314  ;;  %1851 = vrot.lane.b32.xlu0 %v1818_v43, %s6713_s0  ;;  %v5199_v8 = vpop.permute.xlu1 %1734  ;;  %v1709_v27 = vmul.f32 %v1697_v2, %v4325_v58  ;;  %v1819_v2 = vmul.f32 %v1807_v5, %v4361_v12 }
 0x35b   : > { %v5205_v45 = vpop.permute.xlu0 %1316 }
 0x35f   : > { %1538 = vrot.lane.b32.xlu1 %v1504_v55, %s6710_s2  ;;  %1540 = vrot.lane.b32.xlu2 %v1505_v18, %s6710_s2  ;;  %v1711_v18 = vmul.f32 %v1699_v24, %v4335_v0  ;;  %v1808_v24 = vmul.f32 %v4745_v17, %v5079_v47  ;;  %v2012_v17 = vmul.f32 %v4695_v13, %v5133_v38 }
 0x361   : > { %v5214_v43 = vpop.permute.xlu2 %1629  ;;  %2059 = vrot.lane.b32.xlu0 %v2025_v19, %s6715_s3  ;;  %v5217_v16 = vpop.permute.xlu1 %1841  ;;  %v2347_v19 = vmul.f32 %v2344_v1, %v4315_v52 }
 0x363   : > { %v5225_v55 = vpop.permute.xlu0 %1631 }
 0x364   : > { %6743 = vst [vmem:[#allocation62_spill] sm:$0xff] %v5225_v55 }
 0x367   : > { %1746 = vrot.lane.b32.xlu1 %v1711_v18, %s6711_s1  ;;  %1742 = vrot.lane.b32.xlu2 %v1709_v27, %s6711_s1  ;;  %v1820_v18 = vmul.f32 %v1808_v24, %v4355_v11  ;;  %v2024_v24 = vmul.f32 %v2012_v17, %v4379_v26 }
 0x369   : > { %v5232_v30 = vpop.permute.xlu2 %1944  ;;  %2354 = vrot.lane.b32.xlu0 %v2347_v19, %s6707_s27  ;;  %v5235_v37 = vpop.permute.xlu1 %2049  ;;  %v2014_v19 = vmul.f32 %v4695_v13, %v5079_v47  ;;  %v3966_v13 = vld [vmem:[%s6694_s12 + $0xc] sm:$0xf] }
 0x36a   : > { %6744 = vst [vmem:[#allocation63_spill] sm:$0xff] %v5232_v30 }
 0x36b   : > { %6745 = vst [vmem:[#allocation64_spill] sm:$0xff] %v5235_v37  ;;  %v5241_v0 = vpop.permute.xlu0 %1946  ;;  %v2026_v5 = vmul.f32 %v2014_v19, %v4377_v23 }
 0x36c   : > { %6746 = vst [vmem:[#allocation65_spill] sm:$0xff] %v5241_v0 }
 0x36f   : > { %1853 = vrot.lane.b32.xlu1 %v1819_v2, %s6713_s0  ;;  %1855 = vrot.lane.b32.xlu2 %v1820_v18, %s6713_s0  ;;  %v2345_v2 = vmul.f32 %v4717_v62, %v4287_v35  ;;  %v6762_v35 = vld [vmem:[#allocation22_spill] sm:$0xff] }
 0x371   : > { %v5247_v1 = vpop.permute.xlu2 %1421  ;;  %v5249_v27 = vpop.permute.xlu1 %1312  ;;  %v2348_v19 = vmul.f32 %v2345_v2, %v4298_v44 }
 0x373   : > { %v5255_v52 = vpop.permute.xlu0 %1423 }
 0x377   : > { %2061 = vrot.lane.b32.xlu1 %v2026_v5, %s6715_s3  ;;  %2057 = vrot.lane.b32.xlu2 %v2024_v24, %s6715_s3 }
 0x379   : > { %v5263_v18 = vpop.permute.xlu2 %1534  ;;  %v5265_v12 = vpop.permute.xlu1 %1627 }
 0x37b   : > { %v5267_v47 = vpop.permute.xlu0 %1530 }
 0x37f   : > { %2356 = vrot.lane.b32.xlu1 %v2348_v19, %s6707_s27  ;;  %2368 = vperm.xlu2 %4053, %v3966_v13  }
 0x381   : > { %v5274_v17 = vpop.permute.xlu2 %1736  ;;  %v5276_v5 = vpop.permute.xlu1 %1942 }
 0x382   : > { %6747 = vst [vmem:[#allocation66_spill] sm:$0xff] %v5276_v5 }
 0x383   : > { %v5278_v62 = vpop.permute.xlu0 %1738 }
 0x389   : > { %v5280_v24 = vpop.permute.xlu2 %1849  ;;  %v5282_v26 = vpop.permute.xlu1 %1425 }
 0x38a   : > { %6748 = vst [vmem:[#allocation67_spill] sm:$0xff] %v5280_v24 }
 0x38b   : > { %v5284_v23 = vpop.permute.xlu0 %1845 }
 0x38c   : > { %6749 = vst [vmem:[#allocation68_spill] sm:$0xff] %v5284_v23 }
 0x391   : > { %v5286_v11 = vpop.permute.xlu2 %2051  ;;  %v5288_v58 = vpop.permute.xlu1 %1532 }
 0x392   : > { %6750 = vst [vmem:[#allocation69_spill] sm:$0xff] %v5286_v11 }
 0x393   : > { %v5290_v2 = vpop.permute.xlu0 %2053 }
 0x394   : > { %6751 = vst [vmem:[#allocation70_spill] sm:$0xff] %v5290_v2 }
 0x399   : > { %v5292_v19 = vpop.permute.xlu2 %1320  ;;  %v5294_v13 = vpop.permute.xlu1 %1740 }
 0x39a   : > { %6752 = vst [vmem:[#allocation71_spill] sm:$0xff] %v5294_v13 }
 0x39b   : > { %v5296_v44 = vpop.permute.xlu0 %1322 }
 0x3a1   : > { %v5298_v37 = vpop.permute.xlu2 %1635  ;;  %v5300_v0 = vpop.permute.xlu1 %1847 }
 0x3a2   : > { %6753 = vst [vmem:[#allocation72_spill] sm:$0xff] %v5298_v37  ;;  %v1235_v37 = vmul.f32 %v4685_v63, %v4724_v31  ;;  %v1237_v31 = vmul.f32 %v6762_v35, %v4859_v3  ;;  %v1434_v3 = vsel %vm818_vm7, %v4956_v50, %v5004_v36 }
 0x3a3   : > { %v5302_v61 = vpop.permute.xlu0 %1637 }
 0x3a4   : > { %6754 = vst [vmem:[#allocation73_spill] sm:$0xff] %v5302_v61  ;;  %v1243_v55 = vmul.f32 %v1235_v37, %v4221_v6  ;;  %v1542_v37 = vsel %vm856_vm8, %v4971_v15, %v5021_v51  ;;  %v1245_v15 = vmul.f32 %v1237_v31, %v4221_v6  ;;  %v6766_v31 = vld [vmem:[#allocation48_spill] sm:$0xff] }
 0x3a9   : > { %v5304_v24 = vpop.permute.xlu2 %1950  ;;  %v5306_v5 = vpop.permute.xlu1 %2055 }
 0x3aa   : > { %6755 = vst [vmem:[#allocation74_spill] sm:$0xff] %v5304_v24  ;;  %v1324_v24 = vsel %vm777_vm6, %v4937_v14, %v4885_v4  ;;  %v1325_v14 = vsel %vm777_vm6, %v4885_v4, %v4901_v54  ;;  %v1238_v4 = vmul.f32 %v6762_v35, %v4856_v42 }
 0x3ab   : > { %6756 = vst [vmem:[#allocation75_spill] sm:$0xff] %v5306_v5  ;;  %v5308_v11 = vpop.permute.xlu0 %1952  ;;  %v1340_v34 = vadd.f32 %v1324_v24, %v1243_v55 }
 0x3ac   : > { %6757 = vst [vmem:[#allocation76_spill] sm:$0xff] %v5308_v11  ;;  %v1236_v11 = vmul.f32 %v4685_v63, %v4753_v48  ;;  %v6763_v63 = vld [vmem:[#allocation3_spill] sm:$0xff] }
 0x3ae   : > { %v1244_v48 = vmul.f32 %v1236_v11, %v6763_v63  ;;  %v1326_v11 = vsel %vm777_vm6, %v5107_v29, %v5052_v39 }
 0x3b0   : > { %v1341_v54 = vadd.f32 %v1325_v14, %v1244_v48  ;;  %v1327_v14 = vsel %vm777_vm6, %v5052_v39, %v6766_v31 }
 0x3b1   : > { %v5310_v30 = vpop.permute.xlu2 %1427  ;;  %v5312_v2 = vpop.permute.xlu1 %1318 }
 0x3b3   : > { %v5318_v13 = vpop.permute.xlu0 %1429 }
 0x3b9   : > { %v5314_v60 = vpop.permute.xlu2 %1540  ;;  %v5316_v49 = vpop.permute.xlu1 %1633 }
 0x3ba   : > { %6758 = vst [vmem:[#allocation77_spill] sm:$0xff] %v5314_v60 }
 0x3bb   : > { %6759 = vst [vmem:[#allocation78_spill] sm:$0xff] %v5316_v49  ;;  %v1433_v49 = vsel %vm818_vm7, %v4949_v33, %v4956_v50  ;;  %v5340_v60 = vpop.permute.xlu0 %1536  ;;  %v6765_v33 = vld [vmem:[#allocation27_spill] sm:$0xff]  ;;  %v1328_v50 = vsel %vm777_vm6, %v5249_v27, %v5196_v46  ;;  %v1435_v27 = vsel %vm818_vm7, %v5104_v10, %v5113_v32 }
 0x3bc   : > { %v1242_v23 = vmul.f32 %v6765_v33, %v5124_v7  ;;  %v1449_v55 = vadd.f32 %v1433_v49, %v1340_v34  ;;  %v1450_v34 = vadd.f32 %v1434_v3, %v1341_v54  ;;  %v1342_v49 = vadd.f32 %v1326_v11, %v1245_v15  ;;  %v6768_v3 = vld [vmem:[#allocation43_spill] sm:$0xff]  ;;  %v6770_v15 = vld [vmem:[#allocation54_spill] sm:$0xff] }
 0x3bd   : > { %v1241_v42 = vmul.f32 %v6765_v33, %v5133_v38  ;;  %v1748_v38 = vsel %vm920_vm10, %v4995_v57, %v4991_v59  ;;  %v6767_v33 = vld [vmem:[#allocation39_spill] sm:$0xff]  ;;  %v1857_v39 = vsel %vm958_vm11, %v6768_v3, %v5063_v25  ;;  %v1643_v3 = vsel %vm882_vm9, %v5265_v12, %v5214_v43 }
 0x3be   : > { %v1558_v7 = vadd.f32 %v1542_v37, %v1449_v55  ;;  %v1250_v24 = vmul.f32 %v1242_v23, %v6763_v63  ;;  %v1437_v23 = vsel %vm818_vm7, %v5247_v1, %v5255_v52  ;;  %v1640_v57 = vsel %vm882_vm9, %v4905_v53, %v6767_v33 }
 0x3bf   : > { %v1451_v55 = vadd.f32 %v1435_v27, %v1342_v49  ;;  %v1546_v1 = vsel %vm856_vm8, %v5267_v47, %v5288_v58  ;;  %v1330_v49 = vsel %vm777_vm6, %v5312_v2, %v5292_v19  ;;  %v1329_v2 = vsel %vm777_vm6, %v5196_v46, %v5205_v45  ;;  %v6777_v46 = vld [vmem:[#allocation49_spill] sm:$0xff] }
 0x3c0   : > { %v1439_v45 = vsel %vm818_vm7, %v5310_v30, %v5318_v13  ;;  %v1547_v12 = vsel %vm856_vm8, %v5288_v58, %v5263_v18  ;;  %v1751_v30 = vsel %vm920_vm10, %v5151_v40, %v5199_v8  ;;  %v1752_v58 = vsel %vm920_vm10, %v5274_v17, %v5278_v62 }
 0x3c1   : > { %v5327_v5 = vpop.permute.xlu2 %1742  ;;  %v5329_v61 = vpop.permute.xlu1 %1948 }
 0x3c2   : > { %6760 = vst [vmem:[#allocation79_spill] sm:$0xff] %v5327_v5 }
 0x3c3   : > { %6761 = vst [vmem:[#allocation80_spill] sm:$0xff] %v5329_v61  ;;  %v6764_v61 = vld [vmem:[#allocation23_spill] sm:$0xff] }
 0x3c4   : > { %v1239_v5 = vmul.f32 %v6764_v61, %v4989_v22  ;;  %v1543_v22 = vsel %vm856_vm8, %v5021_v51, %v4973_v20  ;;  %v1639_v20 = vsel %vm882_vm9, %v4958_v41, %v4905_v53  ;;  %v1246_v51 = vmul.f32 %v1238_v4, %v6763_v63  ;;  %v6769_v4 = vld [vmem:[#allocation47_spill] sm:$0xff]  ;;  %v5409_v53 = vpop.permute.xlu0 %1744 }
 0x3c5   : > { %v1655_v37 = vadd.f32 %v1639_v20, %v1558_v7  ;;  %v1544_v41 = vsel %vm856_vm8, %v5135_v56, %v5181_v28  ;;  %v1240_v10 = vmul.f32 %v6764_v61, %v4985_v9  ;;  %v1436_v56 = vsel %vm818_vm7, %v5113_v32, %v5165_v21  ;;  %v6771_v32 = vld [vmem:[#allocation44_spill] sm:$0xff] }
 0x3c6   : > { %v1247_v35 = vmul.f32 %v1239_v5, %v4221_v6  ;;  %v1559_v5 = vadd.f32 %v1543_v22, %v1450_v34  ;;  %v1749_v9 = vsel %vm920_vm10, %v4991_v59, %v6769_v4  ;;  %v1343_v11 = vadd.f32 %v1327_v14, %v1246_v51  ;;  %v6775_v14 = vld [vmem:[#allocation55_spill] sm:$0xff] }
 0x3c7   : > { %v1764_v61 = vadd.f32 %v1748_v38, %v1655_v37  ;;  %v1545_v22 = vsel %vm856_vm8, %v5181_v28, %v6770_v15  ;;  %v1560_v7 = vadd.f32 %v1544_v41, %v1451_v55  ;;  %v1858_v21 = vsel %vm958_vm11, %v5063_v25, %v6771_v32  ;;  %v6773_v38 = vld [vmem:[#allocation42_spill] sm:$0xff]  ;;  %v6776_v41 = vld [vmem:[#allocation41_spill] sm:$0xff] }
 0x3c8   : > { %v1344_v48 = vadd.f32 %v1328_v50, %v1247_v35  ;;  %v1656_v54 = vadd.f32 %v1640_v57, %v1559_v5  ;;  %v1452_v34 = vadd.f32 %v1436_v56, %v1343_v11  ;;  %v1248_v35 = vmul.f32 %v1240_v10, %v6763_v63  ;;  %v6772_v5 = vld [vmem:[#allocation40_spill] sm:$0xff]  ;;  %v6774_v25 = vld [vmem:[#allocation50_spill] sm:$0xff] }
 0x3c9   : > { %v5368_v36 = vpop.permute.xlu2 %1855  ;;  %v5370_v29 = vpop.permute.xlu1 %1431  ;;  %v1873_v59 = vadd.f32 %v1857_v39, %v1764_v61  ;;  %v1249_v51 = vmul.f32 %v1241_v42, %v4221_v6  ;;  %v1954_v31 = vsel %vm984_vm12, %v6773_v38, %v6772_v5  ;;  %v5436_v42 = vsel %vm984_vm12, %v6772_v5, %v6776_v41  ;;  %v6778_v56 = vld [vmem:[#allocation56_spill] sm:$0xff]  ;;  %v6785_v38 = vld [vmem:[#allocation62_spill] sm:$0xff]  ;;  %v6790_v41 = vld [vmem:[#allocation13_spill] sm:$0xff] }
 0x3ca   : > { %v1453_v50 = vadd.f32 %v1437_v23, %v1344_v48  ;;  %v1765_v47 = vadd.f32 %v1749_v9, %v1656_v54  ;;  %v1641_v48 = vsel %vm882_vm9, %v6775_v14, %v6774_v25  ;;  %v1561_v37 = vadd.f32 %v1545_v22, %v1452_v34  ;;  %v6779_v22 = vld [vmem:[#allocation59_spill] sm:$0xff]  ;;  %v6781_v34 = vld [vmem:[#allocation77_spill] sm:$0xff]  ;;  %v6787_v14 = vld [vmem:[#allocation72_spill] sm:$0xff] }
 0x3cb   : > { %v1657_v23 = vadd.f32 %v1641_v48, %v1560_v7  ;;  %v1346_v33 = vadd.f32 %v1330_v49, %v1249_v51  ;;  %v5440_v57 = vadd.f32 %v1954_v31, %v1873_v59  ;;  %v1438_v39 = vsel %vm818_vm7, %v5255_v52, %v5282_v26  ;;  %v6784_v51 = vld [vmem:[#allocation8_spill] sm:$0xff]  ;;  %v6788_v48 = vld [vmem:[#allocation78_spill] sm:$0xff] }
 0x3cc   : > { %v1562_v20 = vadd.f32 %v1546_v1, %v1453_v50  ;;  %v5438_v10 = vadd.f32 %v1858_v21, %v1765_v47  ;;  %v1642_v55 = vsel %vm882_vm9, %v6774_v25, %v6777_v46  ;;  %v1750_v4 = vsel %vm920_vm10, %v6778_v56, %v5151_v40  ;;  %v1852_v40 = vpop.permute.xlu0 %1851  ;;  %v6782_v47 = vld [vmem:[#allocation6_spill] sm:$0xff] }
 0x3cd   : > { %v1345_v9 = vadd.f32 %v1329_v2, %v1248_v35  ;;  %v1658_v11 = vadd.f32 %v1642_v55, %v1561_v37  ;;  %v1331_v52 = vsel %vm777_vm6, %v5292_v19, %v5296_v44  ;;  %v1766_v1 = vadd.f32 %v1750_v4, %v1657_v23  ;;  %v6780_v44 = vld [vmem:[#allocation68_spill] sm:$0xff]  ;;  %v6783_v35 = vld [vmem:[#allocation7_spill] sm:$0xff]  ;;  %v6789_v37 = vld [vmem:[#allocation10_spill] sm:$0xff] }
 0x3ce   : > { %v1659_v61 = vadd.f32 %v1643_v3, %v1562_v20  ;;  %v1455_v15 = vadd.f32 %v1439_v45, %v1346_v33  ;;  %v1859_v7 = vsel %vm958_vm11, %v6779_v22, %v5217_v16  ;;  %v1861_v18 = vsel %vm958_vm11, %v6780_v44, %v5300_v0  ;;  %v6791_v33 = vld [vmem:[#allocation5_spill] sm:$0xff]  ;;  %v6793_v56 = vld [vmem:[#allocation46_spill] sm:$0xff]  ;;  %v6794_v4 = vld [vmem:[#allocation63_spill] sm:$0xff] }
 0x3cf   : > { %v1454_v54 = vadd.f32 %v1438_v39, %v1345_v9  ;;  %v1347_v19 = vadd.f32 %v1331_v52, %v1250_v24  ;;  %v1875_v39 = vadd.f32 %v1859_v7, %v1766_v1  ;;  %v6792_v55 = vld [vmem:[#allocation45_spill] sm:$0xff]  ;;  %v6795_v9 = vld [vmem:[#allocation66_spill] sm:$0xff] }
 0x3d0   : > { %v1768_v50 = vadd.f32 %v1752_v58, %v1659_v61  ;;  %v1958_v61 = vsel %vm984_vm12, %v6795_v9, %v6794_v4  ;;  %v6798_v1 = vld [vmem:[#allocation57_spill] sm:$0xff]  ;;  %v6799_v58 = vld [vmem:[#allocation58_spill] sm:$0xff]  ;;  %v6812_v9 = vld [vmem:[#allocation64_spill] sm:$0xff] }
 0x3d1   : > { %v5422_v27 = vpop.permute.xlu2 %2057  ;;  %v1539_v28 = vpop.permute.xlu1 %1538  ;;  %v1563_v8 = vadd.f32 %v1547_v12, %v1454_v54  ;;  %v6796_v12 = vld [vmem:[#allocation67_spill] sm:$0xff]  ;;  %v1860_v44 = vsel %vm958_vm11, %v5217_v16, %v6799_v58  ;;  %v6814_v58 = vld [vmem:[#allocation76_spill] sm:$0xff] }
 0x3d2   : > { %v1548_v26 = vsel %vm856_vm8, %v5340_v60, %v1539_v28  ;;  %v1440_v60 = vsel %vm818_vm7, %v5318_v13, %v5370_v29  ;;  %v1549_v49 = vsel %vm856_vm8, %v1539_v28, %v6781_v34  ;;  %v1644_v13 = vsel %vm882_vm9, %v5214_v43, %v6785_v38  ;;  %v6786_v29 = vld [vmem:[#allocation71_spill] sm:$0xff] }
 0x3d3   : > { %v1564_v32 = vadd.f32 %v1548_v26, %v1455_v15  ;;  %v1753_v24 = vsel %vm920_vm10, %v5278_v62, %v6786_v29  ;;  %v1877_v31 = vadd.f32 %v1861_v18, %v1768_v50  ;;  %v1456_v25 = vadd.f32 %v1440_v60, %v1347_v19  ;;  %v6797_v26 = vld [vmem:[#allocation52_spill] sm:$0xff]  ;;  %v6800_v18 = vld [vmem:[#allocation73_spill] sm:$0xff]  ;;  %v6801_v60 = vld [vmem:[#allocation79_spill] sm:$0xff] }
 0x3d4   : > { %v1645_v28 = vsel %vm882_vm9, %v6788_v48, %v6787_v14  ;;  %v1660_v45 = vadd.f32 %v1644_v13, %v1563_v8  ;;  %v2063_v62 = vsel %vm1022_vm13, %v6793_v56, %v6792_v55  ;;  %v1862_v52 = vsel %vm958_vm11, %v5300_v0, %v6796_v12  ;;  %v6802_v34 = vld [vmem:[#allocation51_spill] sm:$0xff]  ;;  %v6807_v48 = vld [vmem:[#allocation65_spill] sm:$0xff] }
 0x3d5   : > { %v1565_v46 = vadd.f32 %v1549_v49, %v1456_v25  ;;  %v1661_v43 = vadd.f32 %v1645_v28, %v1564_v32  ;;  %v1956_v54 = vsel %vm984_vm12, %v6798_v1, %v6797_v26  ;;  %v1767_v15 = vadd.f32 %v1751_v30, %v1658_v11  ;;  %v6803_v49 = vld [vmem:[#allocation70_spill] sm:$0xff]  ;;  %v6806_v25 = vld [vmem:[#allocation60_spill] sm:$0xff]  ;;  %v6811_v56 = vld [vmem:[#allocation53_spill] sm:$0xff] }
 0x3d6   : > { %v1769_v22 = vadd.f32 %v1753_v24, %v1660_v45  ;;  %v1974_v7 = vadd.f32 %v1958_v61, %v1877_v31  ;;  %v1646_v0 = vsel %vm882_vm9, %v6787_v14, %v6800_v18  ;;  %v1754_v8 = vsel %vm920_vm10, %v6801_v60, %v5409_v53  ;;  %v6805_v31 = vld [vmem:[#allocation61_spill] sm:$0xff] }
 0x3d7   : > { %v1662_v30 = vadd.f32 %v1646_v0, %v1565_v46  ;;  %v1770_v50 = vadd.f32 %v1754_v8, %v1661_v43  ;;  %v2064_v16 = vsel %vm1022_vm13, %v6792_v55, %v6802_v34  ;;  %v1876_v13 = vadd.f32 %v1860_v44, %v1767_v15  ;;  %v6815_v8 = vld [vmem:[#allocation34_spill] sm:$0xff] }
 0x3d8   : > { %v1878_v11 = vadd.f32 %v1862_v52, %v1769_v22  ;;  %v2065_v14 = vsel %vm1022_vm13, %v6806_v25, %v6805_v31  ;;  %v1959_v28 = vsel %vm984_vm12, %v6794_v4, %v6807_v48  ;;  %v1957_v4 = vsel %vm984_vm12, %v6797_v26, %v6811_v56  ;;  %v6813_v22 = vld [vmem:[#allocation28_spill] sm:$0xff]  ;;  %v2135_v48 = vld [vmem:[%s6818_s8] sm:$0xff] }
 0x3d9   : > { %v2369_v21 = vpop.permute.xlu2 %2368  ;;  %v1747_v59 = vpop.permute.xlu1 %1746  ;;  %v2066_v61 = vsel %vm1022_vm13, %v6805_v31, %v6812_v9  ;;  %v2079_v52 = vadd.f32 %v2063_v62, %v5440_v57  ;;  %v1973_v1 = vadd.f32 %v1957_v4, %v1876_v13  ;;  %v1971_v26 = vadd.f32 %v5436_v42, %v5438_v10  ;;  %v3968_v42 = vld [vmem:[%s6694_s12 + $0x14] sm:$0xf]  ;;  %v3970_v9 = vld [vmem:[%s6694_s12 + $0x1c] sm:$0xf] }
 0x3da   : > { %v2371_v17 = vmul.f32 %v2369_v21, %v6782_v47  ;;  %v2372_v20 = vmul.f32 %v2369_v21, %v6783_v35  ;;  %v2373_v5 = vmul.f32 %v2369_v21, %v6784_v51  ;;  %v1755_v19 = vsel %vm920_vm10, %v5409_v53, %v1747_v59  ;;  %v2060_v53 = vpop.permute.xlu0 %2059 }
 0x3db   : > { %v1972_v21 = vadd.f32 %v1956_v54, %v1875_v39  ;;  %v1771_v59 = vadd.f32 %v1755_v19, %v1662_v30  ;;  %v3967_v39 = vld [vmem:[%s6694_s12 + $0x10] sm:$0xf]  ;;  %v1975_v45 = vadd.f32 %v1959_v28, %v1878_v11  ;;  %v2069_v12 = vsel %vm1022_vm13, %v5422_v27, %v2060_v53  ;;  %v6817_v11 = vld [vmem:[#allocation33_spill] sm:$0xff] }
 0x3dc   : > { %v2376_v2 = vmul.f32 %v2373_v5, %v6789_v37  ;;  %v2375_v23 = vmul.f32 %v2372_v20, %v6790_v41  ;;  %v2374_v3 = vmul.f32 %v2371_v17, %v6791_v33  ;;  %v6804_v17 = vld [vmem:[#allocation69_spill] sm:$0xff]  ;;  %v2082_v18 = vadd.f32 %v2066_v61, %v1973_v1  ;;  %v6816_v19 = vld [vmem:[#allocation24_spill] sm:$0xff] }
 0x3dd   : > { %v2067_v20 = vsel %vm1022_vm13, %v6804_v17, %v6803_v49  ;;  %v2081_v55 = vadd.f32 %v2065_v14, %v1972_v21  ;;  %v2111_v30 = vadd.f32 %v6817_v11, %v2079_v52  ;;  %v3969_v61 = vld [vmem:[%s6694_s12 + $0x18] sm:$0xf]  ;;  %v6819_v52 = vld [vmem:[#allocation15_spill] sm:$0xff] }
 0x3de   : > { %2384 = vrot.lane.b32.xlu2 %v2376_v2, %s6710_s2  ;;  %2382 = vrot.lane.b32.xlu1 %v2375_v23, %s6710_s2  ;;  %v2083_v24 = vadd.f32 %v2067_v20, %v1974_v7  ;;  %v6808_v2 = vld [vmem:[#allocation75_spill] sm:$0xff]  ;;  %v6809_v23 = vld [vmem:[#allocation74_spill] sm:$0xff] }
 0x3df   : > { %2380 = vrot.lane.b32.xlu0 %v2374_v3, %s6710_s2  ;;  %v6810_v3 = vld [vmem:[#allocation80_spill] sm:$0xff]  ;;  %v1961_v44 = vsel %vm984_vm12, %v6809_v23, %v6814_v58  ;;  %v2113_v57 = vadd.f32 %v6816_v19, %v2081_v55 }
 0x3e0   : > { %v2115_v7 = vadd.f32 %v6813_v22, %v2083_v24 }
 0x3e1   : > { %v1854_v32 = vpop.permute.xlu1 %1853  ;;  %v2121_v17 = vmax.f32 %v2113_v57, 0.0  ;;  %v6822_v57 = vld [vmem:[#allocation35_spill] sm:$0xff] }
 0x3e2   : > { %v1863_v5 = vsel %vm958_vm11, %v1852_v40, %v1854_v32  ;;  %v1864_v38 = vsel %vm958_vm11, %v1854_v32, %v5368_v36  ;;  %v2068_v40 = vsel %vm1022_vm13, %v6803_v49, %v6808_v2  ;;  %v1960_v36 = vsel %vm984_vm12, %v6810_v3, %v6809_v23  ;;  %v3971_v2 = vld [vmem:[%s6694_s12 + $0x20] sm:$0xf]  ;;  %v2136_v3 = vld [vmem:[%s6818_s8 + $0x8] sm:$0xff] }
 0x3e3   : > { %v1879_v29 = vadd.f32 %v1863_v5, %v1770_v50  ;;  %v1880_v46 = vadd.f32 %v1864_v38, %v1771_v59  ;;  %v2084_v54 = vadd.f32 %v2068_v40, %v1975_v45  ;;  %v2080_v50 = vadd.f32 %v2064_v16, %v1971_v26  ;;  %v5596_v45 = vpop.permute.xlu0 %2354 }
 0x3e4   : > { %v2123_v34 = vmax.f32 %v2115_v7, 0.0  ;;  %v2114_v5 = vadd.f32 %v6816_v19, %v2082_v18 }
 0x3e5   : > { %v1976_v43 = vadd.f32 %v1960_v36, %v1879_v29  ;;  %v1977_v0 = vadd.f32 %v1961_v44, %v1880_v46  ;;  %v2116_v49 = vadd.f32 %v6813_v22, %v2084_v54  ;;  %v2112_v38 = vadd.f32 %v6817_v11, %v2080_v50  ;;  %v2137_v36 = vld [vmem:[%s6818_s8 + $0x10] sm:$0xff]  ;;  %v6821_v44 = vld [vmem:[#allocation14_spill] sm:$0xff] }
 0x3e6   : > { %v2131_v16 = vmin.f32 %v2123_v34, 6.0  ;;  %v2129_v29 = vmin.f32 %v2121_v17, 6.0  ;;  %v2122_v31 = vmax.f32 %v2114_v5, 0.0  ;;  %v6820_v22 = vld [vmem:[#allocation12_spill] sm:$0xff]  ;;  %v6825_v34 = vld [vmem:[#allocation25_spill] sm:$0xff] }
 0x3e7   : > { %2396 = vperm.xlu0 %4054, %v3967_v39   ;;  %v2085_v15 = vadd.f32 %v2069_v12, %v1976_v43  ;;  %v2124_v59 = vmax.f32 %v2116_v49, 0.0  ;;  %v2120_v28 = vmax.f32 %v2112_v38, 0.0  ;;  %v2138_v39 = vld [vmem:[%s6818_s8 + $0x18] sm:$0xff]  ;;  %s4027_s8 = sshll.u32 %s6859_s30, 4 }
 0x3e8   : > { %v2130_v40 = vmin.f32 %v2122_v31, 6.0  ;;  %s718_s4 = scalar_lea.vmem %s6548_s22, %s4027_s8 }
 0x3e9   : > { %v2062_v60 = vpop.permute.xlu1 %2061  ;;  %v2117_v27 = vadd.f32 %v6815_v8, %v2085_v15  ;;  %v2132_v14 = vmin.f32 %v2124_v59, 6.0  ;;  %v2128_v23 = vmin.f32 %v2120_v28, 6.0 }
 0x3ea   : > { %v2070_v62 = vsel %vm1022_vm13, %v2060_v53, %v2062_v60  ;;  %v2119_v53 = vmax.f32 %v2111_v30, 0.0  ;;  %v6823_v30 = vld [vmem:[#allocation29_spill] sm:$0xff] }
 0x3eb   : > { %v2086_v32 = vadd.f32 %v2070_v62, %v1977_v0  ;;  %v2125_v21 = vmax.f32 %v2117_v27, 0.0 }
 0x3ec   : > { %v2127_v25 = vmin.f32 %v2119_v53, 6.0 }
 0x3ed   : > { %v2133_v10 = vmin.f32 %v2125_v21, 6.0  ;;  %v2118_v20 = vadd.f32 %v6815_v8, %v2086_v32  ;;  %v6824_v32 = vld [vmem:[#allocation26_spill] sm:$0xff] }
 0x3ef   : > { %2421 = vperm.xlu0 %4054, %v3968_v42   ;;  %2187 = vmatpush.msra.mxu2 %v2133_v10  ;;  %v2126_v13 = vmax.f32 %v2118_v20, 0.0 }
 0x3f1   : > { %2188 = vmatpush.msra.mxu2 %v2131_v16  ;;  %v2134_v24 = vmin.f32 %v2126_v13, 6.0 }
 0x3f3   : > { %2189 = vmatpush.msra.mxu2 %v2129_v29  ;;  %2216 = vmatpush.msra.mxu3 %v2134_v24 }
 0x3f5   : > { %2190 = vmatpush.msra.mxu2 %v2127_v25  ;;  %2217 = vmatpush.msra.mxu3 %v2132_v14 }
 0x3f6   : > { %3954 = vmatmul.msk.f32.vlgmr.msra.gmra.mxu2 %vm941_vm4, %v2135_v48 }
 0x3f7   : > { %2502 = vperm.xlu0 %4054, %v3971_v2   ;;  %2218 = vmatpush.msra.mxu3 %v2130_v40 }
 0x3f9   : > { %2219 = vmatpush.msra.mxu3 %v2128_v23  ;;  %v2249_v23 = vld [vmem:[%s6826_s10] sm:$0xff] }
 0x3fa   : > { %3958 = vmatmul.msk.f32.vlgmr.msra.gmra.mxu3 %vm941_vm4, %v2135_v48 }
 0x3fe   : > { %3955 = vmatmul.msk.f32.gmra.mxu2 %vm941_vm4, %v2136_v3 }
 0x402   : > { %3959 = vmatmul.msk.f32.gmra.mxu3 %vm941_vm4, %v2136_v3 }
 0x406   : > { %3956 = vmatmul.msk.f32.gmra.mxu2 %vm941_vm4, %v2137_v36 }
 0x40a   : > { %3960 = vmatmul.msk.f32.gmra.mxu3 %vm941_vm4, %v2137_v36 }
 0x40e   : > { %3957 = vmatmul.msk.f32.gmra.mxu2 %vm941_vm4, %v2138_v39 }
 0x412   : > { %3961 = vmatmul.msk.f32.gmra.mxu3 %vm941_vm4, %v2138_v39  ;;  %v5634_v39 = vpop.permute.xlu1 %2356 }
 0x451   : > { %v5598_v46 = vpop.permute.xlu0 %2380 }
 0x459   : > { %v2397_v43 = vpop.permute.xlu0 %2396 }
 0x45a   : > { %v2399_v55 = vmul.f32 %v2397_v43, %v6782_v47  ;;  %v2400_v56 = vmul.f32 %v2397_v43, %v6783_v35  ;;  %v2401_v15 = vmul.f32 %v2397_v43, %v6784_v51  ;;  %v5636_v43 = vpop.permute.xlu1 %2382 }
 0x45c   : > { %2407 = vrot.lane.b32.xlu2 %v2400_v56, %s6708_s29  ;;  %2405 = vrot.lane.b32.xlu1 %v2399_v55, %s6708_s29  ;;  %v5638_v55 = vpop.permute.xlu2 %2384 }
 0x461   : > { %v2422_v4 = vpop.permute.xlu0 %2421 }
 0x462   : > { %v2425_v12 = vmul.f32 %v2422_v4, %v6783_v35  ;;  %v2424_v54 = vmul.f32 %v2422_v4, %v6782_v47  ;;  %v2426_v58 = vmul.f32 %v2422_v4, %v6784_v51 }
 0x464   : > { %2477 = vperm.xlu2 %4053, %v3970_v9   ;;  %2449 = vperm.xlu1 %4052, %v3969_v61   ;;  %v2428_v1 = vmul.f32 %v2425_v12, %v6819_v52  ;;  %v2427_v7 = vmul.f32 %v2424_v54, %v6820_v22  ;;  %v2429_v26 = vmul.f32 %v2426_v58, %v6821_v44  ;;  %v6827_v54 = vld [vmem:[#allocation17_spill] sm:$0xff] }
 0x466   : > { %2435 = vrot.lane.b32.xlu0 %v2428_v1, %s6711_s1 }
 0x46c   : > { %2409 = vrot.lane.b32.xlu1 %v2401_v15, %s6708_s29  ;;  %2433 = vrot.lane.b32.xlu2 %v2427_v7, %s6711_s1  ;;  %v6828_v7 = vld [vmem:[#allocation18_spill] sm:$0xff] }
 0x474   : > { %2437 = vrot.lane.b32.xlu1 %v2429_v26, %s6711_s1  ;;  %v6829_v26 = vld [vmem:[#allocation16_spill] sm:$0xff] }
 0x479   : > { %v2192_v18 = vpop.f32.mrf.mxu2 }
 0x47a   : > { %v2193_v49 = vadd.f32 %v2192_v18, %v6825_v34 }
 0x47c   : > { %v2233_v53 = vmax.f32 %v2193_v49, 0.0 }
 0x47d   : > { %v2221_v0 = vpop.f32.mrf.mxu3 }
 0x47e   : > { %v2222_v59 = vadd.f32 %v2221_v0, %v6825_v34  ;;  %v2241_v2 = vmin.f32 %v2233_v53, 6.0  ;;  %v6832_v34 = vld [vmem:[#allocation20_spill] sm:$0xff]  ;;  %v3985_v53 = vld [vmem:[%s6542_s16 + $0x38] sm:$0xff] }
 0x480   : > { %v2234_v28 = vmax.f32 %v2222_v59, 0.0  ;;  %v2709_v59 = vld [vmem:[%s6542_s16 + $0x18] sm:$0xff] }
 0x481   : > { %v2195_v60 = vpop.f32.mrf.mxu2 }
 0x482   : > { %v2196_v50 = vadd.f32 %v2195_v60, %v6823_v30  ;;  %v2242_v36 = vmin.f32 %v2234_v28, 6.0  ;;  %v3989_v28 = vld [vmem:[%s6542_s16 + $0x58] sm:$0xff] }
 0x484   : > { %v2235_v5 = vmax.f32 %v2196_v50, 0.0 }
 0x485   : > { %v2224_v8 = vpop.f32.mrf.mxu3 }
 0x486   : > { %v2225_v38 = vadd.f32 %v2224_v8, %v6823_v30  ;;  %v2243_v14 = vmin.f32 %v2235_v5, 6.0  ;;  %v6830_v30 = vld [vmem:[#allocation19_spill] sm:$0xff]  ;;  %v2544_v5 = vld [vmem:[%s6541_s15 + $0x10] sm:$0xff] }
 0x488   : > { %v2236_v25 = vmax.f32 %v2225_v38, 0.0  ;;  %v3982_v38 = vld [vmem:[%s6542_s16 + $0x20] sm:$0xff] }
 0x489   : > { %v2198_v27 = vpop.f32.mrf.mxu2 }
 0x48a   : > { %v2199_v62 = vadd.f32 %v2198_v27, %v6822_v57  ;;  %v2244_v3 = vmin.f32 %v2236_v25, 6.0  ;;  %v2503_v27 = vpop.permute.xlu0 %2502  ;;  %v3986_v25 = vld [vmem:[%s6542_s16 + $0x40] sm:$0xff] }
 0x48c   : > { %v2237_v42 = vmax.f32 %v2199_v62, 0.0  ;;  %v2507_v62 = vmul.f32 %v2503_v27, %v6784_v51 }
 0x48d   : > { %v2227_v19 = vpop.f32.mrf.mxu3 }
 0x48e   : > { %v2228_v10 = vadd.f32 %v2227_v19, %v6822_v57  ;;  %v2245_v31 = vmin.f32 %v2237_v42, 6.0  ;;  %v2506_v57 = vmul.f32 %v2503_v27, %v6783_v35  ;;  %v2510_v50 = vmul.f32 %v2507_v62, %v6830_v30  ;;  %v2543_v42 = vld [vmem:[%s6541_s15 + $0x8] sm:$0xff] }
 0x490   : > { %v2238_v29 = vmax.f32 %v2228_v10, 0.0  ;;  %v2526_v10 = vld [vmem:[%s6539_s13] sm:$0xf] }
 0x491   : > { %v2201_v11 = vpop.f32.mrf.mxu2 }
 0x492   : > { %v2202_v21 = vadd.f32 %v2201_v11, %v6824_v32  ;;  %v2246_v40 = vmin.f32 %v2238_v29, 6.0  ;;  %v2505_v11 = vmul.f32 %v2503_v27, %v6782_v47  ;;  %v3983_v29 = vld [vmem:[%s6542_s16 + $0x28] sm:$0xff] }
 0x493   : > { %v3995_v27 = vld [vmem:[%s6542_s16 + $0x88] sm:$0xff] }
 0x494   : > { %v2239_v17 = vmax.f32 %v2202_v21, 0.0  ;;  %v2508_v49 = vmul.f32 %v2505_v11, %v6832_v34  ;;  %v4013_v11 = vld [vmem:[%s6542_s16 + $0x118] sm:$0xff] }
 0x495   : > { %v2230_v20 = vpop.f32.mrf.mxu3 }
 0x496   : > { %v2231_v16 = vadd.f32 %v2230_v20, %v6824_v32  ;;  %v2247_v13 = vmin.f32 %v2239_v17, 6.0  ;;  %v6831_v32 = vld [vmem:[#allocation21_spill] sm:$0xff]  ;;  %v2707_v17 = vld [vmem:[%s6542_s16 + $0x8] sm:$0xff] }
 0x497   : > { %v2509_v21 = vmul.f32 %v2506_v57, %v6831_v32  ;;  %v2545_v20 = vld [vmem:[%s6541_s15 + $0x18] sm:$0xff] }
 0x498   : > { %v2240_v24 = vmax.f32 %v2231_v16, 0.0  ;;  %2271 = vmatpush.msrb.mxu0 %v2247_v13  ;;  %v2706_v16 = vld [vmem:[%s6542_s16] sm:$0xff]  ;;  %v2708_v13 = vld [vmem:[%s6542_s16 + $0x10] sm:$0xff] }
 0x49a   : > { %2272 = vmatpush.msrb.mxu0 %v2245_v31  ;;  %v2248_v48 = vmin.f32 %v2240_v24, 6.0  ;;  %v3988_v24 = vld [vmem:[%s6542_s16 + $0x50] sm:$0xff] }
 0x49b   : > { %v3984_v31 = vld [vmem:[%s6542_s16 + $0x30] sm:$0xff] }
 0x49c   : > { %2273 = vmatpush.msrb.mxu0 %v2243_v14  ;;  %2291 = vmatpush.msrb.mxu1 %v2248_v48  ;;  %v3993_v14 = vld [vmem:[%s6542_s16 + $0x78] sm:$0xff]  ;;  %v3987_v48 = vld [vmem:[%s6542_s16 + $0x48] sm:$0xff] }
 0x49e   : > { %2274 = vmatpush.msrb.mxu0 %v2241_v2  ;;  %2292 = vmatpush.msrb.mxu1 %v2246_v40  ;;  %v6833_v40 = vld [vmem:[#allocation30_spill] sm:$0xff] }
 0x49f   : > { %3962 = vmatmul.msk.f32.vlgmr.msrb.gmra.mxu0 %vm941_vm4, %v2249_v23 }
 0x4a0   : > { %2293 = vmatpush.msrb.mxu1 %v2244_v3 }
 0x4a2   : > { %2294 = vmatpush.msrb.mxu1 %v2242_v36  ;;  %v3997_v36 = vld [vmem:[%s6542_s16 + $0x98] sm:$0xff] }
 0x4a3   : > { %3963 = vmatmul.msk.f32.vlgmr.msrb.gmra.mxu1 %vm941_vm4, %v2249_v23 }
 0x4b6   : > { %v5642_v4 = vpop.permute.xlu2 %2407 }
 0x4be   : > { %v2478_v0 = vpop.permute.xlu2 %2477 }
 0x4bf   : > { %v2481_v60 = vmul.f32 %v2478_v0, %v6783_v35  ;;  %v2482_v8 = vmul.f32 %v2478_v0, %v6784_v51  ;;  %v2480_v19 = vmul.f32 %v2478_v0, %v6782_v47  ;;  %v3996_v0 = vld [vmem:[%s6542_s16 + $0x90] sm:$0xff] }
 0x4c6   : > { %v2434_v57 = vpop.permute.xlu2 %2433 }
 0x4ce   : > { %v5640_v56 = vpop.permute.xlu1 %2405 }
 0x4d6   : > { %v2450_v9 = vpop.permute.xlu1 %2449 }
 0x4d7   : > { %v2452_v61 = vmul.f32 %v2450_v9, %v6782_v47  ;;  %v2453_v12 = vmul.f32 %v2450_v9, %v6783_v35  ;;  %v2454_v1 = vmul.f32 %v2450_v9, %v6784_v51  ;;  %v2542_v51 = vld [vmem:[%s6541_s15] sm:$0xff] }
 0x4d8   : > { %v3990_v9 = vld [vmem:[%s6542_s16 + $0x60] sm:$0xff] }
 0x4d9   : > { %v2457_v15 = vmul.f32 %v2454_v1, %v6827_v54  ;;  %v2456_v58 = vmul.f32 %v2453_v12, %v6828_v7  ;;  %v2455_v18 = vmul.f32 %v2452_v61, %v6829_v26  ;;  %v3992_v12 = vld [vmem:[%s6542_s16 + $0x70] sm:$0xff] }
 0x4da   : > { %v4000_v1 = vld [vmem:[%s6542_s16 + $0xb0] sm:$0xff] }
 0x4db   : > { %2465 = vrot.lane.b32.xlu1 %v2457_v15, %s6713_s0  ;;  %2463 = vrot.lane.b32.xlu0 %v2456_v58, %s6713_s0  ;;  %v3991_v15 = vld [vmem:[%s6542_s16 + $0x68] sm:$0xff]  ;;  %v4001_v58 = vld [vmem:[%s6542_s16 + $0xb8] sm:$0xff] }
 0x4dc   : > { %2461 = vrot.lane.b32.xlu2 %v2455_v18, %s6713_s0  ;;  %v3999_v18 = vld [vmem:[%s6542_s16 + $0xa8] sm:$0xff] }
 0x4de   : > { %v2410_v62 = vpop.permute.xlu1 %2409 }
 0x4e3   : > { %2490 = vrot.lane.b32.xlu1 %v2482_v8, %s6709_s26  ;;  %2488 = vrot.lane.b32.xlu0 %v2481_v60, %s6709_s26  ;;  %v4005_v60 = vld [vmem:[%s6542_s16 + $0xd8] sm:$0xff]  ;;  %v3998_v8 = vld [vmem:[%s6542_s16 + $0xa0] sm:$0xff] }
 0x4e4   : > { %2486 = vrot.lane.b32.xlu2 %v2480_v19, %s6709_s26  ;;  %v4004_v19 = vld [vmem:[%s6542_s16 + $0xd0] sm:$0xff] }
 0x4eb   : > { %2518 = vrot.lane.b32.xlu1 %v2510_v50, %s6715_s3  ;;  %2516 = vrot.lane.b32.xlu0 %v2509_v21, %s6715_s3  ;;  %v3994_v50 = vld [vmem:[%s6542_s16 + $0x80] sm:$0xff]  ;;  %v4003_v21 = vld [vmem:[%s6542_s16 + $0xc8] sm:$0xff] }
 0x4ec   : > { %2514 = vrot.lane.b32.xlu2 %v2508_v49, %s6715_s3 }
 0x4f3   : > { %2553 = vperm.xlu1 %4052, %v2543_v42   ;;  %2548 = vperm.xlu0 %4054, %v2542_v51   ;;  %v2436_v42 = vpop.permute.xlu0 %2435  ;;  %v2438_v51 = vpop.permute.xlu1 %2437 }
 0x4f4   : > { %2529 = vperm.xlu2 %4053, %v2526_v10   ;;  %v4012_v10 = vld [vmem:[%s6542_s16 + $0x110] sm:$0xff] }
 0x4fb   : > { %2717 = vperm.xlu1 %4052, %v2707_v17   ;;  %2563 = vperm.xlu0 %4054, %v2545_v20   ;;  %v4009_v17 = vld [vmem:[%s6542_s16 + $0xf8] sm:$0xff]  ;;  %v4002_v20 = vld [vmem:[%s6542_s16 + $0xc0] sm:$0xff] }
 0x4fc   : > { %2558 = vperm.xlu2 %4053, %v2544_v5   ;;  %v6834_v5 = vld [vmem:[#allocation36_spill] sm:$0xff] }
 0x503   : > { %2753 = vperm.xlu1 %4052, %v3982_v38   ;;  %2712 = vperm.xlu0 %4054, %v2706_v16   ;;  %v2307_v38 = vmul.f32 %v6834_v5, %v6782_v47  ;;  %v2308_v16 = vmul.f32 %v6834_v5, %v6783_v35  ;;  %v6838_v35 = vld [vmem:[#allocation38_spill] sm:$0xff] }
 0x504   : > { %2722 = vperm.xlu2 %4053, %v2708_v13  }
 0x505   : > { %v2309_v47 = vmul.f32 %v2307_v38, %v4221_v6 }
 0x50b   : > { %2768 = vperm.xlu1 %4052, %v3985_v53   ;;  %2727 = vperm.xlu0 %4054, %v2709_v59  }
 0x50c   : > { %2758 = vperm.xlu2 %4053, %v3983_v29   ;;  %v6835_v29 = vld [vmem:[#allocation32_spill] sm:$0xff] }
 0x513   : > { %2860 = vperm.xlu1 %4052, %v3988_v24   ;;  %2763 = vperm.xlu0 %4054, %v3984_v31   ;;  %v6836_v24 = vld [vmem:[#allocation37_spill] sm:$0xff] }
 0x514   : > { %2850 = vperm.xlu2 %4053, %v3986_v25   ;;  %v2331_v31 = vsel %vm777_vm6, %v6836_v24, %v6835_v29  ;;  %v6837_v25 = vld [vmem:[#allocation31_spill] sm:$0xff] }
 0x51b   : > { %2974 = vperm.xlu1 %4052, %v3993_v14   ;;  %2855 = vperm.xlu0 %4054, %v3987_v48   ;;  %v2330_v14 = vsel %vm777_vm6, %v6837_v25, %v6836_v24  ;;  %v2310_v48 = vmul.f32 %v2308_v16, %v6763_v63  ;;  %v3584_v24 = vld [vmem:[%s6543_s17 + $0x10] sm:$0xff] }
 0x51c   : > { %2865 = vperm.xlu2 %4053, %v3989_v28   ;;  %v2276_v2 = vpop.f32.mrf.mxu0  ;;  %v2358_v28 = vsel %vm818_vm7, %v6838_v35, %v5596_v45  ;;  %v2538_v35 = vld [vmem:[%s6540_s14] sm:$0xff] }
 0x51d   : > { %v2277_v23 = vadd.f32 %v2276_v2, %v6833_v40  ;;  %v2359_v2 = vsel %vm818_vm7, %v5596_v45, %v5634_v39  ;;  %v2387_v45 = vsel %vm856_vm8, %v5636_v43, %v5638_v55 }
 0x51f   : > { %2299 = vst [vmem:[%s718_s4] sm:$0xff] %v2277_v23  ;;  %v4008_v23 = vld [vmem:[%s6542_s16 + $0xf0] sm:$0xff] }
 0x520   : > { %v2296_v3 = vpop.f32.mrf.mxu1 }
 0x521   : > { %v2297_v61 = vadd.f32 %v2296_v3, %v6833_v40  ;;  %v4006_v40 = vld [vmem:[%s6542_s16 + $0xe0] sm:$0xff]  ;;  %v2335_v3 = vadd.f32 %v2331_v31, %v2310_v48 }
 0x523   : > { %2300 = vst [vmem:[%s718_s4 + $0x8] sm:$0xff] %v2297_v61  ;;  %3083 = vperm.xlu1 %4052, %v3997_v36   ;;  %2959 = vperm.xlu0 %4054, %v3990_v9   ;;  %v2334_v36 = vadd.f32 %v2330_v14, %v2309_v47  ;;  %v4007_v9 = vld [vmem:[%s6542_s16 + $0xe8] sm:$0xff]  ;;  %v2386_v61 = vsel %vm856_vm8, %v5598_v46, %v5636_v43 }
 0x524   : > { %2969 = vperm.xlu2 %4053, %v3992_v12   ;;  %v2363_v12 = vadd.f32 %v2359_v2, %v2335_v3  ;;  %v2440_v43 = vsel %vm920_vm10, %v2436_v42, %v2438_v51  ;;  %v2540_v2 = vld [vmem:[%s6540_s14 + $0x10] sm:$0xff] }
 0x525   : > { %v2362_v39 = vadd.f32 %v2358_v28, %v2334_v36  ;;  %v2539_v28 = vld [vmem:[%s6540_s14 + $0x8] sm:$0xff] }
 0x52b   : > { %3175 = vperm.xlu1 %4052, %v4000_v1   ;;  %2964 = vperm.xlu0 %4054, %v3991_v15   ;;  %v2411_v1 = vsel %vm882_vm9, %v5640_v56, %v5642_v4  ;;  %v2412_v15 = vsel %vm882_vm9, %v5642_v4, %v2410_v62  ;;  %v4011_v56 = vld [vmem:[%s6542_s16 + $0x108] sm:$0xff] }
 0x52c   : > { %3180 = vperm.xlu2 %4053, %v4001_v58   ;;  %v2390_v58 = vadd.f32 %v2386_v61, %v2362_v39 }
 0x533   : > { %3170 = vperm.xlu1 %4052, %v3999_v18   ;;  %3078 = vperm.xlu0 %4054, %v3996_v0   ;;  %v2391_v18 = vadd.f32 %v2387_v45, %v2363_v12 }
 0x534   : > { %3289 = vperm.xlu2 %4053, %v4005_v60   ;;  %v2439_v60 = vsel %vm920_vm10, %v2434_v57, %v2436_v42 }
 0x536   : > { %v2462_v49 = vpop.permute.xlu2 %2461 }
 0x53b   : > { %3165 = vperm.xlu1 %4052, %v3998_v8   ;;  %3073 = vperm.xlu0 %4054, %v3995_v27   ;;  %v2415_v8 = vadd.f32 %v2411_v1, %v2390_v58  ;;  %v2416_v27 = vadd.f32 %v2412_v15, %v2391_v18 }
 0x53c   : > { %3284 = vperm.xlu2 %4053, %v4004_v19  }
 0x53d   : > { %v2443_v4 = vadd.f32 %v2439_v60, %v2415_v8  ;;  %v2444_v62 = vadd.f32 %v2440_v43, %v2416_v27 }
 0x53e   : > { %v2487_v13 = vpop.permute.xlu2 %2486 }
 0x543   : > { %3495 = vperm.xlu1 %4052, %v4013_v11   ;;  %3068 = vperm.xlu0 %4054, %v3994_v50   ;;  %v4010_v50 = vld [vmem:[%s6542_s16 + $0x100] sm:$0xff] }
 0x544   : > { %3279 = vperm.xlu2 %4053, %v4003_v21  }
 0x546   : > { %v2515_v55 = vpop.permute.xlu2 %2514 }
 0x54b   : > { %3490 = vperm.xlu1 %4052, %v4012_v10   ;;  %3398 = vperm.xlu0 %4054, %v4009_v17  }
 0x54c   : > { %3274 = vperm.xlu2 %4053, %v4002_v20  }
 0x54d   : > { %v2464_v53 = vpop.permute.xlu0 %2463  ;;  %v2466_v59 = vpop.permute.xlu1 %2465 }
 0x54e   : > { %v2467_v19 = vsel %vm958_vm11, %v2462_v49, %v2464_v53  ;;  %v2468_v11 = vsel %vm958_vm11, %v2464_v53, %v2466_v59  ;;  %v2530_v59 = vpop.permute.xlu2 %2529 }
 0x54f   : > { %v2471_v42 = vadd.f32 %v2467_v19, %v2443_v4  ;;  %v2472_v51 = vadd.f32 %v2468_v11, %v2444_v62 }
 0x553   : > { %3383 = vperm.xlu1 %4052, %v4006_v40   ;;  %3393 = vperm.xlu0 %4054, %v4008_v23   ;;  %v2541_v40 = vld [vmem:[%s6540_s14 + $0x18] sm:$0xff] }
 0x554   : > { %3388 = vperm.xlu2 %4053, %v4007_v9  }
 0x555   : > { %v2489_v0 = vpop.permute.xlu0 %2488  ;;  %v2491_v46 = vpop.permute.xlu1 %2490 }
 0x556   : > { %v2492_v57 = vsel %vm984_vm12, %v2487_v13, %v2489_v0  ;;  %v2493_v21 = vsel %vm984_vm12, %v2489_v0, %v2491_v46  ;;  %v3585_v13 = vld [vmem:[%s6543_s17 + $0x18] sm:$0xff]  ;;  %v2559_v23 = vpop.permute.xlu2 %2558 }
 0x557   : > { %v2496_v49 = vadd.f32 %v2492_v57, %v2471_v42  ;;  %v2497_v10 = vadd.f32 %v2493_v21, %v2472_v51 }
 0x55b   : > { %3485 = vperm.xlu0 %4054, %v4011_v56  }
 0x55c   : > { %3480 = vperm.xlu2 %4053, %v4010_v50  }
 0x55d   : > { %v2517_v17 = vpop.permute.xlu0 %2516  ;;  %v2519_v20 = vpop.permute.xlu1 %2518 }
 0x55e   : > { %v2520_v5 = vsel %vm1022_vm13, %v2515_v55, %v2517_v17  ;;  %v2521_v38 = vsel %vm1022_vm13, %v2517_v17, %v2519_v20  ;;  %v5862_v3 = vpop.permute.xlu2 %2722 }
 0x55f   : > { %v2524_v16 = vadd.f32 %v2520_v5, %v2496_v49  ;;  %v2525_v53 = vadd.f32 %v2521_v38, %v2497_v10  ;;  %6839 = vst [vmem:[#allocation22_spill] sm:$0xff] %v5862_v3 }
 0x561   : > { %v2533_v29 = vadd.f32 %v2530_v59, %v2525_v53  ;;  %v2532_v31 = vadd.f32 %v2530_v59, %v2524_v16 }
 0x563   : > { %3603 = vperm.xlu0 %4054, %v3585_v13   ;;  %v2534_v25 = vmax.f32 %v2532_v31, 0.0  ;;  %v2535_v14 = vmax.f32 %v2533_v29, 0.0 }
 0x564   : > { %3598 = vperm.xlu2 %4053, %v3584_v24  }
 0x565   : > { %v2536_v48 = vmin.f32 %v2534_v25, 6.0  ;;  %v2537_v47 = vmin.f32 %v2535_v14, 6.0  ;;  %v2554_v61 = vpop.permute.xlu1 %2553  ;;  %v2549_v45 = vpop.permute.xlu0 %2548 }
 0x566   : > { %v5864_v36 = vpop.permute.xlu2 %2758 }
 0x567   : > { %3972 = vmatpush.msk.msrb.mxu2 %vm1082_vm14, %v2536_v48  ;;  %3977 = vmatpush.msk.msrb.mxu3 %vm1082_vm14, %v2537_v47 }
 0x568   : > { %3973 = vmatmul.msk.f32.vlgmr.msrb.gmra.mxu2 %vm1069_vm15, %v2538_v35  ;;  %3978 = vmatmul.msk.f32.vlgmr.msrb.gmra.mxu3 %vm1069_vm15, %v2538_v35 }
 0x56d   : > { %v5870_v18 = vpop.permute.xlu1 %2717  ;;  %v2564_v21 = vpop.permute.xlu0 %2563 }
 0x56e   : > { %v5866_v9 = vpop.permute.xlu2 %2850 }
 0x570   : > { %3974 = vmatmul.msk.f32.gmra.mxu2 %vm1069_vm15, %v2539_v28  ;;  %3979 = vmatmul.msk.f32.gmra.mxu3 %vm1069_vm15, %v2539_v28 }
 0x575   : > { %v5876_v62 = vpop.permute.xlu1 %2753  ;;  %v5886_v31 = vpop.permute.xlu0 %2712 }
 0x576   : > { %v5868_v39 = vpop.permute.xlu2 %2865 }
 0x578   : > { %3975 = vmatmul.msk.f32.gmra.mxu2 %vm1069_vm15, %v2540_v2  ;;  %3980 = vmatmul.msk.f32.gmra.mxu3 %vm1069_vm15, %v2540_v2 }
 0x57d   : > { %v5882_v53 = vpop.permute.xlu1 %2768  ;;  %v5894_v2 = vpop.permute.xlu0 %2727 }
 0x57e   : > { %v5874_v27 = vpop.permute.xlu2 %2969  ;;  %6840 = vst [vmem:[#allocation3_spill] sm:$0xff] %v5894_v2 }
 0x580   : > { %3976 = vmatmul.msk.f32.gmra.mxu2 %vm1069_vm15, %v2541_v40  ;;  %3981 = vmatmul.msk.f32.gmra.mxu3 %vm1069_vm15, %v2541_v40 }
 0x585   : > { %v5892_v28 = vpop.permute.xlu1 %2860 }
 0x586   : > { %v5880_v17 = vpop.permute.xlu2 %3180 }
 0x58e   : > { %v5888_v48 = vpop.permute.xlu2 %3289 }
 0x596   : > { %v5896_v40 = vpop.permute.xlu2 %3284 }
 0x5eb   : > { %v2601_v12 = vpop.f32.mrf.mxu2  ;;  %v2630_v1 = vpop.f32.mrf.mxu3 }
 0x5ec   : > { %v2602_v15 = vadd.f32 %v2601_v12, %v2549_v45  ;;  %v2631_v58 = vadd.f32 %v2630_v1, %v2549_v45  ;;  %v5902_v45 = vpop.permute.xlu2 %3279 }
 0x5ee   : > { %v2642_v0 = vmax.f32 %v2602_v15, 0.0  ;;  %v2643_v46 = vmax.f32 %v2631_v58, 0.0 }
 0x5f0   : > { %v2650_v60 = vmin.f32 %v2642_v0, 6.0  ;;  %v2651_v43 = vmin.f32 %v2643_v46, 6.0 }
 0x5f2   : > { %2666 = vrot.lane.b32.xlu1 %v2650_v60, %s6700_s6  ;;  %2668 = vrot.lane.b32.xlu2 %v2651_v43, %s6700_s6 }
 0x5f3   : > { %v2604_v55 = vpop.f32.mrf.mxu2  ;;  %v2633_v8 = vpop.f32.mrf.mxu3 }
 0x5f4   : > { %v2605_v19 = vadd.f32 %v2604_v55, %v2554_v61  ;;  %v2634_v11 = vadd.f32 %v2633_v8, %v2554_v61  ;;  %v5900_v61 = vpop.permute.xlu0 %2763  ;;  %v5908_v15 = vpop.permute.xlu2 %3274 }
 0x5f6   : > { %v2644_v56 = vmax.f32 %v2605_v19, 0.0  ;;  %v2645_v4 = vmax.f32 %v2634_v11, 0.0 }
 0x5f8   : > { %v2652_v50 = vmin.f32 %v2644_v56, 6.0  ;;  %v2653_v57 = vmin.f32 %v2645_v4, 6.0 }
 0x5fa   : > { %2672 = vrot.lane.b32.xlu1 %v2653_v57, %s6700_s6  ;;  %2670 = vrot.lane.b32.xlu0 %v2652_v50, %s6700_s6 }
 0x5fb   : > { %v2607_v42 = vpop.f32.mrf.mxu2  ;;  %v2636_v51 = vpop.f32.mrf.mxu3 }
 0x5fc   : > { %v2608_v49 = vadd.f32 %v2607_v42, %v2559_v23  ;;  %v2637_v10 = vadd.f32 %v2636_v51, %v2559_v23  ;;  %v5898_v23 = vpop.permute.xlu1 %2974  ;;  %v5906_v1 = vpop.permute.xlu0 %2855 }
 0x5fd   : > { %v5914_v46 = vpop.permute.xlu2 %3388 }
 0x5fe   : > { %v2646_v20 = vmax.f32 %v2608_v49, 0.0  ;;  %v2647_v5 = vmax.f32 %v2637_v10, 0.0 }
 0x600   : > { %v2654_v38 = vmin.f32 %v2646_v20, 6.0  ;;  %v2655_v16 = vmin.f32 %v2647_v5, 6.0 }
 0x602   : > { %2674 = vrot.lane.b32.xlu2 %v2654_v38, %s6700_s6  ;;  %2676 = vrot.lane.b32.xlu0 %v2655_v16, %s6700_s6 }
 0x603   : > { %v2610_v59 = vpop.f32.mrf.mxu2  ;;  %v2639_v13 = vpop.f32.mrf.mxu3 }
 0x604   : > { %v2611_v29 = vadd.f32 %v2610_v59, %v2564_v21  ;;  %v2640_v24 = vadd.f32 %v2639_v13, %v2564_v21  ;;  %v5904_v12 = vpop.permute.xlu1 %3083  ;;  %v5912_v0 = vpop.permute.xlu0 %2959 }
 0x605   : > { %v5920_v55 = vpop.permute.xlu2 %3480 }
 0x606   : > { %v2648_v25 = vmax.f32 %v2611_v29, 0.0  ;;  %v2649_v14 = vmax.f32 %v2640_v24, 0.0  ;;  %6841 = vst [vmem:[#allocation23_spill] sm:$0xff] %v5920_v55  ;;  %v6844_v29 = vld [vmem:[#allocation11_spill] sm:$0xff] }
 0x608   : > { %v2656_v47 = vmin.f32 %v2648_v25, 6.0  ;;  %v2657_v35 = vmin.f32 %v2649_v14, 6.0 }
 0x60a   : > { %2680 = vrot.lane.b32.xlu2 %v2657_v35, %s6700_s6  ;;  %2678 = vrot.lane.b32.xlu1 %v2656_v47, %s6700_s6 }
 0x60c   : > { %v5910_v58 = vpop.permute.xlu1 %3175  ;;  %v5918_v43 = vpop.permute.xlu0 %2964 }
 0x60d   : > { %v5926_v11 = vpop.permute.xlu2 %3598 }
 0x60e   : > { %6842 = vst [vmem:[#allocation27_spill] sm:$0xff] %v5926_v11 }
 0x614   : > { %v5916_v60 = vpop.permute.xlu1 %3170  ;;  %v5924_v19 = vpop.permute.xlu0 %3078 }
 0x61c   : > { %v5922_v8 = vpop.permute.xlu1 %3165  ;;  %v5930_v4 = vpop.permute.xlu0 %3073 }
 0x624   : > { %v5928_v56 = vpop.permute.xlu1 %3495  ;;  %v3069_v51 = vpop.permute.xlu0 %3068 }
 0x62c   : > { %v5938_v42 = vpop.permute.xlu1 %3490  ;;  %v5965_v35 = vpop.permute.xlu0 %3398 }
 0x634   : > { %v3384_v10 = vpop.permute.xlu1 %3383 }
 0x64c   : > { %v2669_v50 = vpop.permute.xlu2 %2668 }
 0x64d   : > { %v5933_v57 = vsel %vm736_vm0, %v2669_v50, 0.0 }
 0x64e   : > { %v2773_v21 = vmul.f32 %v5876_v62, %v5933_v57  ;;  %v3088_v49 = vmul.f32 %v3069_v51, %v5933_v57  ;;  %v2979_v25 = vmul.f32 %v5912_v0, %v5933_v57 }
 0x650   : > { %2799 = vrot.lane.b32.xlu1 %v2773_v21, %s6699_s25 }
 0x658   : > { %3114 = vrot.lane.b32.xlu1 %v3088_v49, %s6708_s29  ;;  %v3403_v49 = vmul.f32 %v3384_v10, %v5933_v57 }
 0x664   : > { %v2667_v20 = vpop.permute.xlu1 %2666 }
 0x665   : > { %v5943_v5 = vsel %vm736_vm0, %v2667_v20, %v2669_v50  ;;  %v5946_v38 = vsel %vm736_vm0, 0.0, %v2667_v20  ;;  %v3185_v50 = vmul.f32 %v5922_v8, %v5933_v57  ;;  %v2870_v20 = vmul.f32 %v5866_v9, %v5933_v57 }
 0x666   : > { %6843 = vst [vmem:[#allocation48_spill] sm:$0xff] %v5946_v38  ;;  %v2771_v16 = vmul.f32 %v5876_v62, %v5946_v38  ;;  %v2772_v59 = vmul.f32 %v5876_v62, %v5943_v5  ;;  %v2869_v13 = vmul.f32 %v5866_v9, %v5943_v5  ;;  %v3086_v14 = vmul.f32 %v3069_v51, %v5946_v38 }
 0x667   : > { %v3087_v47 = vmul.f32 %v3069_v51, %v5943_v5  ;;  %v2991_v62 = vmul.f32 %v2979_v25, %v6789_v37  ;;  %v3402_v21 = vmul.f32 %v3384_v10, %v5943_v5  ;;  %v3197_v51 = vmul.f32 %v3185_v50, %v6821_v44 }
 0x668   : > { %2795 = vrot.lane.b32.xlu2 %v2771_v16, %s6699_s25  ;;  %2797 = vrot.lane.b32.xlu0 %v2772_v59, %s6699_s25  ;;  %v2881_v24 = vmul.f32 %v2869_v13, %v6844_v29  ;;  %v5978_v16 = vpop.permute.xlu0 %3393  ;;  %v3294_v59 = vmul.f32 %v5908_v15, %v5933_v57  ;;  %v6845_v13 = vld [vmem:[#allocation9_spill] sm:$0xff]  ;;  %v3401_v25 = vmul.f32 %v3384_v10, %v5946_v38 }
 0x669   : > { %v3292_v50 = vmul.f32 %v5908_v15, %v5946_v38 }
 0x66a   : > { %2906 = vrot.lane.b32.xlu1 %v2881_v24, %s6707_s27  ;;  %v2882_v24 = vmul.f32 %v2870_v20, %v6845_v13 }
 0x66b   : > { %v3304_v20 = vmul.f32 %v3292_v50, %v6829_v26 }
 0x66c   : > { %v2673_v50 = vpop.permute.xlu1 %2672 }
 0x670   : > { %3110 = vrot.lane.b32.xlu2 %v3086_v14, %s6708_s29  ;;  %3112 = vrot.lane.b32.xlu0 %v3087_v47, %s6708_s29  ;;  %v3306_v14 = vmul.f32 %v3294_v59, %v6827_v54  ;;  %v2977_v47 = vmul.f32 %v5912_v0, %v5946_v38  ;;  %v2978_v59 = vmul.f32 %v5912_v0, %v5943_v5 }
 0x671   : > { %v3500_v0 = vmul.f32 %v5920_v55, %v5933_v57 }
 0x672   : > { %3017 = vrot.lane.b32.xlu1 %v2991_v62, %s6710_s2  ;;  %v2868_v62 = vmul.f32 %v5866_v9, %v5946_v38  ;;  %v2989_v10 = vmul.f32 %v2977_v47, %v6791_v33  ;;  %v3183_v9 = vmul.f32 %v5922_v8, %v5946_v38 }
 0x678   : > { %3427 = vrot.lane.b32.xlu2 %v3402_v21, %s6709_s26  ;;  %3429 = vrot.lane.b32.xlu0 %v3403_v49, %s6709_s26  ;;  %v5994_v21 = vpop.permute.xlu0 %3485  ;;  %v6847_v49 = vld [vmem:[#allocation4_spill] sm:$0xff] }
 0x679   : > { %6846 = vst [vmem:[#allocation39_spill] sm:$0xff] %v5994_v21 }
 0x67a   : > { %3223 = vrot.lane.b32.xlu1 %v3197_v51, %s6711_s1  ;;  %v2880_v51 = vmul.f32 %v2868_v62, %v6847_v49 }
 0x680   : > { %2908 = vrot.lane.b32.xlu2 %v2882_v24, %s6707_s27  ;;  %3425 = vrot.lane.b32.xlu0 %v3401_v25, %s6709_s26  ;;  %v3499_v24 = vmul.f32 %v5920_v55, %v5943_v5  ;;  %v3195_v25 = vmul.f32 %v3183_v9, %v6820_v22  ;;  %v6010_v47 = vpop.permute.xlu0 %3603 }
 0x681   : > { %6848 = vst [vmem:[#allocation43_spill] sm:$0xff] %v6010_v47 }
 0x682   : > { %3332 = vrot.lane.b32.xlu1 %v3306_v14, %s6713_s0  ;;  %v2990_v14 = vmul.f32 %v2978_v59, %v6790_v41  ;;  %v3511_v62 = vmul.f32 %v3499_v24, %v6831_v32 }
 0x688   : > { %3013 = vrot.lane.b32.xlu2 %v2989_v10, %s6710_s2  ;;  %2904 = vrot.lane.b32.xlu0 %v2880_v51, %s6707_s27  ;;  %v3184_v10 = vmul.f32 %v5922_v8, %v5943_v5  ;;  %v6021_v51 = vsel %vm736_vm0, %v2673_v50, 0.0  ;;  %v2671_v59 = vpop.permute.xlu0 %2670  ;;  %v3293_v8 = vmul.f32 %v5908_v15, %v5943_v5 }
 0x689   : > { %v2776_v24 = vmul.f32 %v5864_v36, %v6021_v51  ;;  %v6033_v57 = vsel %vm736_vm0, 0.0, %v2671_v59 }
 0x68a   : > { %3328 = vrot.lane.b32.xlu1 %v3304_v20, %s6713_s0  ;;  %v3512_v20 = vmul.f32 %v3500_v0, %v6830_v30  ;;  %v3196_v9 = vmul.f32 %v3184_v10, %v6819_v52  ;;  %v6044_v0 = vsel %vm736_vm0, %v2671_v59, %v2673_v50  ;;  %v3089_v15 = vmul.f32 %v5930_v4, %v6033_v57 }
 0x68b   : > { %v2775_v10 = vmul.f32 %v5864_v36, %v6044_v0  ;;  %v3090_v59 = vmul.f32 %v5930_v4, %v6044_v0 }
 0x690   : > { %3219 = vrot.lane.b32.xlu2 %v3195_v25, %s6711_s1  ;;  %3015 = vrot.lane.b32.xlu0 %v2990_v14, %s6710_s2  ;;  %v2774_v25 = vmul.f32 %v5864_v36, %v6033_v57  ;;  %v3305_v14 = vmul.f32 %v3293_v8, %v6828_v7  ;;  %v3404_v36 = vmul.f32 %v5914_v46, %v6033_v57 }
 0x691   : > { %v2982_v8 = vmul.f32 %v5918_v43, %v6021_v51 }
 0x692   : > { %3536 = vrot.lane.b32.xlu1 %v3511_v62, %s6715_s3  ;;  %v3091_v62 = vmul.f32 %v5930_v4, %v6021_v51  ;;  %v3405_v4 = vmul.f32 %v5914_v46, %v6044_v0 }
 0x698   : > { %3538 = vrot.lane.b32.xlu2 %v3512_v20, %s6715_s3  ;;  %3221 = vrot.lane.b32.xlu0 %v3196_v9, %s6711_s1  ;;  %v3406_v20 = vmul.f32 %v5914_v46, %v6021_v51  ;;  %v2873_v9 = vmul.f32 %v5906_v1, %v6021_v51 }
 0x69a   : > { %2805 = vrot.lane.b32.xlu1 %v2776_v24, %s6699_s25  ;;  %v2885_v50 = vmul.f32 %v2873_v9, %v6845_v13  ;;  %v6060_v24 = vpop.permute.xlu2 %2674  ;;  %v2981_v9 = vmul.f32 %v5918_v43, %v6044_v0 }
 0x6a0   : > { %2801 = vrot.lane.b32.xlu2 %v2774_v25, %s6699_s25  ;;  %3330 = vrot.lane.b32.xlu0 %v3305_v14, %s6713_s0  ;;  %v2872_v25 = vmul.f32 %v5906_v1, %v6044_v0  ;;  %v2994_v14 = vmul.f32 %v2982_v8, %v6789_v37 }
 0x6a2   : > { %3120 = vrot.lane.b32.xlu1 %v3091_v62, %s6708_s29  ;;  %v2884_v62 = vmul.f32 %v2872_v25, %v6844_v29  ;;  %v3188_v25 = vmul.f32 %v5916_v60, %v6021_v51 }
 0x6a8   : > { %3116 = vrot.lane.b32.xlu2 %v3089_v15, %s6708_s29  ;;  %2803 = vrot.lane.b32.xlu0 %v2775_v10, %s6699_s25  ;;  %v6077_v15 = vpop.permute.xlu2 %2680  ;;  %v2980_v10 = vmul.f32 %v5918_v43, %v6033_v57  ;;  %v3187_v43 = vmul.f32 %v5916_v60, %v6044_v0 }
 0x6aa   : > { %3435 = vrot.lane.b32.xlu1 %v3406_v20, %s6709_s26  ;;  %v2871_v20 = vmul.f32 %v5906_v1, %v6033_v57  ;;  %v2992_v46 = vmul.f32 %v2980_v10, %v6791_v33  ;;  %v3186_v1 = vmul.f32 %v5916_v60, %v6033_v57  ;;  %v3296_v60 = vmul.f32 %v5902_v45, %v6044_v0 }
 0x6b0   : > { %2914 = vrot.lane.b32.xlu2 %v2885_v50, %s6707_s27  ;;  %3118 = vrot.lane.b32.xlu0 %v3090_v59, %s6708_s29  ;;  %v2883_v50 = vmul.f32 %v2871_v20, %v6847_v49  ;;  %v2993_v59 = vmul.f32 %v2981_v9, %v6790_v41  ;;  %v3295_v9 = vmul.f32 %v5902_v45, %v6033_v57 }
 0x6b2   : > { %3431 = vrot.lane.b32.xlu1 %v3404_v36, %s6709_s26  ;;  %v6091_v36 = vpop.permute.xlu1 %2678 }
 0x6b8   : > { %3023 = vrot.lane.b32.xlu2 %v2994_v14, %s6710_s2  ;;  %3433 = vrot.lane.b32.xlu0 %v3405_v4, %s6709_s26  ;;  %v3198_v14 = vmul.f32 %v3186_v1, %v6820_v22  ;;  %v3199_v4 = vmul.f32 %v3187_v43, %v6819_v52  ;;  %v2677_v43 = vpop.permute.xlu0 %2676 }
 0x6ba   : > { %2912 = vrot.lane.b32.xlu1 %v2884_v62, %s6707_s27  ;;  %v3200_v62 = vmul.f32 %v3188_v25, %v6821_v44 }
 0x6c0   : > { %3019 = vrot.lane.b32.xlu2 %v2992_v46, %s6710_s2  ;;  %2910 = vrot.lane.b32.xlu0 %v2883_v50, %s6707_s27  ;;  %v3297_v46 = vmul.f32 %v5902_v45, %v6021_v51  ;;  %v3307_v50 = vmul.f32 %v3295_v9, %v6829_v26  ;;  %v3503_v45 = vmul.f32 %v5994_v21, %v6021_v51 }
 0x6c2   : > { %v2796_v8 = vpop.permute.xlu2 %2795  ;;  %3021 = vrot.lane.b32.xlu1 %v2993_v59, %s6710_s2  ;;  %v2800_v10 = vpop.permute.xlu1 %2799  ;;  %v3308_v59 = vmul.f32 %v3296_v60, %v6828_v7  ;;  %v3309_v1 = vmul.f32 %v3297_v46, %v6827_v54  ;;  %v3515_v60 = vmul.f32 %v3503_v45, %v6830_v30  ;;  %v2730_v46 = vmul.f32 %v5886_v31, %v5946_v38 }
 0x6c3   : > { %v6140_v45 = vsel %vm736_vm0, 0.0, %v6060_v24 }
 0x6c8   : > { %3225 = vrot.lane.b32.xlu2 %v3198_v14, %s6711_s1  ;;  %3227 = vrot.lane.b32.xlu0 %v3199_v4, %s6711_s1  ;;  %v3502_v14 = vmul.f32 %v5994_v21, %v6044_v0 }
 0x6ca   : > { %v3111_v20 = vpop.permute.xlu2 %3110  ;;  %3229 = vrot.lane.b32.xlu1 %v3200_v62, %s6711_s1  ;;  %v3115_v4 = vpop.permute.xlu1 %3114  ;;  %v6123_v62 = vsel %vm736_vm0, %v2677_v43, 0.0  ;;  %v3514_v9 = vmul.f32 %v3502_v14, %v6831_v32 }
 0x6cb   : > { %v2779_v51 = vmul.f32 %v5900_v61, %v6123_v62 }
 0x6d0   : > { %3334 = vrot.lane.b32.xlu2 %v3307_v50, %s6713_s0  ;;  %3336 = vrot.lane.b32.xlu0 %v3308_v59, %s6713_s0  ;;  %v2731_v50 = vmul.f32 %v5886_v31, %v5943_v5  ;;  %v6144_v31 = vsel %vm736_vm0, %v6060_v24, %v2677_v43  ;;  %v3094_v43 = vmul.f32 %v5924_v19, %v6123_v62 }
 0x6d1   : > { %v2778_v21 = vmul.f32 %v5900_v61, %v6144_v31 }
 0x6d2   : > { %v3428_v25 = vpop.permute.xlu2 %3427  ;;  %3338 = vrot.lane.b32.xlu1 %v3309_v1, %s6713_s0  ;;  %v2738_v1 = vmul.f32 %v2730_v46, %v4221_v6  ;;  %v2739_v14 = vmul.f32 %v2731_v50, %v6763_v63 }
 0x6d8   : > { %3542 = vrot.lane.b32.xlu2 %v3514_v9, %s6715_s3  ;;  %3544 = vrot.lane.b32.xlu0 %v3515_v60, %s6715_s3 }
 0x6da   : > { %v2909_v59 = vpop.permute.xlu2 %2908  ;;  %v2798_v47 = vpop.permute.xlu0 %2797  ;;  %2811 = vrot.lane.b32.xlu1 %v2779_v51, %s6699_s25  ;;  %v2777_v51 = vmul.f32 %v5900_v61, %v6140_v45  ;;  %v3408_v61 = vmul.f32 %v5978_v16, %v6144_v31 }
 0x6db   : > { %v2819_v5 = vsel %vm777_vm6, %v2796_v8, %v2798_v47  ;;  %v2820_v9 = vsel %vm777_vm6, %v2798_v47, %v2800_v10  ;;  %v3093_v47 = vmul.f32 %v5924_v19, %v6144_v31 }
 0x6dc   : > { %v2835_v60 = vadd.f32 %v2819_v5, %v2738_v1  ;;  %v2836_v11 = vadd.f32 %v2820_v9, %v2739_v14  ;;  %v2907_v46 = vpop.permute.xlu1 %2906  ;;  %v2875_v5 = vmul.f32 %v5892_v28, %v6144_v31  ;;  %v3092_v9 = vmul.f32 %v5924_v19, %v6140_v45 }
 0x6dd   : > { %v2929_v2 = vsel %vm818_vm7, %v2907_v46, %v2909_v59 }
 0x6de   : > { %v6149_v50 = vadd.f32 %v2929_v2, %v2836_v11 }
 0x6e0   : > { %2807 = vrot.lane.b32.xlu2 %v2777_v51, %s6699_s25  ;;  %2809 = vrot.lane.b32.xlu0 %v2778_v21, %s6699_s25  ;;  %v3409_v21 = vmul.f32 %v5978_v16, %v6123_v62 }
 0x6e2   : > { %v3014_v24 = vpop.permute.xlu2 %3013  ;;  %v3113_v8 = vpop.permute.xlu0 %3112  ;;  %3124 = vrot.lane.b32.xlu1 %v3093_v47, %s6708_s29  ;;  %v2887_v47 = vmul.f32 %v2875_v5, %v6844_v29 }
 0x6e3   : > { %v3134_v2 = vsel %vm882_vm9, %v3111_v20, %v3113_v8  ;;  %v3135_v11 = vsel %vm882_vm9, %v3113_v8, %v3115_v4  ;;  %v2874_v20 = vmul.f32 %v5892_v28, %v6140_v45 }
 0x6e4   : > { %v3018_v10 = vpop.permute.xlu1 %3017 }
 0x6e5   : > { %v2886_v51 = vmul.f32 %v2874_v20, %v6847_v49  ;;  %v3407_v20 = vmul.f32 %v5978_v16, %v6140_v45 }
 0x6e8   : > { %3126 = vrot.lane.b32.xlu2 %v3094_v43, %s6708_s29  ;;  %3439 = vrot.lane.b32.xlu0 %v3408_v61, %s6709_s26  ;;  %v2985_v61 = vmul.f32 %v5874_v27, %v6123_v62 }
 0x6ea   : > { %v3220_v59 = vpop.permute.xlu2 %3219  ;;  %v3430_v1 = vpop.permute.xlu0 %3429  ;;  %3441 = vrot.lane.b32.xlu1 %v3409_v21, %s6709_s26  ;;  %v2997_v5 = vmul.f32 %v2985_v61, %v6789_v37 }
 0x6eb   : > { %v6174_v4 = vsel %vm984_vm12, %v3428_v25, %v3430_v1  ;;  %v3191_v1 = vmul.f32 %v5910_v58, %v6123_v62 }
 0x6ec   : > { %v3224_v14 = vpop.permute.xlu1 %3223 }
 0x6f0   : > { %3122 = vrot.lane.b32.xlu2 %v3092_v9, %s6708_s29  ;;  %2916 = vrot.lane.b32.xlu0 %v2886_v51, %s6707_s27  ;;  %v3203_v9 = vmul.f32 %v3191_v1, %v6821_v44 }
 0x6f2   : > { %v6184_v8 = vpop.permute.xlu2 %3538  ;;  %v3426_v43 = vpop.permute.xlu0 %3425  ;;  %2918 = vrot.lane.b32.xlu1 %v2887_v47, %s6707_s27 }
 0x6f3   : > { %v6190_v21 = vsel %vm984_vm12, %v3426_v43, %v3428_v25  ;;  %v2876_v25 = vmul.f32 %v5892_v28, %v6123_v62  ;;  %v2983_v43 = vmul.f32 %v5874_v27, %v6140_v45 }
 0x6f4   : > { %v3333_v19 = vpop.permute.xlu1 %3332 }
 0x6f5   : > { %v2888_v1 = vmul.f32 %v2876_v25, %v6845_v13 }
 0x6f8   : > { %3437 = vrot.lane.b32.xlu2 %v3407_v20, %s6709_s26  ;;  %3029 = vrot.lane.b32.xlu0 %v2997_v5, %s6710_s2  ;;  %v3300_v20 = vmul.f32 %v5896_v40, %v6123_v62  ;;  %v2995_v5 = vmul.f32 %v2983_v43, %v6791_v33 }
 0x6fa   : > { %v6200_v51 = vpop.permute.xlu2 %2801  ;;  %v2905_v47 = vpop.permute.xlu0 %2904  ;;  %3235 = vrot.lane.b32.xlu1 %v3203_v9, %s6711_s1  ;;  %v3312_v28 = vmul.f32 %v3300_v20, %v6827_v54  ;;  %v3506_v20 = vmul.f32 %v5938_v42, %v6123_v62  ;;  %v3189_v62 = vmul.f32 %v5910_v58, %v6140_v45 }
 0x6fb   : > { %v2928_v16 = vsel %vm818_vm7, %v2905_v47, %v2907_v46  ;;  %v3190_v46 = vmul.f32 %v5910_v58, %v6144_v31 }
 0x6fc   : > { %v2944_v61 = vadd.f32 %v2928_v16, %v2835_v60  ;;  %v3329_v55 = vpop.permute.xlu1 %3328  ;;  %v2984_v60 = vmul.f32 %v5874_v27, %v6144_v31 }
 0x700   : > { %2920 = vrot.lane.b32.xlu2 %v2888_v1, %s6707_s27  ;;  %3025 = vrot.lane.b32.xlu0 %v2995_v5, %s6710_s2  ;;  %v2996_v5 = vmul.f32 %v2984_v60, %v6790_v41 }
 0x702   : > { %v6215_v9 = vpop.permute.xlu2 %3116  ;;  %v3016_v38 = vpop.permute.xlu0 %3015  ;;  %3344 = vrot.lane.b32.xlu1 %v3312_v28, %s6713_s0  ;;  %v3202_v28 = vmul.f32 %v3190_v46, %v6819_v52 }
 0x703   : > { %v3037_v47 = vsel %vm856_vm8, %v3014_v24, %v3016_v38  ;;  %v3038_v25 = vsel %vm856_vm8, %v3016_v38, %v3018_v10  ;;  %v3518_v38 = vmul.f32 %v3506_v20, %v6830_v30 }
 0x704   : > { %v3053_v43 = vadd.f32 %v3037_v47, %v2944_v61  ;;  %v3054_v16 = vadd.f32 %v3038_v25, %v6149_v50  ;;  %v6225_v1 = vpop.permute.xlu1 %3536  ;;  %v3299_v50 = vmul.f32 %v5896_v40, %v6144_v31  ;;  %v3504_v47 = vmul.f32 %v5938_v42, %v6140_v45 }
 0x705   : > { %v3201_v25 = vmul.f32 %v3189_v62, %v6820_v22 }
 0x706   : > { %v3150_v27 = vadd.f32 %v3134_v2, %v3053_v43  ;;  %v3151_v3 = vadd.f32 %v3135_v11, %v3054_v16  ;;  %v3311_v43 = vmul.f32 %v3299_v50, %v6828_v7  ;;  %v3516_v58 = vmul.f32 %v3504_v47, %v6832_v34 }
 0x708   : > { %3027 = vrot.lane.b32.xlu2 %v2996_v5, %s6710_s2  ;;  %3233 = vrot.lane.b32.xlu0 %v3202_v28, %s6711_s1 }
 0x70a   : > { %v3222_v24 = vpop.permute.xlu0 %3221  ;;  %v6234_v10 = vpop.permute.xlu2 %2914  ;;  %3550 = vrot.lane.b32.xlu1 %v3518_v38, %s6715_s3 }
 0x70b   : > { %v3243_v2 = vsel %vm920_vm10, %v3220_v59, %v3222_v24  ;;  %v3244_v11 = vsel %vm920_vm10, %v3222_v24, %v3224_v14  ;;  %v3298_v59 = vmul.f32 %v5896_v40, %v6140_v45  ;;  %v6261_v24 = vsel %vm736_vm0, %v6077_v15, 0.0 }
 0x70c   : > { %v3259_v61 = vadd.f32 %v3243_v2, %v3150_v27  ;;  %v3260_v60 = vadd.f32 %v3244_v11, %v3151_v3  ;;  %v2806_v46 = vpop.permute.xlu1 %2805  ;;  %v3505_v3 = vmul.f32 %v5938_v42, %v6144_v31  ;;  %v2732_v42 = vmul.f32 %v5870_v18, %v6033_v57 }
 0x70d   : > { %v3310_v40 = vmul.f32 %v3298_v59, %v6829_v26  ;;  %v6277_v2 = vsel %vm736_vm0, %v6091_v36, %v6077_v15  ;;  %v3559_v15 = vsel %vm1022_vm13, %v6225_v1, %v6184_v8  ;;  %v3412_v8 = vmul.f32 %v5965_v35, %v6261_v24 }
 0x70e   : > { %v3517_v50 = vmul.f32 %v3505_v3, %v6831_v32  ;;  %v2740_v11 = vmul.f32 %v2732_v42, %v4221_v6 }
 0x710   : > { %3231 = vrot.lane.b32.xlu2 %v3201_v25, %s6711_s1  ;;  %3342 = vrot.lane.b32.xlu0 %v3311_v43, %s6713_s0 }
 0x712   : > { %v3331_v14 = vpop.permute.xlu0 %3330  ;;  %v6252_v16 = vpop.permute.xlu2 %3023  ;;  %3546 = vrot.lane.b32.xlu1 %v3516_v58, %s6715_s3 }
 0x713   : > { %v3352_v20 = vsel %vm958_vm11, %v3329_v55, %v3331_v14  ;;  %v3353_v5 = vsel %vm958_vm11, %v3331_v14, %v3333_v19  ;;  %v2733_v55 = vmul.f32 %v5870_v18, %v6044_v0  ;;  %v2782_v19 = vmul.f32 %v5882_v53, %v6261_v24 }
 0x714   : > { %v3368_v28 = vadd.f32 %v3352_v20, %v3259_v61  ;;  %v3369_v27 = vadd.f32 %v3353_v5, %v3260_v60  ;;  %v3121_v38 = vpop.permute.xlu1 %3120  ;;  %v6287_v60 = vsel %vm736_vm0, 0.0, %v6091_v36  ;;  %v2781_v36 = vmul.f32 %v5882_v53, %v6277_v2 }
 0x715   : > { %v2741_v18 = vmul.f32 %v2733_v55, %v6763_v63  ;;  %v2988_v55 = vmul.f32 %v5898_v23, %v6261_v24 }
 0x716   : > { %v3466_v62 = vadd.f32 %v6174_v4, %v3369_v27  ;;  %v6283_v0 = vadd.f32 %v6190_v21, %v3368_v28  ;;  %v2780_v21 = vmul.f32 %v5882_v53, %v6287_v60  ;;  %v2878_v53 = vmul.f32 %v5868_v39, %v6277_v2 }
 0x717   : > { %v3096_v28 = vmul.f32 %v5904_v12, %v6277_v2  ;;  %v3097_v27 = vmul.f32 %v5904_v12, %v6261_v24 }
 0x718   : > { %3340 = vrot.lane.b32.xlu2 %v3310_v40, %s6713_s0  ;;  %3548 = vrot.lane.b32.xlu0 %v3517_v50, %s6715_s3  ;;  %v6295_v14 = vadd.f32 %v3559_v15, %v3466_v62  ;;  %v2890_v40 = vmul.f32 %v2878_v53, %v6844_v29  ;;  %v3410_v29 = vmul.f32 %v5965_v35, %v6287_v60 }
 0x71a   : > { %v3020_v4 = vpop.permute.xlu2 %3019  ;;  %2817 = vrot.lane.b32.xlu1 %v2782_v19, %s6699_s25  ;;  %v2804_v61 = vpop.permute.xlu0 %2803 }
 0x71b   : > { %v2821_v47 = vsel %vm777_vm6, %v6200_v51, %v2804_v61  ;;  %v2822_v25 = vsel %vm777_vm6, %v2804_v61, %v2806_v46  ;;  %v3095_v61 = vmul.f32 %v5904_v12, %v6287_v60  ;;  %v2986_v12 = vmul.f32 %v5898_v23, %v6287_v60 }
 0x71c   : > { %v2837_v43 = vadd.f32 %v2821_v47, %v2740_v11  ;;  %v2838_v58 = vadd.f32 %v2822_v25, %v2741_v18  ;;  %v3436_v59 = vpop.permute.xlu1 %3435  ;;  %v3000_v18 = vmul.f32 %v2988_v55, %v6789_v37 }
 0x71d   : > { %v2998_v53 = vmul.f32 %v2986_v12, %v6791_v33  ;;  %v3302_v12 = vmul.f32 %v5888_v48, %v6277_v2 }
 0x720   : > { %2813 = vrot.lane.b32.xlu2 %v2780_v21, %s6699_s25  ;;  %2815 = vrot.lane.b32.xlu0 %v2781_v36, %s6699_s25 }
 0x722   : > { %v3226_v51 = vpop.permute.xlu2 %3225  ;;  %3447 = vrot.lane.b32.xlu1 %v3412_v8, %s6709_s26  ;;  %v3119_v46 = vpop.permute.xlu0 %3118 }
 0x723   : > { %v3136_v3 = vsel %vm882_vm9, %v6215_v9, %v3119_v46  ;;  %v3137_v20 = vsel %vm882_vm9, %v3119_v46, %v3121_v38 }
 0x724   : > { %v3432_v5 = vpop.permute.xlu1 %3431 }
 0x728   : > { %3130 = vrot.lane.b32.xlu2 %v3096_v28, %s6708_s29  ;;  %3132 = vrot.lane.b32.xlu0 %v3097_v27, %s6708_s29 }
 0x72a   : > { %v3335_v62 = vpop.permute.xlu2 %3334  ;;  %v3434_v9 = vpop.permute.xlu0 %3433  ;;  %2924 = vrot.lane.b32.xlu1 %v2890_v40, %s6707_s27 }
 0x72b   : > { %v6320_v38 = vsel %vm984_vm12, %v3432_v5, %v3434_v9  ;;  %v3452_v50 = vsel %vm984_vm12, %v3434_v9, %v3436_v59  ;;  %v3411_v5 = vmul.f32 %v5965_v35, %v6277_v2 }
 0x72c   : > { %v2913_v42 = vpop.permute.xlu1 %2912 }
 0x72d   : > { %v2931_v19 = vsel %vm818_vm7, %v2913_v42, %v6234_v10  ;;  %v2879_v10 = vmul.f32 %v5868_v39, %v6261_v24 }
 0x72e   : > { %v2947_v11 = vadd.f32 %v2931_v19, %v2838_v58 }
 0x72f   : > { %v2891_v46 = vmul.f32 %v2879_v10, %v6845_v13  ;;  %v2877_v13 = vmul.f32 %v5868_v39, %v6287_v60 }
 0x730   : > { %3443 = vrot.lane.b32.xlu2 %v3410_v29, %s6709_s26  ;;  %3128 = vrot.lane.b32.xlu0 %v3095_v61, %s6708_s29  ;;  %v2987_v29 = vmul.f32 %v5898_v23, %v6277_v2 }
 0x731   : > { %v2889_v55 = vmul.f32 %v2877_v13, %v6847_v49 }
 0x732   : > { %v6334_v15 = vpop.permute.xlu2 %3542  ;;  %v2911_v47 = vpop.permute.xlu0 %2910  ;;  %3035 = vrot.lane.b32.xlu1 %v3000_v18, %s6710_s2  ;;  %v3303_v18 = vmul.f32 %v5888_v48, %v6261_v24 }
 0x733   : > { %v2930_v25 = vsel %vm818_vm7, %v2911_v47, %v2913_v42 }
 0x734   : > { %v2946_v58 = vadd.f32 %v2930_v25, %v2837_v43  ;;  %v3022_v59 = vpop.permute.xlu1 %3021  ;;  %v2999_v25 = vmul.f32 %v2987_v29, %v6790_v41  ;;  %v3315_v23 = vmul.f32 %v3303_v18, %v6827_v54  ;;  %v3509_v54 = vmul.f32 %v5928_v56, %v6261_v24  ;;  %v3637_v29 = vld [vmem:[%s6545_s19 + $0x18] sm:$0xff] }
 0x735   : > { %v3039_v21 = vsel %vm856_vm8, %v3020_v4, %v3022_v59  ;;  %v3040_v37 = vsel %vm856_vm8, %v3022_v59, %v6252_v16  ;;  %v3194_v16 = vmul.f32 %v5880_v17, %v6261_v24  ;;  %v3301_v59 = vmul.f32 %v5888_v48, %v6287_v60 }
 0x736   : > { %v3055_v36 = vadd.f32 %v3039_v21, %v2946_v58  ;;  %v3056_v8 = vadd.f32 %v3040_v37, %v2947_v11  ;;  %v3192_v11 = vmul.f32 %v5880_v17, %v6287_v60 }
 0x737   : > { %v3206_v42 = vmul.f32 %v3194_v16, %v6821_v44  ;;  %v3313_v37 = vmul.f32 %v3301_v59, %v6829_v26  ;;  %v3745_v59 = vld [vmem:[%s6547_s21] sm:$0xf] }
 0x738   : > { %2926 = vrot.lane.b32.xlu2 %v2891_v46, %s6707_s27  ;;  %3445 = vrot.lane.b32.xlu0 %v3411_v5, %s6709_s26  ;;  %v3152_v43 = vadd.f32 %v3136_v3, %v3055_v36  ;;  %v3153_v28 = vadd.f32 %v3137_v20, %v3056_v8  ;;  %v3193_v3 = vmul.f32 %v5880_v17, %v6277_v2  ;;  %v6849_v8 = vld [vmem:[#allocation22_spill] sm:$0xff] }
 0x739   : > { %v3204_v10 = vmul.f32 %v3192_v11, %v6820_v22  ;;  %v3314_v36 = vmul.f32 %v3302_v12, %v6828_v7  ;;  %v2734_v46 = vmul.f32 %v6849_v8, %v6140_v45  ;;  %v2735_v48 = vmul.f32 %v6849_v8, %v6144_v31  ;;  %v3635_v12 = vld [vmem:[%s6545_s19 + $0x8] sm:$0xff] }
 0x73a   : > { %v2808_v27 = vpop.permute.xlu2 %2807  ;;  %v3228_v4 = vpop.permute.xlu0 %3227  ;;  %3031 = vrot.lane.b32.xlu1 %v2998_v53, %s6710_s2  ;;  %v3205_v39 = vmul.f32 %v3193_v3, %v6819_v52  ;;  %v3507_v7 = vmul.f32 %v5928_v56, %v6287_v60  ;;  %v3508_v45 = vmul.f32 %v5928_v56, %v6277_v2  ;;  %v6851_v3 = vld [vmem:[#allocation23_spill] sm:$0xff] }
 0x73b   : > { %v3245_v35 = vsel %vm920_vm10, %v3226_v51, %v3228_v4  ;;  %v2743_v24 = vmul.f32 %v2735_v48, %v6763_v63 }
 0x73c   : > { %v3261_v40 = vadd.f32 %v3245_v35, %v3152_v43  ;;  %v3230_v9 = vpop.permute.xlu1 %3229  ;;  %v2742_v43 = vmul.f32 %v2734_v46, %v4221_v6  ;;  %v3519_v35 = vmul.f32 %v3507_v7, %v6832_v34 }
 0x73d   : > { %v3246_v33 = vsel %vm920_vm10, %v3228_v4, %v3230_v9  ;;  %v3583_v9 = vld [vmem:[%s6543_s17 + $0x8] sm:$0xff] }
 0x73e   : > { %v3262_v20 = vadd.f32 %v3246_v33, %v3153_v28 }
 0x740   : > { %3241 = vrot.lane.b32.xlu2 %v3206_v42, %s6711_s1  ;;  %2922 = vrot.lane.b32.xlu0 %v2889_v55, %s6707_s27 }
 0x742   : > { %v3127_v19 = vpop.permute.xlu2 %3126  ;;  %v3337_v51 = vpop.permute.xlu0 %3336  ;;  %3239 = vrot.lane.b32.xlu1 %v3205_v39, %s6711_s1 }
 0x743   : > { %v3354_v44 = vsel %vm958_vm11, %v3335_v62, %v3337_v51 }
 0x744   : > { %v3370_v61 = vadd.f32 %v3354_v44, %v3261_v40  ;;  %v3339_v49 = vpop.permute.xlu1 %3338  ;;  %v3520_v40 = vmul.f32 %v3508_v45, %v6831_v32 }
 0x745   : > { %v3355_v47 = vsel %vm958_vm11, %v3337_v51, %v3339_v49 }
 0x746   : > { %v3371_v52 = vadd.f32 %v3355_v47, %v3262_v20  ;;  %v6385_v22 = vadd.f32 %v6320_v38, %v3370_v61  ;;  %v3521_v38 = vmul.f32 %v3509_v54, %v6830_v30  ;;  %v6852_v20 = vld [vmem:[#allocation39_spill] sm:$0xff]  ;;  %v3582_v47 = vld [vmem:[%s6543_s17] sm:$0xff] }
 0x747   : > { %v3501_v42 = vmul.f32 %v6852_v20, %v6033_v57 }
 0x748   : > { %3237 = vrot.lane.b32.xlu2 %v3204_v10, %s6711_s1  ;;  %3033 = vrot.lane.b32.xlu0 %v2999_v25, %s6710_s2  ;;  %v3468_v17 = vadd.f32 %v3452_v50, %v3371_v52  ;;  %v3634_v25 = vld [vmem:[%s6545_s19] sm:$0xff]  ;;  %s6856_s2 = sshll.u32 %s6859_s30, 3 }
 0x749   : > { %v3513_v11 = vmul.f32 %v3501_v42, %v6832_v34  ;;  %s723_s12 = scalar_lea.vmem %s6549_s23, %s6856_s2 }
 0x74a   : > { %v3123_v62 = vpop.permute.xlu2 %3122  ;;  %v3545_v58 = vpop.permute.xlu0 %3544  ;;  %3350 = vrot.lane.b32.xlu1 %v3315_v23, %s6713_s0 }
 0x74b   : > { %v3561_v41 = vsel %vm1022_vm13, %v6334_v15, %v3545_v58 }
 0x74c   : > { %v6389_v21 = vadd.f32 %v3561_v41, %v3468_v17  ;;  %v2812_v50 = vpop.permute.xlu1 %2811 }
 0x750   : > { %3346 = vrot.lane.b32.xlu2 %v3313_v37, %s6713_s0  ;;  %3348 = vrot.lane.b32.xlu0 %v3314_v36, %s6713_s0 }
 0x752   : > { %v3438_v5 = vpop.permute.xlu2 %3437  ;;  %v2810_v26 = vpop.permute.xlu0 %2809  ;;  %3556 = vrot.lane.b32.xlu1 %v3521_v38, %s6715_s3 }
 0x753   : > { %v2823_v31 = vsel %vm777_vm6, %v2808_v27, %v2810_v26  ;;  %v2824_v53 = vsel %vm777_vm6, %v2810_v26, %v2812_v50  ;;  %v6850_v27 = vld [vmem:[#allocation48_spill] sm:$0xff] }
 0x754   : > { %v2839_v28 = vadd.f32 %v2823_v31, %v2742_v43  ;;  %v2840_v30 = vadd.f32 %v2824_v53, %v2743_v24  ;;  %v3125_v4 = vpop.permute.xlu1 %3124  ;;  %v3498_v33 = vmul.f32 %v6851_v3, %v6850_v27 }
 0x755   : > { %v3138_v16 = vsel %vm882_vm9, %v3123_v62, %v3125_v4  ;;  %v3139_v13 = vsel %vm882_vm9, %v3125_v4, %v3127_v19 }
 0x756   : > { %v3510_v51 = vmul.f32 %v3498_v33, %v6832_v34  ;;  %v3636_v34 = vld [vmem:[%s6545_s19 + $0x10] sm:$0xff] }
 0x758   : > { %3552 = vrot.lane.b32.xlu2 %v3519_v35, %s6715_s3  ;;  %3554 = vrot.lane.b32.xlu0 %v3520_v40, %s6715_s3 }
 0x75a   : > { %v3440_v56 = vpop.permute.xlu0 %3439  ;;  %3593 = vperm.xlu1 %4052, %v3583_v9   ;;  %v2921_v55 = vpop.permute.xlu2 %2920 }
 0x75b   : > { %v3453_v39 = vsel %vm984_vm12, %v3438_v5, %v3440_v56 }
 0x75c   : > { %v3442_v32 = vpop.permute.xlu1 %3441 }
 0x75d   : > { %v3454_v19 = vsel %vm984_vm12, %v3440_v56, %v3442_v32 }
 0x760   : > { %3534 = vrot.lane.b32.xlu2 %v3510_v51, %s6715_s3  ;;  %3540 = vrot.lane.b32.xlu0 %v3513_v11, %s6715_s3 }
 0x762   : > { %v2917_v44 = vpop.permute.xlu0 %2916  ;;  %3655 = vperm.xlu1 %4052, %v3637_v29   ;;  %v3028_v61 = vpop.permute.xlu2 %3027 }
 0x764   : > { %v2919_v57 = vpop.permute.xlu1 %2918 }
 0x765   : > { %v2932_v49 = vsel %vm818_vm7, %v2917_v44, %v2919_v57  ;;  %v2933_v18 = vsel %vm818_vm7, %v2919_v57, %v2921_v55 }
 0x766   : > { %v2948_v52 = vadd.f32 %v2932_v49, %v2839_v28  ;;  %v2949_v10 = vadd.f32 %v2933_v18, %v2840_v30  ;;  %v6853_v49 = vld [vmem:[#allocation3_spill] sm:$0xff] }
 0x767   : > { %v2736_v18 = vmul.f32 %v6853_v49, %v6287_v60 }
 0x768   : > { %3650 = vperm.xlu2 %4053, %v3636_v34   ;;  %3588 = vperm.xlu0 %4054, %v3582_v47   ;;  %v2737_v34 = vmul.f32 %v6853_v49, %v6277_v2 }
 0x76a   : > { %v3030_v17 = vpop.permute.xlu0 %3029  ;;  %3640 = vperm.xlu1 %4052, %v3634_v25   ;;  %v3232_v50 = vpop.permute.xlu2 %3231 }
 0x76b   : > { %v3042_v23 = vsel %vm856_vm8, %v3028_v61, %v3030_v17 }
 0x76c   : > { %v3058_v62 = vadd.f32 %v3042_v23, %v2949_v10  ;;  %v3236_v58 = vpop.permute.xlu1 %3235  ;;  %v2744_v23 = vmul.f32 %v2736_v18, %v4221_v6 }
 0x76e   : > { %v3155_v41 = vadd.f32 %v3139_v13, %v3058_v62  ;;  %v2745_v62 = vmul.f32 %v2737_v34, %v6763_v63 }
 0x770   : > { %3748 = vperm.xlu2 %4053, %v3745_v59   ;;  %3645 = vperm.xlu0 %4054, %v3635_v12  }
 0x772   : > { %v3026_v54 = vpop.permute.xlu0 %3025  ;;  %v3341_v48 = vpop.permute.xlu2 %3340 }
 0x773   : > { %v3041_v37 = vsel %vm856_vm8, %v3026_v54, %v3028_v61 }
 0x774   : > { %v3057_v36 = vadd.f32 %v3041_v37, %v2948_v52  ;;  %v3345_v8 = vpop.permute.xlu1 %3344 }
 0x776   : > { %v3154_v46 = vadd.f32 %v3138_v16, %v3057_v36 }
 0x77a   : > { %v3234_v38 = vpop.permute.xlu0 %3233  ;;  %v2814_v31 = vpop.permute.xlu2 %2813 }
 0x77b   : > { %v3247_v5 = vsel %vm920_vm10, %v3232_v50, %v3234_v38  ;;  %v3248_v43 = vsel %vm920_vm10, %v3234_v38, %v3236_v58 }
 0x77c   : > { %v3263_v24 = vadd.f32 %v3247_v5, %v3154_v46  ;;  %v3264_v26 = vadd.f32 %v3248_v43, %v3155_v41  ;;  %v3551_v7 = vpop.permute.xlu1 %3550 }
 0x782   : > { %v3343_v45 = vpop.permute.xlu0 %3342  ;;  %v3131_v20 = vpop.permute.xlu2 %3130 }
 0x783   : > { %v3356_v53 = vsel %vm958_vm11, %v3341_v48, %v3343_v45  ;;  %v3357_v28 = vsel %vm958_vm11, %v3343_v45, %v3345_v8 }
 0x784   : > { %v3372_v30 = vadd.f32 %v3356_v53, %v3263_v24  ;;  %v3373_v4 = vadd.f32 %v3357_v28, %v3264_v26  ;;  %v3547_v13 = vpop.permute.xlu1 %3546 }
 0x786   : > { %v3469_v35 = vadd.f32 %v3453_v39, %v3372_v30  ;;  %v3470_v16 = vadd.f32 %v3454_v19, %v3373_v4 }
 0x78a   : > { %v3549_v40 = vpop.permute.xlu0 %3548  ;;  %v3444_v32 = vpop.permute.xlu2 %3443 }
 0x78b   : > { %v3562_v9 = vsel %vm1022_vm13, %v3547_v13, %v3549_v40  ;;  %v3563_v56 = vsel %vm1022_vm13, %v3549_v40, %v3551_v7 }
 0x78c   : > { %v3578_v27 = vadd.f32 %v3562_v9, %v3469_v35  ;;  %v3579_v3 = vadd.f32 %v3563_v56, %v3470_v16  ;;  %v2818_v33 = vpop.permute.xlu1 %2817 }
 0x792   : > { %v2816_v42 = vpop.permute.xlu0 %2815  ;;  %v2927_v29 = vpop.permute.xlu2 %2926 }
 0x793   : > { %v2825_v10 = vsel %vm777_vm6, %v2814_v31, %v2816_v42  ;;  %v2826_v25 = vsel %vm777_vm6, %v2816_v42, %v2818_v33  ;;  %v6854_v42 = vld [vmem:[#allocation27_spill] sm:$0xff] }
 0x794   : > { %v3448_v55 = vpop.permute.xlu1 %3447  ;;  %v2841_v12 = vadd.f32 %v2825_v10, %v2744_v23  ;;  %v2842_v60 = vadd.f32 %v2826_v25, %v2745_v62 }
 0x79a   : > { %v3133_v51 = vpop.permute.xlu0 %3132  ;;  %v3242_v39 = vpop.permute.xlu2 %3241 }
 0x79b   : > { %v3141_v6 = vsel %vm882_vm9, %v3131_v20, %v3133_v51  ;;  %v3610_v51 = vadd.f32 %v6854_v42, %v3578_v27 }
 0x79c   : > { %v2925_v11 = vpop.permute.xlu1 %2924 }
 0x79d   : > { %v2935_v58 = vsel %vm818_vm7, %v2925_v11, %v2927_v29  ;;  %v3618_v18 = vmax.f32 %v3610_v51, 0.0 }
 0x79e   : > { %v2951_v41 = vadd.f32 %v2935_v58, %v2842_v60 }
 0x79f   : > { %v3626_v23 = vmin.f32 %v3618_v18, 6.0  ;;  %v3744_v18 = vld [vmem:[%s6546_s20] sm:$0xf] }
 0x7a2   : > { %v3129_v44 = vpop.permute.xlu0 %3128  ;;  %v3238_v17 = vpop.permute.xlu2 %3237 }
 0x7a3   : > { %v3140_v63 = vsel %vm882_vm9, %v3129_v44, %v3131_v20 }
 0x7a4   : > { %v3036_v57 = vpop.permute.xlu1 %3035 }
 0x7aa   : > { %v3446_v61 = vpop.permute.xlu0 %3445  ;;  %v3347_v48 = vpop.permute.xlu2 %3346 }
 0x7ab   : > { %v3455_v13 = vsel %vm984_vm12, %v3444_v32, %v3446_v61  ;;  %v3456_v35 = vsel %vm984_vm12, %v3446_v61, %v3448_v55 }
 0x7ac   : > { %v3032_v19 = vpop.permute.xlu1 %3031 }
 0x7b2   : > { %v2923_v47 = vpop.permute.xlu0 %2922  ;;  %v3553_v16 = vpop.permute.xlu2 %3552 }
 0x7b3   : > { %v2934_v59 = vsel %vm818_vm7, %v2923_v47, %v2925_v11  ;;  %v3611_v11 = vadd.f32 %v6854_v42, %v3579_v3 }
 0x7b4   : > { %v3240_v52 = vpop.permute.xlu1 %3239  ;;  %v2950_v50 = vadd.f32 %v2934_v59, %v2841_v12 }
 0x7b5   : > { %v3249_v24 = vsel %vm920_vm10, %v3238_v17, %v3240_v52  ;;  %v3250_v26 = vsel %vm920_vm10, %v3240_v52, %v3242_v39  ;;  %v6855_v39 = vld [vmem:[#allocation43_spill] sm:$0xff]  ;;  %v3619_v34 = vmax.f32 %v3611_v11, 0.0 }
 0x7b7   : > { %v3627_v62 = vmin.f32 %v3619_v34, 6.0 }
 0x7ba   : > { %v3034_v2 = vpop.permute.xlu0 %3033  ;;  %v3535_v27 = vpop.permute.xlu2 %3534 }
 0x7bb   : > { %v3043_v54 = vsel %vm856_vm8, %v3032_v19, %v3034_v2  ;;  %v3044_v37 = vsel %vm856_vm8, %v3034_v2, %v3036_v57 }
 0x7bc   : > { %v3059_v36 = vadd.f32 %v3043_v54, %v2950_v50  ;;  %v3060_v8 = vadd.f32 %v3044_v37, %v2951_v41  ;;  %v3351_v46 = vpop.permute.xlu1 %3350 }
 0x7be   : > { %v3156_v38 = vadd.f32 %v3140_v63, %v3059_v36  ;;  %v3157_v5 = vadd.f32 %v3141_v6, %v3060_v8  ;;  %v3633_v8 = vld [vmem:[%s6544_s18 + $0x18] sm:$0xff] }
 0x7c0   : > { %v3265_v31 = vadd.f32 %v3249_v24, %v3156_v38  ;;  %v3266_v53 = vadd.f32 %v3250_v26, %v3157_v5 }
 0x7c2   : > { %v3349_v43 = vpop.permute.xlu0 %3348  ;;  %v3651_v24 = vpop.permute.xlu2 %3650 }
 0x7c3   : > { %v3358_v7 = vsel %vm958_vm11, %v3347_v48, %v3349_v43  ;;  %v3359_v45 = vsel %vm958_vm11, %v3349_v43, %v3351_v46 }
 0x7c4   : > { %v3557_v28 = vpop.permute.xlu1 %3556  ;;  %v3374_v30 = vadd.f32 %v3358_v7, %v3265_v31  ;;  %v3375_v4 = vadd.f32 %v3359_v45, %v3266_v53 }
 0x7c6   : > { %v3471_v9 = vadd.f32 %v3455_v13, %v3374_v30  ;;  %v3472_v56 = vadd.f32 %v3456_v35, %v3375_v4 }
 0x7ca   : > { %v3555_v40 = vpop.permute.xlu0 %3554  ;;  %v3749_v34 = vpop.permute.xlu2 %3748 }
 0x7cb   : > { %v3564_v33 = vsel %vm1022_vm13, %v3553_v16, %v3555_v40  ;;  %v3565_v20 = vsel %vm1022_vm13, %v3555_v40, %v3557_v28 }
 0x7cc   : > { %v3580_v29 = vadd.f32 %v3564_v33, %v3471_v9  ;;  %v3581_v44 = vadd.f32 %v3565_v20, %v3472_v56  ;;  %v3594_v57 = vpop.permute.xlu1 %3593 }
 0x7cd   : > { %v3609_v55 = vadd.f32 %v3594_v57, %v6389_v21  ;;  %v3558_v21 = vsel %vm1022_vm13, %v3535_v27, %v6225_v1  ;;  %v3630_v1 = vld [vmem:[%s6544_s18] sm:$0xff] }
 0x7ce   : > { %v3612_v19 = vadd.f32 %v6855_v39, %v3580_v29  ;;  %v3613_v32 = vadd.f32 %v6855_v39, %v3581_v44  ;;  %v3574_v60 = vadd.f32 %v3558_v21, %v6283_v0  ;;  %v3631_v0 = vld [vmem:[%s6544_s18 + $0x8] sm:$0xff] }
 0x7cf   : > { %v3617_v10 = vmax.f32 %v3609_v55, 0.0 }
 0x7d0   : > { %v3620_v61 = vmax.f32 %v3612_v19, 0.0  ;;  %v3621_v49 = vmax.f32 %v3613_v32, 0.0 }
 0x7d1   : > { %v3625_v58 = vmin.f32 %v3617_v10, 6.0 }
 0x7d2   : > { %v3628_v47 = vmin.f32 %v3620_v61, 6.0  ;;  %v3629_v52 = vmin.f32 %v3621_v49, 6.0  ;;  %v3541_v25 = vpop.permute.xlu0 %3540 }
 0x7d3   : > { %v3560_v3 = vsel %vm1022_vm13, %v3541_v25, %v6334_v15 }
 0x7d4   : > { %v3576_v17 = vadd.f32 %v3560_v3, %v6385_v22  ;;  %3682 = vmatpush.msra.mxu0 %v3628_v47  ;;  %3711 = vmatpush.msra.mxu1 %v3629_v52  ;;  %v3656_v38 = vpop.permute.xlu1 %3655 }
 0x7d6   : > { %v3608_v59 = vadd.f32 %v3594_v57, %v3576_v17  ;;  %3683 = vmatpush.msra.mxu0 %v3626_v23  ;;  %3712 = vmatpush.msra.mxu1 %v3627_v62 }
 0x7d8   : > { %3713 = vmatpush.msra.mxu1 %v3625_v58  ;;  %v3616_v12 = vmax.f32 %v3608_v59, 0.0 }
 0x7da   : > { %v3589_v41 = vpop.permute.xlu0 %3588  ;;  %v3624_v50 = vmin.f32 %v3616_v12, 6.0 }
 0x7db   : > { %v3606_v15 = vadd.f32 %v3589_v41, %v3574_v60  ;;  %v3607_v22 = vadd.f32 %v3589_v41, %v6295_v14  ;;  %v3632_v14 = vld [vmem:[%s6544_s18 + $0x10] sm:$0xff] }
 0x7dc   : > { %3684 = vmatpush.msra.mxu0 %v3624_v50  ;;  %v3641_v28 = vpop.permute.xlu1 %3640 }
 0x7dd   : > { %v3614_v2 = vmax.f32 %v3606_v15, 0.0  ;;  %v3615_v54 = vmax.f32 %v3607_v22, 0.0 }
 0x7df   : > { %v3622_v37 = vmin.f32 %v3614_v2, 6.0  ;;  %v3623_v36 = vmin.f32 %v3615_v54, 6.0 }
 0x7e1   : > { %3685 = vmatpush.msra.mxu0 %v3622_v37  ;;  %3714 = vmatpush.msra.mxu1 %v3623_v36 }
 0x7e2   : > { %4014 = vmatmul.msk.f32.vlgmr.msra.gmra.mxu0 %vm941_vm4, %v3630_v1  ;;  %4018 = vmatmul.msk.f32.vlgmr.msra.gmra.mxu1 %vm941_vm4, %v3630_v1  ;;  %v3646_v26 = vpop.permute.xlu0 %3645 }
 0x7ea   : > { %4015 = vmatmul.msk.f32.gmra.mxu0 %vm941_vm4, %v3631_v0  ;;  %4019 = vmatmul.msk.f32.gmra.mxu1 %vm941_vm4, %v3631_v0 }
 0x7f2   : > { %4016 = vmatmul.msk.f32.gmra.mxu0 %vm941_vm4, %v3632_v14  ;;  %4020 = vmatmul.msk.f32.gmra.mxu1 %vm941_vm4, %v3632_v14 }
 0x7fa   : > { %4017 = vmatmul.msk.f32.gmra.mxu0 %vm941_vm4, %v3633_v8  ;;  %4021 = vmatmul.msk.f32.gmra.mxu1 %vm941_vm4, %v3633_v8 }
 0x85f   : > { %v3687_v46 = vpop.f32.mrf.mxu0  ;;  %v3716_v6 = vpop.f32.mrf.mxu1 }
 0x860   : > { %v3688_v16 = vadd.f32 %v3687_v46, %v3641_v28  ;;  %v3717_v40 = vadd.f32 %v3716_v6, %v3641_v28 }
 0x862   : > { %v3728_v44 = vmax.f32 %v3688_v16, 0.0  ;;  %v3729_v57 = vmax.f32 %v3717_v40, 0.0 }
 0x864   : > { %v3736_v61 = vmin.f32 %v3728_v44, 6.0  ;;  %v3737_v49 = vmin.f32 %v3729_v57, 6.0 }
 0x867   : > { %v3690_v63 = vpop.f32.mrf.mxu0  ;;  %v3719_v48 = vpop.f32.mrf.mxu1 }
 0x868   : > { %v3691_v30 = vadd.f32 %v3690_v63, %v3646_v26  ;;  %v3720_v4 = vadd.f32 %v3719_v48, %v3646_v26 }
 0x86a   : > { %v3730_v42 = vmax.f32 %v3691_v30, 0.0  ;;  %v3731_v51 = vmax.f32 %v3720_v4, 0.0 }
 0x86c   : > { %v3738_v32 = vmin.f32 %v3730_v42, 6.0  ;;  %v3739_v55 = vmin.f32 %v3731_v51, 6.0 }
 0x86f   : > { %v3693_v5 = vpop.f32.mrf.mxu0  ;;  %v3722_v43 = vpop.f32.mrf.mxu1 }
 0x870   : > { %v3694_v7 = vadd.f32 %v3693_v5, %v3651_v24  ;;  %v3723_v45 = vadd.f32 %v3722_v43, %v3651_v24 }
 0x872   : > { %v3732_v9 = vmax.f32 %v3694_v7, 0.0  ;;  %v3733_v56 = vmax.f32 %v3723_v45, 0.0 }
 0x874   : > { %v3740_v39 = vmin.f32 %v3732_v9, 6.0  ;;  %v3741_v19 = vmin.f32 %v3733_v56, 6.0 }
 0x877   : > { %v3696_v31 = vpop.f32.mrf.mxu0  ;;  %v3725_v53 = vpop.f32.mrf.mxu1 }
 0x878   : > { %v3697_v13 = vadd.f32 %v3696_v31, %v3656_v38  ;;  %v3726_v35 = vadd.f32 %v3725_v53, %v3656_v38 }
 0x87a   : > { %v3734_v33 = vmax.f32 %v3697_v13, 0.0  ;;  %v3735_v20 = vmax.f32 %v3726_v35, 0.0 }
 0x87c   : > { %v3742_v11 = vmin.f32 %v3734_v33, 6.0  ;;  %v3743_v29 = vmin.f32 %v3735_v20, 6.0 }
 0x87e   : > { %3766 = vmatpush.msra.mxu2 %v3742_v11  ;;  %3786 = vmatpush.msra.mxu3 %v3743_v29 }
 0x880   : > { %3767 = vmatpush.msra.mxu2 %v3740_v39  ;;  %3787 = vmatpush.msra.mxu3 %v3741_v19 }
 0x882   : > { %3768 = vmatpush.msra.mxu2 %v3738_v32  ;;  %3788 = vmatpush.msra.mxu3 %v3739_v55 }
 0x884   : > { %3769 = vmatpush.msra.mxu2 %v3736_v61  ;;  %3789 = vmatpush.msra.mxu3 %v3737_v49 }
 0x885   : > { %4022 = vmatmul.msk.f32.vlgmr.msra.gmra.mxu2 %vm941_vm4, %v3744_v18  ;;  %4023 = vmatmul.msk.f32.vlgmr.msra.gmra.mxu3 %vm941_vm4, %v3744_v18 }
 0x908   : > { %v3771_v47 = vpop.f32.mrf.mxu2  ;;  %v3791_v52 = vpop.f32.mrf.mxu3 }
 0x909   : > { %v3772_v10 = vadd.f32 %v3771_v47, %v3749_v34  ;;  %v3792_v25 = vadd.f32 %v3791_v52, %v3749_v34 }
 0x90b   : > { %v3794_v27 = vmax.f32 %v3772_v10, 0.0  ;;  %v3795_v3 = vmax.f32 %v3792_v25, 0.0 }
 0x90d   : > { %v3797_v17 = vmul.f32 16.0, %v3795_v3  ;;  %v3796_v23 = vmul.f32 16.0, %v3794_v27 }
 0x90f   : > { %v3800_v62 = vrot.slane %v3797_v17, 4 }
 0x911   : > { %v3801_v21 = vsel %vm1082_vm14, %v3796_v23, %v3800_v62 }
 0x912   : > { %3803 = vst [vmem:[%s723_s12] sm:$0xff] %v3801_v21 }
 0x913 PF: > { %s6857_s3 = sld [smem:[#allocation2_spill]] }
 0x919   : > { %s34_s4 = sadd.s32 1, %s6857_s3  }
 0x91a   : > { %p31_p4 = scmp.ge.s32.totalorder %s34_s4, 4  }
 0x91c   :  { %33 = sbr.rel (!%p31_p4) target bundleno = 14 (0xe), region = 183 }

</bundles_post_ra>
